<compile_context>
chip_gen: v7x
topology: tpu7x:2x2x1
jax: 0.10.0
libtpu: 0.0.40
codegen_flags: <defaults>
</compile_context>

<pallas_src>
import functools
from typing import NamedTuple

import numpy as np

import jax
import jax.numpy as jnp
from jax.experimental import pallas as pl
from jax.experimental.pallas import tpu as pltpu


# Keep the propagated embedding table fully VMEM-resident (single pinned copy,
# no double-buffering) when its f32 footprint is at most this many bytes.
# 32 MiB resident + ~7 MiB of pipeline buffers stays under the 48 MiB limit
# (safe on v7x's 64 MiB/TC; ample headroom on v5e/v6e's 128 MiB).
_H_RESIDENT_BYTES = 32 * 1024 * 1024
_VMEM_LIMIT_BYTES = 48 * 1024 * 1024


class BlockCSR(NamedTuple):
    blocks: jax.Array      # (n_blk, tile, tile) int8 — packed nonzero adj blocks
    row_ids: jax.Array     # (n_blk,) int32 — row-block id of each packed block
    col_ids: jax.Array     # (n_blk,) int32 — col-block id of each packed block
    row_first: jax.Array   # (n_blk,) int32 — 1 iff first block of its row
    row_last: jax.Array    # (n_blk,) int32 — 1 iff last block of its row
    scales: jax.Array      # (n_blk,) float32 — per-block int8 dequant scale


# ---------------------------------------------------------------------------
# Host-side block-CSR construction (runs ONCE, outside the forward pass).
# ---------------------------------------------------------------------------
def build_block_csr(adj):
    """Convert a dense (possibly sparse-structured) adjacency into block-CSR.

    Rows with no nonzero block get a single all-zero block so that every
    output row-block is still produced by the kernel.
    Returns (BlockCSR, tile, n_pad).
    """
    adj_np = np.asarray(jax.device_get(adj), dtype=np.float32)
    n = adj_np.shape[0]

    # tile >= 512 always (per-grid-step overhead ~0.35us dominates smaller
    # tiles); 1024 for large graphs.
    tile = 1024 if n > 8192 else 512
    n_pad = ((n + tile - 1) // tile) * tile
    nib = n_pad // tile

    a = np.zeros((n_pad, n_pad), dtype=np.float32)
    a[:n, :n] = adj_np
    blocks4 = a.reshape(nib, tile, nib, tile).transpose(0, 2, 1, 3)  # (nib,nib,t,t)
    absmax = np.abs(blocks4).max(axis=(2, 3))                        # (nib, nib)
    mask = absmax > 0.0

    packed, scales = [], []
    row_ids, col_ids, first, last = [], [], [], []
    for i in range(nib):
        cols = np.nonzero(mask[i])[0]
        if len(cols) == 0:
            # Insert a zero block so this row-block's outputs get written.
            packed.append(np.zeros((tile, tile), dtype=np.int8))
            scales.append(1.0)
            row_ids.append(i); col_ids.append(0); first.append(1); last.append(1)
            continue
        for j, c in enumerate(cols):
            sc = float(absmax[i, c]) / 127.0
            q = np.clip(np.rint(blocks4[i, c] / sc), -127, 127).astype(np.int8)
            packed.append(q)
            scales.append(sc)
            row_ids.append(i)
            col_ids.append(int(c))
            first.append(1 if j == 0 else 0)
            last.append(1 if j == len(cols) - 1 else 0)

    bsr = BlockCSR(
        blocks=jnp.asarray(np.stack(packed, axis=0)),                     # int8
        row_ids=jnp.asarray(np.asarray(row_ids, dtype=np.int32)),
        col_ids=jnp.asarray(np.asarray(col_ids, dtype=np.int32)),
        row_first=jnp.asarray(np.asarray(first, dtype=np.int32)),
        row_last=jnp.asarray(np.asarray(last, dtype=np.int32)),
        scales=jnp.asarray(np.asarray(scales, dtype=np.float32)),
    )
    return bsr, tile, n_pad


# ---------------------------------------------------------------------------
# Kernel 1: one propagation layer over the flat list of nonzero adj blocks.
#   For each row-block r:  h_new[r] = sum_c scale[b] * (int8_block[b] @ h[c])
#   Epilogue (fused):      h_out[r] = h_new[r]          (f32, skipped last layer)
#                          s_out[r] = (s[r] + h_new[r]) * out_scale   (f32)
# ---------------------------------------------------------------------------
def _make_spmm_kernel(tile, h_resident, out_scale, write_h):
    def kernel(row_ref, col_ref, first_ref, last_ref,        # SMEM prefetch
               a_ref, h_ref, s_ref, scales_ref, *rest):      # inputs (+SMEM scales)
        rest = list(rest)
        h_out_ref = rest.pop(0) if write_h else None
        s_out_ref = rest.pop(0)
        h_vmem = rest.pop(0) if h_resident else None
        acc_ref = rest.pop(0)
        copy_sem = rest.pop(0) if h_resident else None

        b = pl.program_id(0)

        if h_resident:
            # One-time pinned copy of the whole (n_pad, d) f32 h table into a
            # persistent VMEM scratch (no double-buffering, no re-fetch).
            @pl.when(b == 0)
            def _():
                cp = pltpu.make_async_copy(h_ref, h_vmem, copy_sem)
                cp.start()
                cp.wait()

        @pl.when(first_ref[b] == 1)
        def _():
            acc_ref[...] = jnp.zeros_like(acc_ref)

        # int8 -> bf16 is exact (|q| <= 127); per-block scale applied to the
        # (tile, d) dot result (cheaper than dequantizing the tile^2 block).
        a_blk = a_ref[0].astype(jnp.bfloat16)
        if h_resident:
            start = pl.multiple_of(col_ref[b] * tile, tile)
            h_blk = h_vmem[pl.ds(start, tile), :].astype(jnp.bfloat16)
        else:
            h_blk = h_ref[...].astype(jnp.bfloat16)
        acc_ref[...] += scales_ref[b] * jnp.dot(
            a_blk, h_blk, preferred_element_type=jnp.float32)

        @pl.when(last_ref[b] == 1)
        def _():
            h_new = acc_ref[...]
            if write_h:
                h_out_ref[...] = h_new
            s_out_ref[...] = (s_ref[...] + h_new) * out_scale

    return kernel


def _propagate_layer(bsr, h, s, *, tile, n_pad, d, scale, h_resident, write_h):
    n_blk = bsr.blocks.shape[0]

    def adj_idx(b, row, col, first, last):
        return (b, 0, 0)

    def row_idx(b, row, col, first, last):
        return (row[b], 0)

    def col_idx(b, row, col, first, last):
        return (col[b], 0)

    adj_kwargs = {}
    if n_blk >= 4:
        # Deeper buffering hides the per-row epilogue writeback behind the
        # next row's first adjacency DMA.
        adj_kwargs["pipeline_mode"] = pl.Buffered(3)
    adj_spec = pl.BlockSpec((1, tile, tile), adj_idx, **adj_kwargs)

    if h_resident:
        h_spec = pl.BlockSpec(memory_space=pl.ANY)        # raw HBM ref, manual DMA
    else:
        h_spec = pl.BlockSpec((tile, d), col_idx)         # per-block stripe fetch

    s_spec = pl.BlockSpec((tile, d), row_idx)
    scales_spec = pl.BlockSpec(memory_space=pltpu.MemorySpace.SMEM)

    if write_h:
        out_specs = [pl.BlockSpec((tile, d), row_idx),
                     pl.BlockSpec((tile, d), row_idx)]
        out_shape = (jax.ShapeDtypeStruct((n_pad, d), jnp.float32),
                     jax.ShapeDtypeStruct((n_pad, d), jnp.float32))
    else:
        out_specs = pl.BlockSpec((tile, d), row_idx)
        out_shape = jax.ShapeDtypeStruct((n_pad, d), jnp.float32)

    scratch = []
    if h_resident:
        scratch.append(pltpu.VMEM((n_pad, d), jnp.float32))   # pinned h copy
    scratch.append(pltpu.VMEM((tile, d), jnp.float32))        # row accumulator
    if h_resident:
        scratch.append(pltpu.SemaphoreType.DMA(()))

    grid_spec = pltpu.PrefetchScalarGridSpec(
        num_scalar_prefetch=4,
        grid=(n_blk,),
        in_specs=[adj_spec, h_spec, s_spec, scales_spec],
        out_specs=out_specs,
        scratch_shapes=scratch,
    )

    adj_bytes = int(bsr.blocks.size)                                    # int8
    h_bytes = int(n_pad) * d * 4 if h_resident else int(n_blk) * tile * d * 4
    out_bytes = (2 if write_h else 1) * int(n_pad) * d * 4
    cost = pl.CostEstimate(
        flops=2 * int(n_blk) * tile * tile * d,
        transcendentals=0,
        bytes_accessed=adj_bytes + h_bytes + int(n_pad) * d * 4 + out_bytes,
    )

    result = pl.pallas_call(
        _make_spmm_kernel(tile, h_resident, scale, write_h),
        out_shape=out_shape,
        grid_spec=grid_spec,
        compiler_params=pltpu.CompilerParams(
            dimension_semantics=("arbitrary",),
            vmem_limit_bytes=_VMEM_LIMIT_BYTES,
        ),
        cost_estimate=cost,
    )(bsr.row_ids, bsr.col_ids, bsr.row_first, bsr.row_last,
      bsr.blocks, h, s, bsr.scales)

    if write_h:
        h_new, s_new = result
        return h_new, s_new
    return None, result


def lightgcn_propagate(bsr, embeds_pad, n_layers, *, tile, n_pad):
    d = embeds_pad.shape[1]
    if n_layers == 0:
        return embeds_pad
    h = embeds_pad                       # f32 carry (cast to bf16 only at MXU)
    s = embeds_pad                       # running layer-sum, f32
    h_resident = (n_pad * d * 4) <= _H_RESIDENT_BYTES
    for layer in range(n_layers):
        is_last = layer == n_layers - 1
        scale = 1.0 / float(n_layers + 1) if is_last else 1.0
        h, s = _propagate_layer(bsr, h, s, tile=tile, n_pad=n_pad, d=d,
                                scale=scale, h_resident=h_resident,
                                write_h=not is_last)
    return s  # already averaged over the (n_layers + 1) embeddings


# ---------------------------------------------------------------------------
# Kernel 2: edge scoring  1 + 4*sigmoid(sum_d h[u]*h[v]), lane-dense output.
# ---------------------------------------------------------------------------
def _score_kernel(hu_ref, hv_ref, o_ref):
    sc = jnp.sum(hu_ref[...] * hv_ref[...], axis=1)          # (bb,)
    o_ref[...] = (1.0 + 4.0 * jax.nn.sigmoid(sc))[None, :]   # lane-dense row


def edge_scores(hu, hv):
    b, d = hu.shape
    bb = 512 if b >= 512 else 128
    b_pad = ((b + bb - 1) // bb) * bb
    if b_pad != b:
        hu = jnp.pad(hu, ((0, b_pad - b), (0, 0)))
        hv = jnp.pad(hv, ((0, b_pad - b), (0, 0)))
    out = pl.pallas_call(
        _score_kernel,
        out_shape=jax.ShapeDtypeStruct((1, b_pad), jnp.float32),
        grid=(b_pad // bb,),
        in_specs=[pl.BlockSpec((bb, d), lambda j: (j, 0)),
                  pl.BlockSpec((bb, d), lambda j: (j, 0))],
        out_specs=pl.BlockSpec((1, bb), lambda j: (0, j)),
        compiler_params=pltpu.CompilerParams(
            dimension_semantics=("parallel",)),
    )(hu, hv)
    return out[0, :b]


# ---------------------------------------------------------------------------
# Device-side LightGCN forward (eval mode) — jittable; BSR built once outside.
# ---------------------------------------------------------------------------
def lightgcn_forward_device(bsr, embeds_pad, u_idx, v_idx, *,
                            n_layers, tile, n_pad):
    h = lightgcn_propagate(bsr, embeds_pad, n_layers, tile=tile, n_pad=n_pad)
    hu = jnp.take(h, u_idx, axis=0)      # plain-JAX gather glue (small B)
    hv = jnp.take(h, v_idx, axis=0)
    return edge_scores(hu, hv)


# ---------------------------------------------------------------------------
# Pure-JAX reference for the correctness check
# ---------------------------------------------------------------------------
def lightgcn_forward_ref(adj, embeds, u_idx, v_idx, n_layers):
    h = embeds
    embs = [h]
    for _ in range(n_layers):
        h = adj @ h
        embs.append(h)
    h = jnp.stack(embs, 0).mean(0)
    scores = jnp.sum(h[u_idx] * h[v_idx], axis=1)
    return 1.0 + 4.0 * jax.nn.sigmoid(scores)


if __name__ == "__main__":
    key = jax.random.PRNGKey(0)
    k_emb, k_adj, k_u, k_v = jax.random.split(key, 4)

    N = 300          # num nodes (users + items), deliberately non-tile-multiple
    D = 128          # embedding dim
    n_layers = 2
    B = 16           # number of (u, v) edges to score

    # deterministic "initial_embeds" (module __init__ buffer)
    embeds = jax.random.normal(k_emb, (N, D), dtype=jnp.float32) * 0.1

    # deterministic symmetric, degree-normalized sparse adjacency (~5% dense)
    a = (jax.random.uniform(k_adj, (N, N)) < 0.05).astype(jnp.float32)
    a = jnp.maximum(a, a.T)
    deg = jnp.clip(a.sum(axis=1), 1.0, None)
    d_inv_sqrt = 1.0 / jnp.sqrt(deg)
    adj = a * d_inv_sqrt[:, None] * d_inv_sqrt[None, :]

    u_idx = jax.random.randint(k_u, (B,), 0, N)
    v_idx = jax.random.randint(k_v, (B,), 0, N)

    # One-time host-side preprocessing (hoisted out of the forward pass).
    bsr, tile, n_pad = build_block_csr(adj)
    embeds_pad = jnp.zeros((n_pad, D), jnp.float32).at[:N, :].set(embeds)

    fwd = jax.jit(functools.partial(
        lightgcn_forward_device, n_layers=n_layers, tile=tile, n_pad=n_pad))
    out = jax.block_until_ready(fwd(bsr, embeds_pad, u_idx, v_idx))

    ref = lightgcn_forward_ref(adj, embeds, u_idx, v_idx, n_layers)
    assert out.shape == (B,)
    # int8 adjacency + bf16 MXU inputs, but f32 h carry -> tight tolerance.
    assert jnp.allclose(out, ref, atol=1e-2, rtol=1e-2), (out, ref)

    print("KERNEL_OK")
</pallas_src>

<mosaic_0001>
module attributes {stable_mosaic.version = 11 : i64} {
  func.func @kernel(%arg0: i32, %arg1: memref<1xi32, #tpu.memory_space<smem>>, %arg2: memref<1xi32, #tpu.memory_space<smem>>, %arg3: memref<1xi32, #tpu.memory_space<smem>>, %arg4: memref<1xi32, #tpu.memory_space<smem>>, %arg5: memref<1x512x512xi8, #tpu.memory_space<vmem>>, %arg6: memref<512x128xf32, #tpu.memory_space<any>>, %arg7: memref<512x128xf32, #tpu.memory_space<vmem>>, %arg8: memref<1xf32, #tpu.memory_space<smem>>, %arg9: memref<512x128xf32, #tpu.memory_space<vmem>>, %arg10: memref<512x128xf32, #tpu.memory_space<vmem>>, %arg11: memref<512x128xf32, #tpu.memory_space<vmem>>, %arg12: memref<!tpu.dma_semaphore, #tpu.memory_space<semaphore_mem>>) attributes {dimension_semantics = [#tpu.dimension_semantics<arbitrary>], iteration_bounds = array<i64: 1>, scalar_prefetch = 4 : i64, scratch_operands = 3 : i64, tpu.core_type = #tpu.core_type<tc>, window_params = [{transform_indices = @transform_0, window_bounds = array<i64: 1, 512, 512>}, {}, {transform_indices = @transform_2, window_bounds = array<i64: 512, 128>}, {transform_indices = @transform_3, window_bounds = array<i64: 1>}, {transform_indices = @transform_4, window_bounds = array<i64: 512, 128>}]} {
    %c0_i32 = arith.constant 0 : i32
    %0 = arith.cmpi eq, %arg0, %c0_i32 : i32
    %1 = arith.extui %0 : i1 to i32
    %c0_i32_0 = arith.constant 0 : i32
    %2 = arith.cmpi ne, %1, %c0_i32_0 : i32
    scf.if %2 {
      tpu.enqueue_dma source(%arg6 : memref<512x128xf32, #tpu.memory_space<any>>) target(%arg10 : memref<512x128xf32, #tpu.memory_space<vmem>>) target_semaphore(%arg12 : memref<!tpu.dma_semaphore, #tpu.memory_space<semaphore_mem>>)
      tpu.wait_dma2 semaphore(%arg12 : memref<!tpu.dma_semaphore, #tpu.memory_space<semaphore_mem>>) src(%arg6 : memref<512x128xf32, #tpu.memory_space<any>>) dst(%arg10 : memref<512x128xf32, #tpu.memory_space<vmem>>)
    } else {
    }
    %3 = arith.index_cast %arg0 : i32 to index
    %4 = memref.load %arg3[%3] : memref<1xi32, #tpu.memory_space<smem>>
    %c1_i32 = arith.constant 1 : i32
    %5 = arith.cmpi eq, %4, %c1_i32 : i32
    %6 = arith.extui %5 : i1 to i32
    %c0_i32_1 = arith.constant 0 : i32
    %7 = arith.cmpi ne, %6, %c0_i32_1 : i32
    scf.if %7 {
      %cst_11 = arith.constant 0.000000e+00 : f32
      %31 = vector.broadcast %cst_11 : f32 to vector<512x128xf32>
      %c0_12 = arith.constant 0 : index
      %c0_13 = arith.constant 0 : index
      %32 = vector.load %arg11[%c0_12, %c0_13] : memref<512x128xf32, #tpu.memory_space<vmem>>, vector<512x128xf32>
      tpu.vector_store %arg11[%c0_12, %c0_13], %31 {strides = array<i32>} : memref<512x128xf32, #tpu.memory_space<vmem>>, vector<512x128xf32>,
    } else {
    }
    %c0 = arith.constant 0 : index
    %c0_2 = arith.constant 0 : index
    %c0_3 = arith.constant 0 : index
    %8 = vector.load %arg5[%c0, %c0_2, %c0_3] : memref<1x512x512xi8, #tpu.memory_space<vmem>>, vector<1x512x512xi8>
    %9 = vector.shape_cast %8 : vector<1x512x512xi8> to vector<512x512xi8>
    %10 = arith.sitofp %9 : vector<512x512xi8> to vector<512x512xbf16>
    %11 = arith.index_cast %arg0 : i32 to index
    %12 = memref.load %arg2[%11] : memref<1xi32, #tpu.memory_space<smem>>
    %c512_i32 = arith.constant 512 : i32
    %13 = arith.muli %12, %c512_i32 : i32
    %14 = tpu.assume_multiple %13, 512 : i32
    %15 = arith.index_cast %14 : i32 to index
    %c0_4 = arith.constant 0 : index
    %16 = vector.load %arg10[%15, %c0_4] : memref<512x128xf32, #tpu.memory_space<vmem>>, vector<512x128xf32>
    %17 = arith.truncf %16 : vector<512x128xf32> to vector<512x128xbf16>
    %c0_5 = arith.constant 0 : index
    %c0_6 = arith.constant 0 : index
    %18 = vector.load %arg11[%c0_5, %c0_6] : memref<512x128xf32, #tpu.memory_space<vmem>>, vector<512x128xf32>
    %19 = arith.index_cast %arg0 : i32 to index
    %20 = memref.load %arg8[%19] : memref<1xf32, #tpu.memory_space<smem>>
    %cst = arith.constant dense<0.000000e+00> : vector<512x128xf32>
    %21 = tpu.matmul %10, %17, %cst {dimension_numbers = #tpu.dot_dimension_numbers<[1], [0], [0], [1], [0, 0, 1, 1], [], []>} : vector<512x512xbf16>, vector<512x128xbf16>, vector<512x128xf32> -> vector<512x128xf32>
    %22 = vector.broadcast %20 : f32 to vector<512x128xf32>
    %23 = arith.mulf %22, %21 : vector<512x128xf32>
    %24 = arith.addf %18, %23 : vector<512x128xf32>
    %c0_7 = arith.constant 0 : index
    %c0_8 = arith.constant 0 : index
    %25 = vector.load %arg11[%c0_7, %c0_8] : memref<512x128xf32, #tpu.memory_space<vmem>>, vector<512x128xf32>
    tpu.vector_store %arg11[%c0_7, %c0_8], %24 {strides = array<i32>} : memref<512x128xf32, #tpu.memory_space<vmem>>, vector<512x128xf32>,
    %26 = arith.index_cast %arg0 : i32 to index
    %27 = memref.load %arg4[%26] : memref<1xi32, #tpu.memory_space<smem>>
    %c1_i32_9 = arith.constant 1 : i32
    %28 = arith.cmpi eq, %27, %c1_i32_9 : i32
    %29 = arith.extui %28 : i1 to i32
    %c0_i32_10 = arith.constant 0 : i32
    %30 = arith.cmpi ne, %29, %c0_i32_10 : i32
    scf.if %30 {
      %c0_11 = arith.constant 0 : index
      %c0_12 = arith.constant 0 : index
      %31 = vector.load %arg11[%c0_11, %c0_12] : memref<512x128xf32, #tpu.memory_space<vmem>>, vector<512x128xf32>
      %c0_13 = arith.constant 0 : index
      %c0_14 = arith.constant 0 : index
      %32 = vector.load %arg7[%c0_13, %c0_14] : memref<512x128xf32, #tpu.memory_space<vmem>>, vector<512x128xf32>
      %33 = arith.addf %32, %31 : vector<512x128xf32>
      %cst_15 = arith.constant 0.333333343 : f32
      %34 = vector.broadcast %cst_15 : f32 to vector<512x128xf32>
      %35 = arith.mulf %33, %34 : vector<512x128xf32>
      %c0_16 = arith.constant 0 : index
      %c0_17 = arith.constant 0 : index
      %36 = vector.load %arg9[%c0_16, %c0_17] : memref<512x128xf32, #tpu.memory_space<vmem>>, vector<512x128xf32>
      tpu.vector_store %arg9[%c0_16, %c0_17], %35 {strides = array<i32>} : memref<512x128xf32, #tpu.memory_space<vmem>>, vector<512x128xf32>,
    } else {
    }
    return
  }
  func.func @transform_0(%arg0: i32, %arg1: memref<1xi32, #tpu.memory_space<smem>>, %arg2: memref<1xi32, #tpu.memory_space<smem>>, %arg3: memref<1xi32, #tpu.memory_space<smem>>, %arg4: memref<1xi32, #tpu.memory_space<smem>>) -> (i32, i32, i32) {
    %c0_i32 = arith.constant 0 : i32
    %c0_i32_0 = arith.constant 0 : i32
    %c0_i32_1 = arith.constant 0 : i32
    return %arg0, %c0_i32, %c0_i32_0 : i32, i32, i32
  }
  func.func @transform_2(%arg0: i32, %arg1: memref<1xi32, #tpu.memory_space<smem>>, %arg2: memref<1xi32, #tpu.memory_space<smem>>, %arg3: memref<1xi32, #tpu.memory_space<smem>>, %arg4: memref<1xi32, #tpu.memory_space<smem>>) -> (i32, i32) {
    %0 = arith.index_cast %arg0 : i32 to index
    %1 = memref.load %arg1[%0] : memref<1xi32, #tpu.memory_space<smem>>
    %c0_i32 = arith.constant 0 : i32
    %c0_i32_0 = arith.constant 0 : i32
    return %1, %c0_i32 : i32, i32
  }
  func.func @transform_3(%arg0: i32, %arg1: memref<1xi32, #tpu.memory_space<smem>>, %arg2: memref<1xi32, #tpu.memory_space<smem>>, %arg3: memref<1xi32, #tpu.memory_space<smem>>, %arg4: memref<1xi32, #tpu.memory_space<smem>>) -> i32 {
    %c0_i32 = arith.constant 0 : i32
    %c0_i32_0 = arith.constant 0 : i32
    return %c0_i32 : i32
  }
  func.func @transform_4(%arg0: i32, %arg1: memref<1xi32, #tpu.memory_space<smem>>, %arg2: memref<1xi32, #tpu.memory_space<smem>>, %arg3: memref<1xi32, #tpu.memory_space<smem>>, %arg4: memref<1xi32, #tpu.memory_space<smem>>) -> (i32, i32) {
    %0 = arith.index_cast %arg0 : i32 to index
    %1 = memref.load %arg1[%0] : memref<1xi32, #tpu.memory_space<smem>>
    %c0_i32 = arith.constant 0 : i32
    %c0_i32_0 = arith.constant 0 : i32
    return %1, %c0_i32 : i32, i32
  }
}

module attributes {stable_mosaic.version = 11 : i64} {
  func.func @kernel(%arg0: i32, %arg1: memref<1xi32, #tpu.memory_space<smem>>, %arg2: memref<1xi32, #tpu.memory_space<smem>>, %arg3: memref<1xi32, #tpu.memory_space<smem>>, %arg4: memref<1xi32, #tpu.memory_space<smem>>, %arg5: memref<1x512x512xi8, #tpu.memory_space<vmem>>, %arg6: memref<512x128xf32, #tpu.memory_space<any>>, %arg7: memref<512x128xf32, #tpu.memory_space<vmem>>, %arg8: memref<1xf32, #tpu.memory_space<smem>>, %arg9: memref<512x128xf32, #tpu.memory_space<vmem>>, %arg10: memref<512x128xf32, #tpu.memory_space<vmem>>, %arg11: memref<512x128xf32, #tpu.memory_space<vmem>>, %arg12: memref<512x128xf32, #tpu.memory_space<vmem>>, %arg13: memref<!tpu.dma_semaphore, #tpu.memory_space<semaphore_mem>>) attributes {dimension_semantics = [#tpu.dimension_semantics<arbitrary>], iteration_bounds = array<i64: 1>, scalar_prefetch = 4 : i64, scratch_operands = 3 : i64, tpu.core_type = #tpu.core_type<tc>, window_params = [{transform_indices = @transform_0, window_bounds = array<i64: 1, 512, 512>}, {}, {transform_indices = @transform_2, window_bounds = array<i64: 512, 128>}, {transform_indices = @transform_3, window_bounds = array<i64: 1>}, {transform_indices = @transform_4, window_bounds = array<i64: 512, 128>}, {transform_indices = @transform_5, window_bounds = array<i64: 512, 128>}]} {
    %c0_i32 = arith.constant 0 : i32
    %0 = arith.cmpi eq, %arg0, %c0_i32 : i32
    %1 = arith.extui %0 : i1 to i32
    %c0_i32_0 = arith.constant 0 : i32
    %2 = arith.cmpi ne, %1, %c0_i32_0 : i32
    scf.if %2 {
      tpu.enqueue_dma source(%arg6 : memref<512x128xf32, #tpu.memory_space<any>>) target(%arg11 : memref<512x128xf32, #tpu.memory_space<vmem>>) target_semaphore(%arg13 : memref<!tpu.dma_semaphore, #tpu.memory_space<semaphore_mem>>)
      tpu.wait_dma2 semaphore(%arg13 : memref<!tpu.dma_semaphore, #tpu.memory_space<semaphore_mem>>) src(%arg6 : memref<512x128xf32, #tpu.memory_space<any>>) dst(%arg11 : memref<512x128xf32, #tpu.memory_space<vmem>>)
    } else {
    }
    %3 = arith.index_cast %arg0 : i32 to index
    %4 = memref.load %arg3[%3] : memref<1xi32, #tpu.memory_space<smem>>
    %c1_i32 = arith.constant 1 : i32
    %5 = arith.cmpi eq, %4, %c1_i32 : i32
    %6 = arith.extui %5 : i1 to i32
    %c0_i32_1 = arith.constant 0 : i32
    %7 = arith.cmpi ne, %6, %c0_i32_1 : i32
    scf.if %7 {
      %cst_11 = arith.constant 0.000000e+00 : f32
      %31 = vector.broadcast %cst_11 : f32 to vector<512x128xf32>
      %c0_12 = arith.constant 0 : index
      %c0_13 = arith.constant 0 : index
      %32 = vector.load %arg12[%c0_12, %c0_13] : memref<512x128xf32, #tpu.memory_space<vmem>>, vector<512x128xf32>
      tpu.vector_store %arg12[%c0_12, %c0_13], %31 {strides = array<i32>} : memref<512x128xf32, #tpu.memory_space<vmem>>, vector<512x128xf32>,
    } else {
    }
    %c0 = arith.constant 0 : index
    %c0_2 = arith.constant 0 : index
    %c0_3 = arith.constant 0 : index
    %8 = vector.load %arg5[%c0, %c0_2, %c0_3] : memref<1x512x512xi8, #tpu.memory_space<vmem>>, vector<1x512x512xi8>
    %9 = vector.shape_cast %8 : vector<1x512x512xi8> to vector<512x512xi8>
    %10 = arith.sitofp %9 : vector<512x512xi8> to vector<512x512xbf16>
    %11 = arith.index_cast %arg0 : i32 to index
    %12 = memref.load %arg2[%11] : memref<1xi32, #tpu.memory_space<smem>>
    %c512_i32 = arith.constant 512 : i32
    %13 = arith.muli %12, %c512_i32 : i32
    %14 = tpu.assume_multiple %13, 512 : i32
    %15 = arith.index_cast %14 : i32 to index
    %c0_4 = arith.constant 0 : index
    %16 = vector.load %arg11[%15, %c0_4] : memref<512x128xf32, #tpu.memory_space<vmem>>, vector<512x128xf32>
    %17 = arith.truncf %16 : vector<512x128xf32> to vector<512x128xbf16>
    %c0_5 = arith.constant 0 : index
    %c0_6 = arith.constant 0 : index
    %18 = vector.load %arg12[%c0_5, %c0_6] : memref<512x128xf32, #tpu.memory_space<vmem>>, vector<512x128xf32>
    %19 = arith.index_cast %arg0 : i32 to index
    %20 = memref.load %arg8[%19] : memref<1xf32, #tpu.memory_space<smem>>
    %cst = arith.constant dense<0.000000e+00> : vector<512x128xf32>
    %21 = tpu.matmul %10, %17, %cst {dimension_numbers = #tpu.dot_dimension_numbers<[1], [0], [0], [1], [0, 0, 1, 1], [], []>} : vector<512x512xbf16>, vector<512x128xbf16>, vector<512x128xf32> -> vector<512x128xf32>
    %22 = vector.broadcast %20 : f32 to vector<512x128xf32>
    %23 = arith.mulf %22, %21 : vector<512x128xf32>
    %24 = arith.addf %18, %23 : vector<512x128xf32>
    %c0_7 = arith.constant 0 : index
    %c0_8 = arith.constant 0 : index
    %25 = vector.load %arg12[%c0_7, %c0_8] : memref<512x128xf32, #tpu.memory_space<vmem>>, vector<512x128xf32>
    tpu.vector_store %arg12[%c0_7, %c0_8], %24 {strides = array<i32>} : memref<512x128xf32, #tpu.memory_space<vmem>>, vector<512x128xf32>,
    %26 = arith.index_cast %arg0 : i32 to index
    %27 = memref.load %arg4[%26] : memref<1xi32, #tpu.memory_space<smem>>
    %c1_i32_9 = arith.constant 1 : i32
    %28 = arith.cmpi eq, %27, %c1_i32_9 : i32
    %29 = arith.extui %28 : i1 to i32
    %c0_i32_10 = arith.constant 0 : i32
    %30 = arith.cmpi ne, %29, %c0_i32_10 : i32
    scf.if %30 {
      %c0_11 = arith.constant 0 : index
      %c0_12 = arith.constant 0 : index
      %31 = vector.load %arg12[%c0_11, %c0_12] : memref<512x128xf32, #tpu.memory_space<vmem>>, vector<512x128xf32>
      %c0_13 = arith.constant 0 : index
      %c0_14 = arith.constant 0 : index
      %32 = vector.load %arg9[%c0_13, %c0_14] : memref<512x128xf32, #tpu.memory_space<vmem>>, vector<512x128xf32>
      tpu.vector_store %arg9[%c0_13, %c0_14], %31 {strides = array<i32>} : memref<512x128xf32, #tpu.memory_space<vmem>>, vector<512x128xf32>,
      %c0_15 = arith.constant 0 : index
      %c0_16 = arith.constant 0 : index
      %33 = vector.load %arg7[%c0_15, %c0_16] : memref<512x128xf32, #tpu.memory_space<vmem>>, vector<512x128xf32>
      %34 = arith.addf %33, %31 : vector<512x128xf32>
      %cst_17 = arith.constant 1.000000e+00 : f32
      %35 = vector.broadcast %cst_17 : f32 to vector<512x128xf32>
      %36 = arith.mulf %34, %35 : vector<512x128xf32>
      %c0_18 = arith.constant 0 : index
      %c0_19 = arith.constant 0 : index
      %37 = vector.load %arg10[%c0_18, %c0_19] : memref<512x128xf32, #tpu.memory_space<vmem>>, vector<512x128xf32>
      tpu.vector_store %arg10[%c0_18, %c0_19], %36 {strides = array<i32>} : memref<512x128xf32, #tpu.memory_space<vmem>>, vector<512x128xf32>,
    } else {
    }
    return
  }
  func.func @transform_0(%arg0: i32, %arg1: memref<1xi32, #tpu.memory_space<smem>>, %arg2: memref<1xi32, #tpu.memory_space<smem>>, %arg3: memref<1xi32, #tpu.memory_space<smem>>, %arg4: memref<1xi32, #tpu.memory_space<smem>>) -> (i32, i32, i32) {
    %c0_i32 = arith.constant 0 : i32
    %c0_i32_0 = arith.constant 0 : i32
    %c0_i32_1 = arith.constant 0 : i32
    return %arg0, %c0_i32, %c0_i32_0 : i32, i32, i32
  }
  func.func @transform_2(%arg0: i32, %arg1: memref<1xi32, #tpu.memory_space<smem>>, %arg2: memref<1xi32, #tpu.memory_space<smem>>, %arg3: memref<1xi32, #tpu.memory_space<smem>>, %arg4: memref<1xi32, #tpu.memory_space<smem>>) -> (i32, i32) {
    %0 = arith.index_cast %arg0 : i32 to index
    %1 = memref.load %arg1[%0] : memref<1xi32, #tpu.memory_space<smem>>
    %c0_i32 = arith.constant 0 : i32
    %c0_i32_0 = arith.constant 0 : i32
    return %1, %c0_i32 : i32, i32
  }
  func.func @transform_3(%arg0: i32, %arg1: memref<1xi32, #tpu.memory_space<smem>>, %arg2: memref<1xi32, #tpu.memory_space<smem>>, %arg3: memref<1xi32, #tpu.memory_space<smem>>, %arg4: memref<1xi32, #tpu.memory_space<smem>>) -> i32 {
    %c0_i32 = arith.constant 0 : i32
    %c0_i32_0 = arith.constant 0 : i32
    return %c0_i32 : i32
  }
  func.func @transform_4(%arg0: i32, %arg1: memref<1xi32, #tpu.memory_space<smem>>, %arg2: memref<1xi32, #tpu.memory_space<smem>>, %arg3: memref<1xi32, #tpu.memory_space<smem>>, %arg4: memref<1xi32, #tpu.memory_space<smem>>) -> (i32, i32) {
    %0 = arith.index_cast %arg0 : i32 to index
    %1 = memref.load %arg1[%0] : memref<1xi32, #tpu.memory_space<smem>>
    %c0_i32 = arith.constant 0 : i32
    %c0_i32_0 = arith.constant 0 : i32
    return %1, %c0_i32 : i32, i32
  }
  func.func @transform_5(%arg0: i32, %arg1: memref<1xi32, #tpu.memory_space<smem>>, %arg2: memref<1xi32, #tpu.memory_space<smem>>, %arg3: memref<1xi32, #tpu.memory_space<smem>>, %arg4: memref<1xi32, #tpu.memory_space<smem>>) -> (i32, i32) {
    %0 = arith.index_cast %arg0 : i32 to index
    %1 = memref.load %arg1[%0] : memref<1xi32, #tpu.memory_space<smem>>
    %c0_i32 = arith.constant 0 : i32
    %c0_i32_0 = arith.constant 0 : i32
    return %1, %c0_i32 : i32, i32
  }
}

module attributes {stable_mosaic.version = 11 : i64} {
  func.func @_score_kernel(%arg0: i32, %arg1: memref<128x128xf32, #tpu.memory_space<vmem>>, %arg2: memref<128x128xf32, #tpu.memory_space<vmem>>, %arg3: memref<1x128xf32, #tpu.memory_space<vmem>>) attributes {dimension_semantics = [#tpu.dimension_semantics<parallel>], iteration_bounds = array<i64: 1>, scalar_prefetch = 0 : i64, scratch_operands = 0 : i64, tpu.core_type = #tpu.core_type<tc>, window_params = [{transform_indices = @transform_0, window_bounds = array<i64: 128, 128>}, {transform_indices = @transform_1, window_bounds = array<i64: 128, 128>}, {transform_indices = @transform_2, window_bounds = array<i64: 1, 128>}]} {
    %c0 = arith.constant 0 : index
    %c0_0 = arith.constant 0 : index
    %0 = vector.load %arg1[%c0, %c0_0] : memref<128x128xf32, #tpu.memory_space<vmem>>, vector<128x128xf32>
    %c0_1 = arith.constant 0 : index
    %c0_2 = arith.constant 0 : index
    %1 = vector.load %arg2[%c0_1, %c0_2] : memref<128x128xf32, #tpu.memory_space<vmem>>, vector<128x128xf32>
    %2 = arith.mulf %0, %1 : vector<128x128xf32>
    %cst = arith.constant dense<0.000000e+00> : vector<128xf32>
    %3 = vector.multi_reduction <add>, %2, %cst [1] : vector<128x128xf32> to vector<128xf32>
    %4 = arith.negf %3 : vector<128xf32>
    %5 = math.exp %4 : vector<128xf32>
    %cst_3 = arith.constant 1.000000e+00 : f32
    %6 = vector.broadcast %cst_3 : f32 to vector<128xf32>
    %7 = arith.addf %6, %5 : vector<128xf32>
    %8 = arith.divf %6, %7 : vector<128xf32>
    %cst_4 = arith.constant 4.000000e+00 : f32
    %9 = vector.broadcast %cst_4 : f32 to vector<128xf32>
    %10 = arith.mulf %9, %8 : vector<128xf32>
    %cst_5 = arith.constant 1.000000e+00 : f32
    %11 = vector.broadcast %cst_5 : f32 to vector<128xf32>
    %12 = arith.addf %11, %10 : vector<128xf32>
    %13 = vector.shape_cast %12 : vector<128xf32> to vector<1x128xf32>
    %c0_6 = arith.constant 0 : index
    %c0_7 = arith.constant 0 : index
    %14 = vector.load %arg3[%c0_6, %c0_7] : memref<1x128xf32, #tpu.memory_space<vmem>>, vector<1x128xf32>
    tpu.vector_store %arg3[%c0_6, %c0_7], %13 {strides = array<i32>} : memref<1x128xf32, #tpu.memory_space<vmem>>, vector<1x128xf32>,
    return
  }
  func.func @transform_0(%arg0: i32) -> (i32, i32) {
    %c0_i32 = arith.constant 0 : i32
    %c0_i32_0 = arith.constant 0 : i32
    return %arg0, %c0_i32 : i32, i32
  }
  func.func @transform_1(%arg0: i32) -> (i32, i32) {
    %c0_i32 = arith.constant 0 : i32
    %c0_i32_0 = arith.constant 0 : i32
    return %arg0, %c0_i32 : i32, i32
  }
  func.func @transform_2(%arg0: i32) -> (i32, i32) {
    %c0_i32 = arith.constant 0 : i32
    %c0_i32_0 = arith.constant 0 : i32
    return %c0_i32, %arg0 : i32, i32
  }
}

</mosaic_0001>

<bundles_post_ra>
// kernel: lightgcn_forward_device.5
= control target key start
LH: loop header
LB: loop body
LE: loop exit
PB: predicated region body
PF: predicated region fallthrough
CT: control target
= control target key end

     0   :  { %v235_v62 = vlaneseq  ;;  %vm246_vm0 = vcmask 130112   ;;  %vm253_vm1 = vcmask 195712   ;;  %vm260_vm2 = vcmask 261312   ;;  %s602_s0 = inlined_call_operand.vmem [shape: f32[128,128], index: 0, kind: input, shape index: {}]   ;;  %s603_s1 = inlined_call_operand.vmem [shape: f32[128,128], index: 1, kind: input, shape index: {}]   ;;  %s604_s2 = inlined_call_operand.vmem [shape: f32[1,128], index: 2, kind: output, shape index: {}]  }
   0x1   :  { %v11_v0 = vld [vmem:[%s602_s0] sm:$0xff]  ;;  %v13_v2 = vld [vmem:[%s602_s0 + $0x10] sm:$0xff]  ;;  %v12_v5 = vld [vmem:[%s602_s0 + $0x8] sm:$0xff]  ;;  %vm267_vm3 = vcmask 326912   ;;  %vm274_vm4 = vcmask 392512   ;;  %vm281_vm5 = vcmask 458112  }
   0x2   :  { %v27_v1 = vld [vmem:[%s603_s1] sm:$0xff]  ;;  %v29_v4 = vld [vmem:[%s603_s1 + $0x10] sm:$0xff]  ;;  %v28_v6 = vld [vmem:[%s603_s1 + $0x8] sm:$0xff]  ;;  %vm288_vm6 = vcmask 523712   ;;  %vm295_vm7 = vcmask 589312   ;;  %vm302_vm8 = vcmask 654912  }
   0x3   :  { %v43_v3 = vmul.f32 %v27_v1, %v11_v0  ;;  %v45_v7 = vmul.f32 %v29_v4, %v13_v2  ;;  %v14_v8 = vld [vmem:[%s602_s0 + $0x18] sm:$0xff]  ;;  %v44_v10 = vmul.f32 %v28_v6, %v12_v5  ;;  %v15_v12 = vld [vmem:[%s602_s0 + $0x20] sm:$0xff]  ;;  %v16_v14 = vld [vmem:[%s602_s0 + $0x28] sm:$0xff]  ;;  %vm309_vm9 = vcmask 720512  }
   0x4   :  { %v30_v9 = vld [vmem:[%s603_s1 + $0x18] sm:$0xff]  ;;  %v31_v13 = vld [vmem:[%s603_s1 + $0x20] sm:$0xff]  ;;  %v32_v15 = vld [vmem:[%s603_s1 + $0x28] sm:$0xff]  ;;  %vm316_vm10 = vcmask 786112   ;;  %vm323_vm11 = vcmask 851712   ;;  %vm330_vm12 = vcmask 917312  }
   0x5   :  { %59 = vadd.xlane.f32.xlu0 %v43_v3  ;;  %63 = vadd.xlane.f32.xlu1 %v45_v7  ;;  %v46_v11 = vmul.f32 %v30_v9, %v14_v8  ;;  %v47_v16 = vmul.f32 %v31_v13, %v15_v12  ;;  %v48_v17 = vmul.f32 %v32_v15, %v16_v14  ;;  %v17_v18 = vld [vmem:[%s602_s0 + $0x30] sm:$0xff]  ;;  %v18_v20 = vld [vmem:[%s602_s0 + $0x38] sm:$0xff]  ;;  %v19_v24 = vld [vmem:[%s602_s0 + $0x40] sm:$0xff]  ;;  %v543_v7 = vand.u32 127, %v235_v62 }
   0x6   :  { %v33_v19 = vld [vmem:[%s603_s1 + $0x30] sm:$0xff]  ;;  %v34_v21 = vld [vmem:[%s603_s1 + $0x38] sm:$0xff]  ;;  %v35_v25 = vld [vmem:[%s603_s1 + $0x40] sm:$0xff]  ;;  %vm337_vm13 = vcmask 982912   ;;  %vm344_vm14 = vcmask 1048512  }
   0x7   :  { %v49_v22 = vmul.f32 %v33_v19, %v17_v18  ;;  %v50_v23 = vmul.f32 %v34_v21, %v18_v20  ;;  %v20_v26 = vld [vmem:[%s602_s0 + $0x48] sm:$0xff]  ;;  %v51_v28 = vmul.f32 %v35_v25, %v19_v24  ;;  %v21_v30 = vld [vmem:[%s602_s0 + $0x50] sm:$0xff]  ;;  %v22_v32 = vld [vmem:[%s602_s0 + $0x58] sm:$0xff]  ;;  %v241_v24 = vadd.s32 4294967288, %v543_v7 }
   0x8   :  { %v36_v27 = vld [vmem:[%s603_s1 + $0x48] sm:$0xff]  ;;  %v37_v31 = vld [vmem:[%s603_s1 + $0x50] sm:$0xff]  ;;  %v38_v33 = vld [vmem:[%s603_s1 + $0x58] sm:$0xff]  ;;  %v552_v25 = vadd.s32 4294967272, %v543_v7 }
   0x9   :  { %61 = vadd.xlane.f32.xlu0 %v44_v10  ;;  %65 = vadd.xlane.f32.xlu1 %v46_v11  ;;  %v52_v29 = vmul.f32 %v36_v27, %v20_v26  ;;  %v53_v34 = vmul.f32 %v37_v31, %v21_v30  ;;  %v54_v35 = vmul.f32 %v38_v33, %v22_v32  ;;  %v23_v36 = vld [vmem:[%s602_s0 + $0x60] sm:$0xff]  ;;  %v24_v38 = vld [vmem:[%s602_s0 + $0x68] sm:$0xff]  ;;  %v25_v42 = vld [vmem:[%s602_s0 + $0x70] sm:$0xff]  ;;  %v559_v33 = vadd.s32 4294967264, %v543_v7 }
   0xa   :  { %v39_v37 = vld [vmem:[%s603_s1 + $0x60] sm:$0xff]  ;;  %v40_v39 = vld [vmem:[%s603_s1 + $0x68] sm:$0xff]  ;;  %v41_v43 = vld [vmem:[%s603_s1 + $0x70] sm:$0xff] }
   0xb   :  { %v55_v40 = vmul.f32 %v39_v37, %v23_v36  ;;  %v56_v41 = vmul.f32 %v40_v39, %v24_v38  ;;  %v26_v44 = vld [vmem:[%s602_s0 + $0x78] sm:$0xff]  ;;  %v57_v46 = vmul.f32 %v41_v43, %v25_v42  ;;  %v562_v38 = vadd.s32 4294967256, %v543_v7 }
   0xc   :  { %v42_v45 = vld [vmem:[%s603_s1 + $0x78] sm:$0xff] }
   0xd   :  { %67 = vadd.xlane.f32.xlu0 %v47_v16  ;;  %69 = vadd.xlane.f32.xlu1 %v48_v17  ;;  %v58_v47 = vmul.f32 %v42_v45, %v26_v44  ;;  %v545_v16 = vshrl.u32 %v235_v62, 7  ;;  %v548_v17 = vadd.s32 4294967280, %v543_v7 }
   0xf   :  { %v258_v42 = vsub.s32 %v552_v25, %v545_v16  ;;  %v290_v25 = vadd.s32 4294967232, %v543_v7 }
  0x11   :  { %71 = vadd.xlane.f32.xlu0 %v49_v22  ;;  %73 = vadd.xlane.f32.xlu1 %v50_v23 }
  0x15   :  { %75 = vadd.xlane.f32.xlu0 %v51_v28  ;;  %77 = vadd.xlane.f32.xlu1 %v52_v29  ;;  %v239_v28 = vsub.s32 %v543_v7, %v545_v16  ;;  %v251_v29 = vsub.s32 %v548_v17, %v545_v16 }
  0x19   :  { %79 = vadd.xlane.f32.xlu0 %v53_v34  ;;  %81 = vadd.xlane.f32.xlu1 %v54_v35 }
  0x1d   :  { %83 = vadd.xlane.f32.xlu0 %v55_v40  ;;  %85 = vadd.xlane.f32.xlu1 %v56_v41  ;;  %v244_v41 = vsub.s32 %v241_v24, %v545_v16 }
  0x21   :  { %87 = vadd.xlane.f32.xlu0 %v57_v46  ;;  %89 = vadd.xlane.f32.xlu1 %v58_v47 }
  0x92   :  { %v60_v48 = vpop.xlane.xlu0 %59  ;;  %v64_v50 = vpop.xlane.xlu1 %63 }
  0x93   :  { %v352_v49 = vmul.f32 -1.442695, %v60_v48  ;;  %v354_v51 = vmul.f32 -1.442695, %v64_v50 }
  0x95   :  { %368 = vpow2.f32 %v352_v49  ;;  %v265_v49 = vsub.s32 %v559_v33, %v545_v16 }
  0x96   :  { %370 = vpow2.f32 %v354_v51  ;;  %v62_v52 = vpop.xlane.xlu0 %61  ;;  %v66_v54 = vpop.xlane.xlu1 %65 }
  0x97   :  { %v353_v53 = vmul.f32 -1.442695, %v62_v52  ;;  %v355_v55 = vmul.f32 -1.442695, %v66_v54 }
  0x99   :  { %372 = vpow2.f32 %v353_v53 }
  0x9a   :  { %374 = vpow2.f32 %v355_v55  ;;  %v68_v56 = vpop.xlane.xlu0 %67  ;;  %v70_v58 = vpop.xlane.xlu1 %69  ;;  %v272_v55 = vsub.s32 %v562_v38, %v545_v16 }
  0x9b   :  { %v356_v57 = vmul.f32 -1.442695, %v68_v56  ;;  %v357_v59 = vmul.f32 -1.442695, %v70_v58 }
  0x9d   :  { %376 = vpow2.f32 %v356_v57 }
  0x9e   :  { %378 = vpow2.f32 %v357_v59  ;;  %v72_v60 = vpop.xlane.xlu0 %71  ;;  %v74_v0 = vpop.xlane.xlu1 %73 }
  0x9f   :  { %v369_v61 = vpop.eup %368  ;;  %v358_v63 = vmul.f32 -1.442695, %v72_v60  ;;  %v359_v3 = vmul.f32 -1.442695, %v74_v0 }
  0xa0   :  { %v371_v1 = vpop.eup %370  ;;  %v139_v2 = vadd.f32 1.0, %v369_v61  ;;  %v276_v61 = vadd.s32 4294967248, %v543_v7 }
  0xa1   :  { %v141_v4 = vadd.f32 1.0, %v371_v1  ;;  %380 = vpow2.f32 %v358_v63  ;;  %v283_v1 = vadd.s32 4294967240, %v543_v7 }
  0xa2   :  { %382 = vrcp.f32 %v139_v2  ;;  %v76_v5 = vpop.xlane.xlu0 %75  ;;  %v78_v9 = vpop.xlane.xlu1 %77 }
  0xa3   :  { %v373_v6 = vpop.eup %372  ;;  %384 = vrcp.f32 %v141_v4  ;;  %v360_v8 = vmul.f32 -1.442695, %v76_v5  ;;  %v361_v12 = vmul.f32 -1.442695, %v78_v9 }
  0xa4   :  { %v375_v10 = vpop.eup %374  ;;  %v140_v11 = vadd.f32 1.0, %v373_v6  ;;  %386 = vpow2.f32 %v359_v3 }
  0xa5   :  { %v142_v13 = vadd.f32 1.0, %v375_v10  ;;  %388 = vpow2.f32 %v360_v8 }
  0xa6   :  { %390 = vrcp.f32 %v140_v11  ;;  %v80_v14 = vpop.xlane.xlu0 %79  ;;  %v82_v19 = vpop.xlane.xlu1 %81 }
  0xa7   :  { %v377_v15 = vpop.eup %376  ;;  %392 = vrcp.f32 %v142_v13  ;;  %v362_v18 = vmul.f32 -1.442695, %v80_v14  ;;  %v363_v22 = vmul.f32 -1.442695, %v82_v19 }
  0xa8   :  { %v379_v20 = vpop.eup %378  ;;  %v143_v21 = vadd.f32 1.0, %v377_v15  ;;  %394 = vpow2.f32 %v361_v12 }
  0xa9   :  { %v144_v23 = vadd.f32 1.0, %v379_v20  ;;  %396 = vpow2.f32 %v362_v18  ;;  %v279_v20 = vsub.s32 %v276_v61, %v545_v16 }
  0xaa   :  { %398 = vrcp.f32 %v143_v21  ;;  %v84_v26 = vpop.xlane.xlu0 %83  ;;  %v86_v31 = vpop.xlane.xlu1 %85 }
  0xab   :  { %v381_v27 = vpop.eup %380  ;;  %400 = vrcp.f32 %v144_v23  ;;  %v364_v30 = vmul.f32 -1.442695, %v84_v26  ;;  %v365_v35 = vmul.f32 -1.442695, %v86_v31  ;;  %v286_v31 = vsub.s32 %v283_v1, %v545_v16 }
  0xac   :  { %v383_v32 = vpop.eup %382  ;;  %v145_v34 = vadd.f32 1.0, %v381_v27  ;;  %402 = vpow2.f32 %v363_v22  ;;  %v297_v27 = vadd.s32 4294967224, %v543_v7 }
  0xad   :  { %v385_v36 = vpop.eup %384  ;;  %v187_v37 = vmul.f32 4.0, %v383_v32  ;;  %404 = vpow2.f32 %v364_v30  ;;  %v304_v32 = vadd.s32 4294967216, %v543_v7 }
  0xae   :  { %v387_v39 = vpop.eup %386  ;;  %v189_v40 = vmul.f32 4.0, %v385_v36  ;;  %406 = vrcp.f32 %v145_v34  ;;  %v88_v43 = vpop.xlane.xlu0 %87 }
  0xaf   :  { %v389_v44 = vpop.eup %388  ;;  %v146_v45 = vadd.f32 1.0, %v387_v39  ;;  %408 = vpow2.f32 %v365_v35  ;;  %v366_v46 = vmul.f32 -1.442695, %v88_v43  ;;  %v90_v47 = vpop.xlane.xlu1 %89  ;;  %v203_v53 = vadd.f32 1.0, %v187_v37 }
  0xb0   :  { %v391_v48 = vpop.eup %390  ;;  %v147_v50 = vadd.f32 1.0, %v389_v44  ;;  %v367_v51 = vmul.f32 -1.442695, %v90_v47  ;;  %v205_v57 = vadd.f32 1.0, %v189_v40  ;;  %v293_v39 = vsub.s32 %v290_v25, %v545_v16 }
  0xb1   :  { %v393_v52 = vpop.eup %392  ;;  %v188_v54 = vmul.f32 4.0, %v391_v48  ;;  %410 = vrcp.f32 %v146_v45  ;;  %v240_v4 = vrot.slane %v203_v53, %v239_v28  ;;  %v300_v43 = vsub.s32 %v297_v27, %v545_v16 }
  0xb2   :  { %v395_v56 = vpop.eup %394  ;;  %v190_v58 = vmul.f32 4.0, %v393_v52  ;;  %412 = vrcp.f32 %v147_v50  ;;  %v252_v9 = vrot.slane %v205_v57, %v251_v29  ;;  %v311_v44 = vadd.s32 4294967208, %v543_v7 }
  0xb3   :  { %v397_v59 = vpop.eup %396  ;;  %v204_v60 = vadd.f32 1.0, %v188_v54  ;;  %v148_v62 = vadd.f32 1.0, %v395_v56  ;;  %414 = vpow2.f32 %v366_v46  ;;  %v307_v48 = vsub.s32 %v304_v32, %v545_v16 }
  0xb4   :  { %v399_v63 = vpop.eup %398  ;;  %v206_v0 = vadd.f32 1.0, %v190_v58  ;;  %v149_v2 = vadd.f32 1.0, %v397_v59  ;;  %416 = vpow2.f32 %v367_v51  ;;  %v314_v61 = vsub.s32 %v311_v44, %v545_v16 }
  0xb5   :  { %v401_v3 = vpop.eup %400  ;;  %v245_v5 = vrot.slane %v204_v60, %v244_v41  ;;  %v191_v6 = vmul.f32 4.0, %v399_v63  ;;  %418 = vrcp.f32 %v148_v62 }
  0xb6   :  { %v403_v8 = vpop.eup %402  ;;  %v259_v10 = vrot.slane %v206_v0, %v258_v42  ;;  %v192_v11 = vmul.f32 4.0, %v401_v3  ;;  %420 = vrcp.f32 %v149_v2  ;;  %v325_v2 = vadd.s32 4294967192, %v543_v7 }
  0xb7   :  { %v405_v12 = vpop.eup %404  ;;  %v247_v13 = vsel %vm246_vm0, %v245_v5, %v240_v4  ;;  %v207_v14 = vadd.f32 1.0, %v191_v6  ;;  %v150_v15 = vadd.f32 1.0, %v403_v8 }
  0xb8   :  { %v407_v17 = vpop.eup %406  ;;  %v254_v18 = vsel %vm253_vm1, %v252_v9, %v247_v13  ;;  %v208_v19 = vadd.f32 1.0, %v192_v11  ;;  %v151_v21 = vadd.f32 1.0, %v405_v12  ;;  %v332_v12 = vadd.s32 4294967184, %v543_v7 }
  0xb9   :  { %v409_v22 = vpop.eup %408  ;;  %v266_v23 = vrot.slane %v207_v14, %v265_v49  ;;  %v193_v24 = vmul.f32 4.0, %v407_v17  ;;  %422 = vrcp.f32 %v150_v15  ;;  %v261_v26 = vsel %vm260_vm2, %v259_v10, %v254_v18 }
  0xba   :  { %424 = vrcp.f32 %v151_v21  ;;  %v152_v28 = vadd.f32 1.0, %v409_v22  ;;  %v273_v34 = vrot.slane %v208_v19, %v272_v55  ;;  %v318_v49 = vadd.s32 4294967200, %v543_v7 }
  0xbb   :  { %v411_v29 = vpop.eup %410  ;;  %v209_v30 = vadd.f32 1.0, %v193_v24  ;;  %v268_v37 = vsel %vm267_vm3, %v266_v23, %v261_v26  ;;  %v328_v15 = vsub.s32 %v325_v2, %v545_v16  ;;  %v339_v17 = vadd.s32 4294967176, %v543_v7 }
  0xbc   :  { %v413_v33 = vpop.eup %412  ;;  %v194_v35 = vmul.f32 4.0, %v411_v29  ;;  %426 = vrcp.f32 %v152_v28  ;;  %v275_v52 = vsel %vm274_vm4, %v273_v34, %v268_v37  ;;  %v321_v5 = vsub.s32 %v318_v49, %v545_v16 }
  0xbd   :  { %v415_v36 = vpop.eup %414  ;;  %v280_v38 = vrot.slane %v209_v30, %v279_v20  ;;  %v195_v40 = vmul.f32 4.0, %v413_v33  ;;  %v335_v23 = vsub.s32 %v332_v12, %v545_v16  ;;  %v342_v27 = vsub.s32 %v339_v17, %v545_v16 }
  0xbe   :  { %v417_v41 = vpop.eup %416  ;;  %v210_v42 = vadd.f32 1.0, %v194_v35  ;;  %v153_v45 = vadd.f32 1.0, %v415_v36 }
  0xbf   :  { %v419_v46 = vpop.eup %418  ;;  %v211_v47 = vadd.f32 1.0, %v195_v40  ;;  %v154_v50 = vadd.f32 1.0, %v417_v41  ;;  %v282_v55 = vsel %vm281_vm5, %v280_v38, %v275_v52 }
  0xc0   :  { %v421_v51 = vpop.eup %420  ;;  %v287_v53 = vrot.slane %v210_v42, %v286_v31  ;;  %v196_v54 = vmul.f32 4.0, %v419_v46  ;;  %428 = vrcp.f32 %v153_v45 }
  0xc1   :  { %v294_v56 = vrot.slane %v211_v47, %v293_v39  ;;  %v197_v57 = vmul.f32 4.0, %v421_v51  ;;  %430 = vrcp.f32 %v154_v50 }
  0xc2   :  { %v212_v58 = vadd.f32 1.0, %v196_v54  ;;  %v289_v63 = vsel %vm288_vm6, %v287_v53, %v282_v55 }
  0xc3   :  { %v423_v59 = vpop.eup %422  ;;  %v213_v60 = vadd.f32 1.0, %v197_v57  ;;  %v296_v3 = vsel %vm295_vm7, %v294_v56, %v289_v63 }
  0xc4   :  { %v425_v62 = vpop.eup %424  ;;  %v301_v0 = vrot.slane %v212_v58, %v300_v43  ;;  %v198_v1 = vmul.f32 4.0, %v423_v59 }
  0xc5   :  { %v308_v4 = vrot.slane %v213_v60, %v307_v48  ;;  %v199_v6 = vmul.f32 4.0, %v425_v62 }
  0xc6   :  { %v427_v8 = vpop.eup %426  ;;  %v214_v9 = vadd.f32 1.0, %v198_v1  ;;  %v303_v13 = vsel %vm302_vm8, %v301_v0, %v296_v3 }
  0xc7   :  { %v215_v10 = vadd.f32 1.0, %v199_v6  ;;  %v200_v11 = vmul.f32 4.0, %v427_v8  ;;  %v310_v18 = vsel %vm309_vm9, %v308_v4, %v303_v13 }
  0xc8   :  { %v315_v14 = vrot.slane %v214_v9, %v314_v61 }
  0xc9   :  { %v322_v19 = vrot.slane %v215_v10, %v321_v5  ;;  %v216_v20 = vadd.f32 1.0, %v200_v11 }
  0xca   :  { %v429_v21 = vpop.eup %428  ;;  %v317_v25 = vsel %vm316_vm10, %v315_v14, %v310_v18 }
  0xcb   :  { %v431_v22 = vpop.eup %430  ;;  %v201_v24 = vmul.f32 4.0, %v429_v21  ;;  %v329_v26 = vrot.slane %v216_v20, %v328_v15  ;;  %v324_v29 = vsel %vm323_vm11, %v322_v19, %v317_v25 }
  0xcc   :  { %v202_v28 = vmul.f32 4.0, %v431_v22 }
  0xcd   :  { %v217_v30 = vadd.f32 1.0, %v201_v24  ;;  %v331_v32 = vsel %vm330_vm12, %v329_v26, %v324_v29 }
  0xce   :  { %v218_v7 = vadd.f32 1.0, %v202_v28 }
  0xcf   :  { %v336_v31 = vrot.slane %v217_v30, %v335_v23 }
  0xd0   :  { %v343_v33 = vrot.slane %v218_v7, %v342_v27 }
  0xd1   :  { %v338_v34 = vsel %vm337_vm13, %v336_v31, %v331_v32 }
  0xd2   :  { %v345_v35 = vsel %vm344_vm14, %v343_v33, %v338_v34 }
  0xd3   :  { %347 = vst [vmem:[%s604_s2] sm:$0x1] %v345_v35 }

// kernel: lightgcn_forward_device.3
= control target key start
LH: loop header
LB: loop body
LE: loop exit
PB: predicated region body
PF: predicated region fallthrough
CT: control target
= control target key end

     0   :  { %s2593_s0 = inlined_call_operand.<no memory space> [shape: s32[1], index: 0, kind: input, shape index: {}]   ;;  %s2594_s1 = inlined_call_operand.<no memory space> [shape: s32[1], index: 1, kind: input, shape index: {}]   ;;  %s2595_s2 = inlined_call_operand.<no memory space> [shape: s32[1], index: 2, kind: input, shape index: {}]   ;;  %s2596_s3 = inlined_call_operand.<no memory space> [shape: s32[1], index: 3, kind: input, shape index: {}]   ;;  %s2597_s4 = inlined_call_operand.hbm [shape: s8[1,512,512], index: 4, kind: input, shape index: {}]   ;;  %s2598_s5 = inlined_call_operand.hbm [shape: f32[512,128], index: 5, kind: input, shape index: {}, may-alias: {5,6}]   ;;  %s2599_s6 = inlined_call_operand.hbm [shape: f32[512,128], index: 6, kind: input, shape index: {}, may-alias: {5,6}]   ;;  %s2600_s7 = inlined_call_operand.<no memory space> [shape: f32[1], index: 7, kind: input, shape index: {}]   ;;  %s2601_s8 = inlined_call_operand.vmem [shape: f32[512,128], index: 8, kind: output, shape index: {0}]   ;;  %s2602_s9 = inlined_call_operand.vmem [shape: f32[512,128], index: 9, kind: output, shape index: {1}]  }
   0x1   :  { %16 = sst [smem:[#allocation7]] %s2594_s1 }
   0x2   :  { %18 = sst [smem:[#allocation9]] %s2596_s3 }
   0x3   :  { %19 = sst [smem:[#allocation10]] %s2600_s7 }
   0x4   :  { %20 = vsyncpa [#allocation12], 0 }
   0x5   :  { %21 = vsyncpa [#allocation14], 0  ;;  %s1850_s15 = smov [#allocation11]   ;;  %s1702_s19 = sshll.u32 %s2593_s0, 13 }
   0x6   :  { %s27_s16 = sshll.u32 %s1850_s15, 4  ;;  %s1776_s1 = scalar_lea.hbm %s2597_s4, 8192  ;;  %s28_s16 = int_to_ptr.vmem [resolvable:$true] %s27_s16 }
   0x7   :  { %p1777_p0 = scmp.ne.s32.totalorder %s2597_s4, %s1776_s1  ;;  %p1780_p1 = scmp.lt.u32.totalorder %s1776_s1, %s2597_s4 }
   0x9   :  { %p1782_p2 = pnand %p1780_p1, %p1777_p0 }
   0xb   :  { %1785 = shalt.err (!%p1782_p2)
}
   0xc   :  { %s1786_s7 = scalar_lea.vmem %s28_s16, 8192  ;;  %p1791_p4 = scmp.lt.s32.totalorder %s28_s16, %s28_s16 }
   0xd   :  { %p1787_p3 = scmp.ne.s32.totalorder %s28_s16, %s1786_s7  ;;  %p1792_p5 = scmp.lt.s32.totalorder %s1786_s7, %s1786_s7 }
   0xf   :  { %p1793_p6 = por %p1792_p5, %p1791_p4 }
  0x11   :  { %p1794_p7 = pnand %p1793_p6, %p1787_p3 }
  0x13   :  { %1797 = shalt.err (!%p1794_p7)
}
  0x14   :  { %s1851_s25 = smov 512   ;;  %s1852_s26 = smov 32  }
  0x15   :  { %33 = dma.hbm_to_vmem [thread:$0]  %s2597_s4, 8192, %s28_s16, [#allocation12], %s1851_s25, %s1851_s25, %s1852_s26  }
  0x16   :  { %s42_s10 = scalar_lea.hbm %s2599_s6, %s1702_s19  ;;  %s1853_s11 = smov [#allocation13]  }
  0x17   :  { %s43_s12 = sshll.u32 %s1853_s11, 4  ;;  %s1798_s13 = scalar_lea.hbm %s42_s10, 8192  ;;  %s44_s12 = int_to_ptr.vmem [resolvable:$true] %s43_s12 }
  0x18   :  { %p1799_p8 = scmp.ne.s32.totalorder %s42_s10, %s1798_s13  ;;  %s1800_s17 = scalar_lea.hbm %s2599_s6, 8192 }
  0x19   :  { %p1801_p9 = scmp.lt.u32.totalorder %s42_s10, %s2599_s6  ;;  %p1802_p10 = scmp.lt.u32.totalorder %s1800_s17, %s1798_s13 }
  0x1a   :  { %p1804_p12 = scmp.lt.u32.totalorder %s1798_s13, %s42_s10 }
  0x1b   :  { %p1803_p11 = por %p1802_p10, %p1801_p9 }
  0x1d   :  { %p1805_p13 = por %p1804_p12, %p1803_p11 }
  0x1f   :  { %p1806_p0 = pnand %p1805_p13, %p1799_p8 }
  0x21   :  { %1809 = shalt.err (!%p1806_p0)
}
  0x22   :  { %s1810_s4 = scalar_lea.vmem %s44_s12, 8192  ;;  %p1815_p2 = scmp.lt.s32.totalorder %s44_s12, %s44_s12 }
  0x23   :  { %p1811_p1 = scmp.ne.s32.totalorder %s44_s12, %s1810_s4  ;;  %p1816_p3 = scmp.lt.s32.totalorder %s1810_s4, %s1810_s4 }
  0x25   :  { %p1817_p4 = por %p1816_p3, %p1815_p2 }
  0x27   :  { %p1818_p5 = pnand %p1817_p4, %p1811_p1 }
  0x29   :  { %1821 = shalt.err (!%p1818_p5)
}
  0x2a   :  { %s1854_s16 = smov 128   ;;  %s1855_s19 = smov 8  }
  0x2b   :  { %49 = dma.hbm_to_vmem [thread:$0]  %s42_s10, 8192, %s44_s12, [#allocation14], %s1854_s16, %s1854_s16, %s1855_s19  }
  0x2c   :  { %1844 = dma.done.wait [#allocation12], 8192  }
  0x2d   :  { %1845 = vsyncadd [#allocation12], 4294959104 }
  0x2e   :  { %1846 = dma.done.wait [#allocation14], 8192  }
  0x2f   :  { %1847 = vsyncadd [#allocation14], 4294959104  ;;  %s1694_s1 = sshll.u32 %s2593_s0, 6  ;;  %s1856_s22 = smov [#allocation2]  }
  0x30   :  { %p74_p6 = scmp.lt.s32.totalorder %s1694_s1, 63  ;;  %s100_s23 = sshll.u32 %s1856_s22, 4  ;;  %s101_s23 = int_to_ptr.vmem [resolvable:$true] %s100_s23 }
  0x31   :  { %s1822_s7 = scalar_lea.hbm %s2598_s5, 8192 }
  0x32   :  { %s2643_s1 = smov (!%p74_p6, %s1694_s1), 63  ;;  %p1823_p7 = scmp.ne.s32.totalorder %s2598_s5, %s1822_s7 }
  0x33   :  { %p1826_p8 = scmp.lt.u32.totalorder %s1822_s7, %s2598_s5 }
  0x35   :  { %p1828_p9 = pnand %p1826_p8, %p1823_p7 }
  0x37   :  { %1831 = shalt.err (!%p1828_p9)  }
  0x38   :  { %s1832_s0 = scalar_lea.vmem %s101_s23, 8192  ;;  %p1837_p11 = scmp.lt.s32.totalorder %s101_s23, %s101_s23 }
  0x39   :  { %p1833_p10 = scmp.ne.s32.totalorder %s101_s23, %s1832_s0  ;;  %p1838_p12 = scmp.lt.s32.totalorder %s1832_s0, %s1832_s0 }
  0x3b   :  { %p1839_p13 = por %p1838_p12, %p1837_p11 }
  0x3d   :  { %p1840_p0 = pnand %p1839_p13, %p1833_p10 }
  0x3f   :  { %1843 = shalt.err (!%p1840_p0)  }
  0x40   :  { %103 = dma.hbm_to_vmem [thread:$0]  %s2598_s5, 8192, %s101_s23, [#allocation4] }
  0x41   :  { %s1695_s10 = sshll.u32 %s2643_s1, 3 }
  0x42   :  { %s1960_s13 = scalar_lea.vmem %s2601_s8, %s1695_s10  ;;  %s1965_s17 = scalar_lea.vmem %s2602_s9, %s1695_s10 }
  0x43   :  { %1848 = dma.done.wait [#allocation4], 8192 }
  0x44   :  { %1849 = vsyncadd [#allocation4], 4294959104  ;;  %p1698_p1 = scmp.ne.s32.totalorder %s2595_s2, 1 }
  0x45   :  { %v1857_v0 = vmov (!%p1698_p1), 0.0  }
  0x46   :  { %111 = sbr.rel (%p1698_p1) target bundleno = 102 (0x66), region = 33  ;;  %112 = vst [vmem:[#allocation3] sm:$0xff] (!%p1698_p1), %v1857_v0  ;;  %113 = vst [vmem:[#allocation3 + $0x8] sm:$0xff] (!%p1698_p1), %v1857_v0 }
  0x47   :  { %114 = vst [vmem:[#allocation3 + $0x10] sm:$0xff] (!%p1698_p1), %v1857_v0  ;;  %115 = vst [vmem:[#allocation3 + $0x18] sm:$0xff] (!%p1698_p1), %v1857_v0 }
  0x48   :  { %116 = vst [vmem:[#allocation3 + $0x20] sm:$0xff] (!%p1698_p1), %v1857_v0  ;;  %117 = vst [vmem:[#allocation3 + $0x28] sm:$0xff] (!%p1698_p1), %v1857_v0 }
  0x49   :  { %118 = vst [vmem:[#allocation3 + $0x30] sm:$0xff] (!%p1698_p1), %v1857_v0  ;;  %119 = vst [vmem:[#allocation3 + $0x38] sm:$0xff] (!%p1698_p1), %v1857_v0 }
  0x4a   :  { %120 = vst [vmem:[#allocation3 + $0x40] sm:$0xff] (!%p1698_p1), %v1857_v0  ;;  %121 = vst [vmem:[#allocation3 + $0x48] sm:$0xff] (!%p1698_p1), %v1857_v0 }
  0x4b   :  { %122 = vst [vmem:[#allocation3 + $0x50] sm:$0xff] (!%p1698_p1), %v1857_v0  ;;  %123 = vst [vmem:[#allocation3 + $0x58] sm:$0xff] (!%p1698_p1), %v1857_v0 }
  0x4c   :  { %124 = vst [vmem:[#allocation3 + $0x60] sm:$0xff] (!%p1698_p1), %v1857_v0  ;;  %125 = vst [vmem:[#allocation3 + $0x68] sm:$0xff] (!%p1698_p1), %v1857_v0 }
  0x4d   :  { %126 = vst [vmem:[#allocation3 + $0x70] sm:$0xff] %v1857_v0  ;;  %127 = vst [vmem:[#allocation3 + $0x78] sm:$0xff] %v1857_v0 }
  0x4e   :  { %128 = vst [vmem:[#allocation3 + $0x80] sm:$0xff] %v1857_v0  ;;  %129 = vst [vmem:[#allocation3 + $0x88] sm:$0xff] %v1857_v0 }
  0x4f   :  { %130 = vst [vmem:[#allocation3 + $0x90] sm:$0xff] %v1857_v0  ;;  %131 = vst [vmem:[#allocation3 + $0x98] sm:$0xff] %v1857_v0 }
  0x50   :  { %132 = vst [vmem:[#allocation3 + $0xa0] sm:$0xff] %v1857_v0  ;;  %133 = vst [vmem:[#allocation3 + $0xa8] sm:$0xff] %v1857_v0 }
  0x51   :  { %134 = vst [vmem:[#allocation3 + $0xb0] sm:$0xff] %v1857_v0  ;;  %135 = vst [vmem:[#allocation3 + $0xb8] sm:$0xff] %v1857_v0 }
  0x52   :  { %136 = vst [vmem:[#allocation3 + $0xc0] sm:$0xff] %v1857_v0  ;;  %137 = vst [vmem:[#allocation3 + $0xc8] sm:$0xff] %v1857_v0 }
  0x53   :  { %138 = vst [vmem:[#allocation3 + $0xd0] sm:$0xff] %v1857_v0  ;;  %139 = vst [vmem:[#allocation3 + $0xd8] sm:$0xff] %v1857_v0 }
  0x54   :  { %140 = vst [vmem:[#allocation3 + $0xe0] sm:$0xff] %v1857_v0  ;;  %141 = vst [vmem:[#allocation3 + $0xe8] sm:$0xff] %v1857_v0 }
  0x55   :  { %142 = vst [vmem:[#allocation3 + $0xf0] sm:$0xff] %v1857_v0  ;;  %143 = vst [vmem:[#allocation3 + $0xf8] sm:$0xff] %v1857_v0 }
  0x56   :  { %144 = vst [vmem:[#allocation3 + $0x100] sm:$0xff] %v1857_v0  ;;  %145 = vst [vmem:[#allocation3 + $0x108] sm:$0xff] %v1857_v0 }
  0x57   :  { %146 = vst [vmem:[#allocation3 + $0x110] sm:$0xff] %v1857_v0  ;;  %147 = vst [vmem:[#allocation3 + $0x118] sm:$0xff] %v1857_v0 }
  0x58   :  { %148 = vst [vmem:[#allocation3 + $0x120] sm:$0xff] %v1857_v0  ;;  %149 = vst [vmem:[#allocation3 + $0x128] sm:$0xff] %v1857_v0 }
  0x59   :  { %150 = vst [vmem:[#allocation3 + $0x130] sm:$0xff] %v1857_v0  ;;  %151 = vst [vmem:[#allocation3 + $0x138] sm:$0xff] %v1857_v0 }
  0x5a   :  { %152 = vst [vmem:[#allocation3 + $0x140] sm:$0xff] %v1857_v0  ;;  %153 = vst [vmem:[#allocation3 + $0x148] sm:$0xff] %v1857_v0 }
  0x5b   :  { %154 = vst [vmem:[#allocation3 + $0x150] sm:$0xff] %v1857_v0  ;;  %155 = vst [vmem:[#allocation3 + $0x158] sm:$0xff] %v1857_v0 }
  0x5c   :  { %156 = vst [vmem:[#allocation3 + $0x160] sm:$0xff] %v1857_v0  ;;  %157 = vst [vmem:[#allocation3 + $0x168] sm:$0xff] %v1857_v0 }
  0x5d   :  { %158 = vst [vmem:[#allocation3 + $0x170] sm:$0xff] %v1857_v0  ;;  %159 = vst [vmem:[#allocation3 + $0x178] sm:$0xff] %v1857_v0 }
  0x5e   :  { %160 = vst [vmem:[#allocation3 + $0x180] sm:$0xff] %v1857_v0  ;;  %161 = vst [vmem:[#allocation3 + $0x188] sm:$0xff] %v1857_v0 }
  0x5f   :  { %162 = vst [vmem:[#allocation3 + $0x190] sm:$0xff] %v1857_v0  ;;  %163 = vst [vmem:[#allocation3 + $0x198] sm:$0xff] %v1857_v0 }
  0x60   :  { %164 = vst [vmem:[#allocation3 + $0x1a0] sm:$0xff] %v1857_v0  ;;  %165 = vst [vmem:[#allocation3 + $0x1a8] sm:$0xff] %v1857_v0 }
  0x61   :  { %166 = vst [vmem:[#allocation3 + $0x1b0] sm:$0xff] %v1857_v0  ;;  %167 = vst [vmem:[#allocation3 + $0x1b8] sm:$0xff] %v1857_v0 }
  0x62   :  { %168 = vst [vmem:[#allocation3 + $0x1c0] sm:$0xff] %v1857_v0  ;;  %169 = vst [vmem:[#allocation3 + $0x1c8] sm:$0xff] %v1857_v0 }
  0x63   :  { %170 = vst [vmem:[#allocation3 + $0x1d0] sm:$0xff] %v1857_v0  ;;  %171 = vst [vmem:[#allocation3 + $0x1d8] sm:$0xff] %v1857_v0 }
  0x64   :  { %172 = vst [vmem:[#allocation3 + $0x1e0] sm:$0xff] %v1857_v0  ;;  %173 = vst [vmem:[#allocation3 + $0x1e8] sm:$0xff] %v1857_v0 }
  0x65   :  { %174 = vst [vmem:[#allocation3 + $0x1f0] sm:$0xff] %v1857_v0  ;;  %175 = vst [vmem:[#allocation3 + $0x1f8] sm:$0xff] %v1857_v0 }
  0x66 PF:  { %s368_s2 = sld [smem:[#allocation7]]  ;;  %v2034_v1 = vld [vmem:[#allocation11 + $0x8] sm:$0xff]  ;;  %v2036_v2 = vld [vmem:[#allocation11 + $0x18] sm:$0xff]  ;;  %v1858_v3 = vmov 0  }
  0x67   :  { %532 = vmatprep.subr.bf16.mxu1 %v1858_v3  ;;  %821 = vmatprep.subr.bf16.mxu0 %v1858_v3  ;;  %v241_v4 = vunpack.c.l.s8.bf16 %v2034_v1  ;;  %v243_v5 = vunpack.c.l.s8.bf16 %v2036_v2  ;;  %s531_s9 = sld [smem:[#allocation10]] }
  0x68   :  { %s2174_s4 = sld [smem:[#allocation9]] }
  0x69   :  { %564 = vmatprep.mubr.bf16.mxu1 %v241_v4  ;;  %853 = vmatprep.mubr.bf16.mxu0 %v243_v5 }
  0x6c   :  { %s1699_s5 = sshll.u32 %s368_s2, 9 }
  0x6d   :  { %s2042_s8 = scalar_lea.vmem [#allocation2], %s1699_s5 }
  0x6e   :  { %v371_v6 = vld [vmem:[%s2042_s8] sm:$0xff]  ;;  %v372_v7 = vld [vmem:[%s2042_s8 + $0x8] sm:$0xff]  ;;  %v373_v11 = vld [vmem:[%s2042_s8 + $0x10] sm:$0xff]  ;;  %p1700_p2 = scmp.ne.s32.totalorder %s2174_s4, 1 }
  0x6f   :  { %v403_v8 = vld [vmem:[%s2042_s8 + $0x100] sm:$0xff]  ;;  %v435_v9 = vpack.c.bf16 %v372_v7, %v371_v6  ;;  %v404_v10 = vld [vmem:[%s2042_s8 + $0x108] sm:$0xff]  ;;  %v374_v12 = vld [vmem:[%s2042_s8 + $0x18] sm:$0xff] }
  0x70   :  { %v451_v13 = vpack.c.bf16 %v404_v10, %v403_v8  ;;  %v405_v14 = vld [vmem:[%s2042_s8 + $0x110] sm:$0xff]  ;;  %v406_v15 = vld [vmem:[%s2042_s8 + $0x118] sm:$0xff]  ;;  %v436_v16 = vpack.c.bf16 %v374_v12, %v373_v11  ;;  %v375_v18 = vld [vmem:[%s2042_s8 + $0x20] sm:$0xff] }
  0x71   :  { %533 = vmatpush1.bf16.msra.mxu1 %v435_v9  ;;  %v452_v17 = vpack.c.bf16 %v406_v15, %v405_v14  ;;  %v376_v19 = vld [vmem:[%s2042_s8 + $0x28] sm:$0xff]  ;;  %v407_v20 = vld [vmem:[%s2042_s8 + $0x120] sm:$0xff]  ;;  %v377_v24 = vld [vmem:[%s2042_s8 + $0x30] sm:$0xff] }
  0x72   :  { %822 = vmatpush1.bf16.msra.mxu0 %v451_v13  ;;  %534 = vmatprep.subr.bf16.mxu1 %v1858_v3  ;;  %v408_v21 = vld [vmem:[%s2042_s8 + $0x128] sm:$0xff]  ;;  %v437_v22 = vpack.c.bf16 %v376_v19, %v375_v18  ;;  %v378_v25 = vld [vmem:[%s2042_s8 + $0x38] sm:$0xff]  ;;  %v409_v26 = vld [vmem:[%s2042_s8 + $0x130] sm:$0xff] }
  0x73   :  { %823 = vmatprep.subr.bf16.mxu0 %v1858_v3  ;;  %v453_v23 = vpack.c.bf16 %v408_v21, %v407_v20  ;;  %v410_v27 = vld [vmem:[%s2042_s8 + $0x138] sm:$0xff]  ;;  %v438_v28 = vpack.c.bf16 %v378_v25, %v377_v24  ;;  %v379_v30 = vld [vmem:[%s2042_s8 + $0x40] sm:$0xff]  ;;  %v380_v31 = vld [vmem:[%s2042_s8 + $0x48] sm:$0xff] }
  0x74   :  { %v454_v29 = vpack.c.bf16 %v410_v27, %v409_v26  ;;  %v411_v32 = vld [vmem:[%s2042_s8 + $0x140] sm:$0xff]  ;;  %v412_v33 = vld [vmem:[%s2042_s8 + $0x148] sm:$0xff]  ;;  %v439_v34 = vpack.c.bf16 %v380_v31, %v379_v30  ;;  %v381_v36 = vld [vmem:[%s2042_s8 + $0x50] sm:$0xff] }
  0x75   :  { %535 = vmatpush1.bf16.msra.mxu1 %v436_v16  ;;  %v455_v35 = vpack.c.bf16 %v412_v33, %v411_v32  ;;  %v382_v37 = vld [vmem:[%s2042_s8 + $0x58] sm:$0xff]  ;;  %v413_v38 = vld [vmem:[%s2042_s8 + $0x150] sm:$0xff]  ;;  %v383_v42 = vld [vmem:[%s2042_s8 + $0x60] sm:$0xff] }
  0x76   :  { %824 = vmatpush1.bf16.msra.mxu0 %v452_v17  ;;  %536 = vmatprep.subr.bf16.mxu1 %v1858_v3  ;;  %v414_v39 = vld [vmem:[%s2042_s8 + $0x158] sm:$0xff]  ;;  %v440_v40 = vpack.c.bf16 %v382_v37, %v381_v36  ;;  %v384_v43 = vld [vmem:[%s2042_s8 + $0x68] sm:$0xff]  ;;  %v415_v44 = vld [vmem:[%s2042_s8 + $0x160] sm:$0xff] }
  0x77   :  { %825 = vmatprep.subr.bf16.mxu0 %v1858_v3  ;;  %v456_v41 = vpack.c.bf16 %v414_v39, %v413_v38  ;;  %v416_v45 = vld [vmem:[%s2042_s8 + $0x168] sm:$0xff]  ;;  %v441_v46 = vpack.c.bf16 %v384_v43, %v383_v42  ;;  %v385_v48 = vld [vmem:[%s2042_s8 + $0x70] sm:$0xff]  ;;  %v386_v49 = vld [vmem:[%s2042_s8 + $0x78] sm:$0xff] }
  0x78   :  { %v457_v47 = vpack.c.bf16 %v416_v45, %v415_v44  ;;  %v417_v50 = vld [vmem:[%s2042_s8 + $0x170] sm:$0xff]  ;;  %v418_v51 = vld [vmem:[%s2042_s8 + $0x178] sm:$0xff]  ;;  %v442_v52 = vpack.c.bf16 %v386_v49, %v385_v48  ;;  %v387_v54 = vld [vmem:[%s2042_s8 + $0x80] sm:$0xff]  ;;  %v245_v44 = vunpack.c.h.s8.bf16 %v2034_v1 }
  0x79   :  { %537 = vmatpush1.bf16.msra.mxu1 %v437_v22  ;;  %v458_v53 = vpack.c.bf16 %v418_v51, %v417_v50  ;;  %v388_v55 = vld [vmem:[%s2042_s8 + $0x88] sm:$0xff]  ;;  %v419_v56 = vld [vmem:[%s2042_s8 + $0x180] sm:$0xff]  ;;  %v389_v60 = vld [vmem:[%s2042_s8 + $0x90] sm:$0xff] }
  0x7a   :  { %826 = vmatpush1.bf16.msra.mxu0 %v453_v23  ;;  %538 = vmatprep.subr.bf16.mxu1 %v1858_v3  ;;  %v420_v57 = vld [vmem:[%s2042_s8 + $0x188] sm:$0xff]  ;;  %v443_v58 = vpack.c.bf16 %v388_v55, %v387_v54  ;;  %v390_v61 = vld [vmem:[%s2042_s8 + $0x98] sm:$0xff]  ;;  %v421_v62 = vld [vmem:[%s2042_s8 + $0x190] sm:$0xff] }
  0x7b   :  { %827 = vmatprep.subr.bf16.mxu0 %v1858_v3  ;;  %v459_v59 = vpack.c.bf16 %v420_v57, %v419_v56  ;;  %v422_v63 = vld [vmem:[%s2042_s8 + $0x198] sm:$0xff]  ;;  %v444_v0 = vpack.c.bf16 %v390_v61, %v389_v60  ;;  %v391_v5 = vld [vmem:[%s2042_s8 + $0xa0] sm:$0xff]  ;;  %v392_v6 = vld [vmem:[%s2042_s8 + $0xa8] sm:$0xff] }
  0x7c   :  { %v460_v4 = vpack.c.bf16 %v422_v63, %v421_v62  ;;  %v423_v7 = vld [vmem:[%s2042_s8 + $0x1a0] sm:$0xff]  ;;  %v424_v8 = vld [vmem:[%s2042_s8 + $0x1a8] sm:$0xff]  ;;  %v445_v9 = vpack.c.bf16 %v392_v6, %v391_v5  ;;  %v393_v11 = vld [vmem:[%s2042_s8 + $0xb0] sm:$0xff] }
  0x7d   :  { %539 = vmatpush1.bf16.msra.mxu1 %v438_v28  ;;  %v461_v10 = vpack.c.bf16 %v424_v8, %v423_v7  ;;  %v394_v12 = vld [vmem:[%s2042_s8 + $0xb8] sm:$0xff]  ;;  %v425_v13 = vld [vmem:[%s2042_s8 + $0x1b0] sm:$0xff]  ;;  %v395_v17 = vld [vmem:[%s2042_s8 + $0xc0] sm:$0xff] }
  0x7e   :  { %828 = vmatpush1.bf16.msra.mxu0 %v454_v29  ;;  %540 = vmatprep.subr.bf16.mxu1 %v1858_v3  ;;  %v426_v14 = vld [vmem:[%s2042_s8 + $0x1b8] sm:$0xff]  ;;  %v446_v15 = vpack.c.bf16 %v394_v12, %v393_v11  ;;  %v396_v18 = vld [vmem:[%s2042_s8 + $0xc8] sm:$0xff]  ;;  %v427_v19 = vld [vmem:[%s2042_s8 + $0x1c0] sm:$0xff] }
  0x7f   :  { %829 = vmatprep.subr.bf16.mxu0 %v1858_v3  ;;  %v462_v16 = vpack.c.bf16 %v426_v14, %v425_v13  ;;  %v428_v20 = vld [vmem:[%s2042_s8 + $0x1c8] sm:$0xff]  ;;  %v447_v21 = vpack.c.bf16 %v396_v18, %v395_v17  ;;  %v397_v23 = vld [vmem:[%s2042_s8 + $0xd0] sm:$0xff]  ;;  %v398_v24 = vld [vmem:[%s2042_s8 + $0xd8] sm:$0xff] }
  0x80   :  { %v463_v22 = vpack.c.bf16 %v428_v20, %v427_v19  ;;  %v429_v25 = vld [vmem:[%s2042_s8 + $0x1d0] sm:$0xff]  ;;  %v430_v26 = vld [vmem:[%s2042_s8 + $0x1d8] sm:$0xff]  ;;  %v448_v27 = vpack.c.bf16 %v398_v24, %v397_v23  ;;  %v399_v29 = vld [vmem:[%s2042_s8 + $0xe0] sm:$0xff] }
  0x81   :  { %541 = vmatpush1.bf16.msra.mxu1 %v439_v34  ;;  %v464_v28 = vpack.c.bf16 %v430_v26, %v429_v25  ;;  %v400_v30 = vld [vmem:[%s2042_s8 + $0xe8] sm:$0xff]  ;;  %v431_v31 = vld [vmem:[%s2042_s8 + $0x1e0] sm:$0xff]  ;;  %v402_v36 = vld [vmem:[%s2042_s8 + $0xf8] sm:$0xff] }
  0x82   :  { %830 = vmatpush1.bf16.msra.mxu0 %v455_v35  ;;  %542 = vmatprep.subr.bf16.mxu1 %v1858_v3  ;;  %v432_v32 = vld [vmem:[%s2042_s8 + $0x1e8] sm:$0xff]  ;;  %v449_v33 = vpack.c.bf16 %v400_v30, %v399_v29  ;;  %v401_v35 = vld [vmem:[%s2042_s8 + $0xf0] sm:$0xff]  ;;  %v434_v38 = vld [vmem:[%s2042_s8 + $0x1f8] sm:$0xff] }
  0x83   :  { %831 = vmatprep.subr.bf16.mxu0 %v1858_v3  ;;  %v465_v34 = vpack.c.bf16 %v432_v32, %v431_v31  ;;  %v433_v37 = vld [vmem:[%s2042_s8 + $0x1f0] sm:$0xff]  ;;  %v450_v39 = vpack.c.bf16 %v402_v36, %v401_v35  ;;  %v183_v48 = vld [vmem:[#allocation11 + $0x38] sm:$0xff]  ;;  %v185_v56 = vld [vmem:[#allocation11 + $0x48] sm:$0xff] }
  0x84   :  { %v178_v42 = vld [vmem:[#allocation11 + $0x10] sm:$0xff]  ;;  %v187_v57 = vld [vmem:[#allocation11 + $0x58] sm:$0xff]  ;;  %v257_v60 = vunpack.c.l.s8.bf16 %v185_v56  ;;  %v184_v62 = vld [vmem:[#allocation11 + $0x40] sm:$0xff]  ;;  %v261_v5 = vunpack.c.h.s8.bf16 %v185_v56 }
  0x85   :  { %543 = vmatpush1.bf16.msra.mxu1 %v440_v40  ;;  %v176_v40 = vld [vmem:[#allocation11] sm:$0xff]  ;;  %v242_v45 = vunpack.c.l.s8.bf16 %v178_v42  ;;  %v246_v50 = vunpack.c.h.s8.bf16 %v178_v42  ;;  %v182_v1 = vld [vmem:[#allocation11 + $0x30] sm:$0xff]  ;;  %v259_v61 = vunpack.c.l.s8.bf16 %v187_v57  ;;  %v263_v6 = vunpack.c.h.s8.bf16 %v187_v57  ;;  %v189_v7 = vld [vmem:[#allocation11 + $0x68] sm:$0xff] }
  0x86   :  { %832 = vmatpush1.bf16.msra.mxu0 %v456_v41  ;;  %544 = vmatprep.subr.bf16.mxu1 %v1858_v3  ;;  %v466_v41 = vpack.c.bf16 %v434_v38, %v433_v37  ;;  %v240_v43 = vunpack.c.l.s8.bf16 %v176_v40  ;;  %v244_v49 = vunpack.c.h.s8.bf16 %v176_v40  ;;  %v250_v54 = vunpack.c.l.s8.bf16 %v182_v1  ;;  %v186_v63 = vld [vmem:[#allocation11 + $0x50] sm:$0xff]  ;;  %v191_v8 = vld [vmem:[#allocation11 + $0x78] sm:$0xff]  ;;  %v188_v13 = vld [vmem:[#allocation11 + $0x60] sm:$0xff] }
  0x87   :  { %833 = vmatprep.subr.bf16.mxu0 %v1858_v3  ;;  %v265_v11 = vunpack.c.l.s8.bf16 %v189_v7  ;;  %v267_v12 = vunpack.c.l.s8.bf16 %v191_v8  ;;  %v190_v14 = vld [vmem:[#allocation11 + $0x70] sm:$0xff]  ;;  %v269_v17 = vunpack.c.h.s8.bf16 %v189_v7  ;;  %v271_v18 = vunpack.c.h.s8.bf16 %v191_v8  ;;  %v193_v19 = vld [vmem:[#allocation11 + $0x88] sm:$0xff]  ;;  %v195_v20 = vld [vmem:[#allocation11 + $0x98] sm:$0xff] }
  0x88   :  { %v273_v23 = vunpack.c.l.s8.bf16 %v193_v19  ;;  %v275_v24 = vunpack.c.l.s8.bf16 %v195_v20  ;;  %v192_v25 = vld [vmem:[#allocation11 + $0x80] sm:$0xff]  ;;  %v194_v26 = vld [vmem:[#allocation11 + $0x90] sm:$0xff]  ;;  %v277_v29 = vunpack.c.h.s8.bf16 %v193_v19  ;;  %v279_v30 = vunpack.c.h.s8.bf16 %v195_v20  ;;  %v197_v31 = vld [vmem:[#allocation11 + $0xa8] sm:$0xff] }
  0x89   :  { %545 = vmatpush1.bf16.msra.mxu1 %v441_v46  ;;  %v247_v46 = vunpack.c.h.s8.bf16 %v2036_v2  ;;  %v255_v2 = vunpack.c.h.s8.bf16 %v183_v48  ;;  %v199_v32 = vld [vmem:[#allocation11 + $0xb8] sm:$0xff]  ;;  %v281_v35 = vunpack.c.l.s8.bf16 %v197_v31  ;;  %v196_v37 = vld [vmem:[#allocation11 + $0xa0] sm:$0xff]  ;;  %v198_v38 = vld [vmem:[#allocation11 + $0xb0] sm:$0xff] }
  0x8a   :  { %834 = vmatpush1.bf16.msra.mxu0 %v457_v47  ;;  %546 = vmatprep.subr.bf16.mxu1 %v1858_v3  ;;  %v181_v47 = vld [vmem:[#allocation11 + $0x28] sm:$0xff]  ;;  %v283_v36 = vunpack.c.l.s8.bf16 %v199_v32  ;;  %v282_v40 = vunpack.c.l.s8.bf16 %v198_v38  ;;  %v287_v42 = vunpack.c.h.s8.bf16 %v199_v32 }
  0x8b   :  { %835 = vmatprep.subr.bf16.mxu0 %v1858_v3  ;;  %v249_v51 = vunpack.c.l.s8.bf16 %v181_v47  ;;  %v253_v55 = vunpack.c.h.s8.bf16 %v181_v47 }
  0x8d   :  { %547 = vmatpush1.bf16.msra.mxu1 %v442_v52  ;;  %v251_v52 = vunpack.c.l.s8.bf16 %v183_v48 }
  0x8e   :  { %836 = vmatpush1.bf16.msra.mxu0 %v458_v53  ;;  %548 = vmatprep.subr.bf16.mxu1 %v1858_v3 }
  0x8f   :  { %837 = vmatprep.subr.bf16.mxu0 %v1858_v3 }
  0x91   :  { %549 = vmatpush1.bf16.msra.mxu1 %v443_v58 }
  0x92   :  { %838 = vmatpush1.bf16.msra.mxu0 %v459_v59  ;;  %550 = vmatprep.subr.bf16.mxu1 %v1858_v3  ;;  %v254_v59 = vunpack.c.h.s8.bf16 %v182_v1 }
  0x93   :  { %839 = vmatprep.subr.bf16.mxu0 %v1858_v3 }
  0x95   :  { %551 = vmatpush1.bf16.msra.mxu1 %v444_v0  ;;  %v256_v0 = vunpack.c.l.s8.bf16 %v184_v62 }
  0x96   :  { %840 = vmatpush1.bf16.msra.mxu0 %v460_v4  ;;  %552 = vmatprep.subr.bf16.mxu1 %v1858_v3  ;;  %v258_v4 = vunpack.c.l.s8.bf16 %v186_v63 }
  0x97   :  { %841 = vmatprep.subr.bf16.mxu0 %v1858_v3 }
  0x99   :  { %553 = vmatpush1.bf16.msra.mxu1 %v445_v9  ;;  %v260_v9 = vunpack.c.h.s8.bf16 %v184_v62 }
  0x9a   :  { %842 = vmatpush1.bf16.msra.mxu0 %v461_v10  ;;  %554 = vmatprep.subr.bf16.mxu1 %v1858_v3  ;;  %v262_v10 = vunpack.c.h.s8.bf16 %v186_v63 }
  0x9b   :  { %843 = vmatprep.subr.bf16.mxu0 %v1858_v3 }
  0x9d   :  { %555 = vmatpush1.bf16.msra.mxu1 %v446_v15  ;;  %v264_v15 = vunpack.c.l.s8.bf16 %v188_v13 }
  0x9e   :  { %844 = vmatpush1.bf16.msra.mxu0 %v462_v16  ;;  %556 = vmatprep.subr.bf16.mxu1 %v1858_v3  ;;  %v266_v16 = vunpack.c.l.s8.bf16 %v190_v14 }
  0x9f   :  { %845 = vmatprep.subr.bf16.mxu0 %v1858_v3 }
  0xa1   :  { %557 = vmatpush1.bf16.msra.mxu1 %v447_v21  ;;  %v268_v21 = vunpack.c.h.s8.bf16 %v188_v13 }
  0xa2   :  { %846 = vmatpush1.bf16.msra.mxu0 %v463_v22  ;;  %558 = vmatprep.subr.bf16.mxu1 %v1858_v3  ;;  %v270_v22 = vunpack.c.h.s8.bf16 %v190_v14 }
  0xa3   :  { %847 = vmatprep.subr.bf16.mxu0 %v1858_v3 }
  0xa5   :  { %559 = vmatpush1.bf16.msra.mxu1 %v448_v27  ;;  %v272_v27 = vunpack.c.l.s8.bf16 %v192_v25 }
  0xa6   :  { %848 = vmatpush1.bf16.msra.mxu0 %v464_v28  ;;  %560 = vmatprep.subr.bf16.mxu1 %v1858_v3  ;;  %v274_v28 = vunpack.c.l.s8.bf16 %v194_v26 }
  0xa7   :  { %849 = vmatprep.subr.bf16.mxu0 %v1858_v3 }
  0xa9   :  { %561 = vmatpush1.bf16.msra.mxu1 %v449_v33  ;;  %v276_v33 = vunpack.c.h.s8.bf16 %v192_v25 }
  0xaa   :  { %850 = vmatpush1.bf16.msra.mxu0 %v465_v34  ;;  %562 = vmatprep.subr.bf16.mxu1 %v1858_v3  ;;  %v278_v34 = vunpack.c.h.s8.bf16 %v194_v26 }
  0xab   :  { %851 = vmatprep.subr.bf16.mxu0 %v1858_v3  ;;  %v180_v3 = vld [vmem:[#allocation11 + $0x20] sm:$0xff] }
  0xac   :  { %v248_v53 = vunpack.c.l.s8.bf16 %v180_v3  ;;  %v252_v58 = vunpack.c.h.s8.bf16 %v180_v3 }
  0xad   :  { %563 = vmatpush1.bf16.msra.mxu1 %v450_v39  ;;  %v280_v39 = vunpack.c.l.s8.bf16 %v196_v37 }
  0xae   :  { %852 = vmatpush1.bf16.msra.mxu0 %v466_v41  ;;  %v285_v41 = vunpack.c.h.s8.bf16 %v197_v31 }
  0xb0   :  { %565 = vmatmul.mubr.bf16.vlgmr.msra.gmra.mrb[0].mxu1 %v240_v43  ;;  %v201_v43 = vld [vmem:[#allocation11 + $0xc8] sm:$0xff] }
  0xb1   :  { %854 = vmatmul.mubr.bf16.vlgmr.msra.gmra.mrb[0].mxu0 %v242_v45  ;;  %572 = vmatprep.mubr.bf16.mxu1 %v245_v44  ;;  %v203_v44 = vld [vmem:[#allocation11 + $0xd8] sm:$0xff]  ;;  %v284_v45 = vunpack.c.h.s8.bf16 %v196_v37  ;;  %v289_v47 = vunpack.c.l.s8.bf16 %v201_v43  ;;  %v293_v3 = vunpack.c.h.s8.bf16 %v201_v43 }
  0xb2   :  { %861 = vmatprep.mubr.bf16.mxu0 %v247_v46  ;;  %v286_v46 = vunpack.c.h.s8.bf16 %v198_v38  ;;  %v291_v48 = vunpack.c.l.s8.bf16 %v203_v44  ;;  %v295_v1 = vunpack.c.h.s8.bf16 %v203_v44 }
  0xb8   :  { %573 = vmatmul.mubr.bf16.gmra.mrb[4].mxu1 %v244_v49  ;;  %v200_v49 = vld [vmem:[#allocation11 + $0xc0] sm:$0xff] }
  0xb9   :  { %862 = vmatmul.mubr.bf16.gmra.mrb[4].mxu0 %v246_v50  ;;  %580 = vmatprep.mubr.bf16.mxu1 %v249_v51  ;;  %v202_v50 = vld [vmem:[#allocation11 + $0xd0] sm:$0xff]  ;;  %v288_v51 = vunpack.c.l.s8.bf16 %v200_v49 }
  0xba   :  { %869 = vmatprep.mubr.bf16.mxu0 %v251_v52  ;;  %v290_v52 = vunpack.c.l.s8.bf16 %v202_v50 }
  0xc0   :  { %581 = vmatmul.mubr.bf16.gmra.mrb[8].mxu1 %v248_v53  ;;  %v205_v53 = vld [vmem:[#allocation11 + $0xe8] sm:$0xff] }
  0xc1   :  { %870 = vmatmul.mubr.bf16.gmra.mrb[8].mxu0 %v250_v54  ;;  %588 = vmatprep.mubr.bf16.mxu1 %v253_v55  ;;  %v207_v54 = vld [vmem:[#allocation11 + $0xf8] sm:$0xff]  ;;  %v292_v55 = vunpack.c.h.s8.bf16 %v200_v49  ;;  %v297_v56 = vunpack.c.l.s8.bf16 %v205_v53  ;;  %v301_v62 = vunpack.c.h.s8.bf16 %v205_v53 }
  0xc2   :  { %877 = vmatprep.mubr.bf16.mxu0 %v255_v2  ;;  %v294_v2 = vunpack.c.h.s8.bf16 %v202_v50  ;;  %v299_v57 = vunpack.c.l.s8.bf16 %v207_v54  ;;  %v303_v63 = vunpack.c.h.s8.bf16 %v207_v54 }
  0xc8   :  { %589 = vmatmul.mubr.bf16.gmra.mrb[12].mxu1 %v252_v58  ;;  %v204_v58 = vld [vmem:[#allocation11 + $0xe0] sm:$0xff] }
  0xc9   :  { %878 = vmatmul.mubr.bf16.gmra.mrb[12].mxu0 %v254_v59  ;;  %596 = vmatprep.mubr.bf16.mxu1 %v257_v60  ;;  %v206_v59 = vld [vmem:[#allocation11 + $0xf0] sm:$0xff]  ;;  %v296_v60 = vunpack.c.l.s8.bf16 %v204_v58 }
  0xca   :  { %885 = vmatprep.mubr.bf16.mxu0 %v259_v61  ;;  %v298_v61 = vunpack.c.l.s8.bf16 %v206_v59 }
  0xd0   :  { %597 = vmatmul.mubr.bf16.gmra.mrb[16].mxu1 %v256_v0  ;;  %v209_v0 = vld [vmem:[#allocation11 + $0x108] sm:$0xff] }
  0xd1   :  { %886 = vmatmul.mubr.bf16.gmra.mrb[16].mxu0 %v258_v4  ;;  %604 = vmatprep.mubr.bf16.mxu1 %v261_v5  ;;  %v211_v4 = vld [vmem:[#allocation11 + $0x118] sm:$0xff]  ;;  %v300_v5 = vunpack.c.h.s8.bf16 %v204_v58  ;;  %v305_v7 = vunpack.c.l.s8.bf16 %v209_v0  ;;  %v309_v13 = vunpack.c.h.s8.bf16 %v209_v0 }
  0xd2   :  { %893 = vmatprep.mubr.bf16.mxu0 %v263_v6  ;;  %v302_v6 = vunpack.c.h.s8.bf16 %v206_v59  ;;  %v307_v8 = vunpack.c.l.s8.bf16 %v211_v4  ;;  %v311_v14 = vunpack.c.h.s8.bf16 %v211_v4 }
  0xd8   :  { %605 = vmatmul.mubr.bf16.gmra.mrb[20].mxu1 %v260_v9  ;;  %v208_v9 = vld [vmem:[#allocation11 + $0x100] sm:$0xff] }
  0xd9   :  { %894 = vmatmul.mubr.bf16.gmra.mrb[20].mxu0 %v262_v10  ;;  %612 = vmatprep.mubr.bf16.mxu1 %v265_v11  ;;  %v210_v10 = vld [vmem:[#allocation11 + $0x110] sm:$0xff]  ;;  %v304_v11 = vunpack.c.l.s8.bf16 %v208_v9 }
  0xda   :  { %901 = vmatprep.mubr.bf16.mxu0 %v267_v12  ;;  %v306_v12 = vunpack.c.l.s8.bf16 %v210_v10 }
  0xe0   :  { %613 = vmatmul.mubr.bf16.gmra.mrb[24].mxu1 %v264_v15  ;;  %v213_v15 = vld [vmem:[#allocation11 + $0x128] sm:$0xff] }
  0xe1   :  { %902 = vmatmul.mubr.bf16.gmra.mrb[24].mxu0 %v266_v16  ;;  %620 = vmatprep.mubr.bf16.mxu1 %v269_v17  ;;  %v215_v16 = vld [vmem:[#allocation11 + $0x138] sm:$0xff]  ;;  %v308_v17 = vunpack.c.h.s8.bf16 %v208_v9  ;;  %v313_v19 = vunpack.c.l.s8.bf16 %v213_v15  ;;  %v317_v25 = vunpack.c.h.s8.bf16 %v213_v15  ;;  %v2140_v15 = vstv %s531_s9 }
  0xe2   :  { %909 = vmatprep.mubr.bf16.mxu0 %v271_v18  ;;  %v310_v18 = vunpack.c.h.s8.bf16 %v210_v10  ;;  %v315_v20 = vunpack.c.l.s8.bf16 %v215_v16  ;;  %v319_v26 = vunpack.c.h.s8.bf16 %v215_v16 }
  0xe8   :  { %621 = vmatmul.mubr.bf16.gmra.mrb[28].mxu1 %v268_v21  ;;  %v212_v21 = vld [vmem:[#allocation11 + $0x120] sm:$0xff] }
  0xe9   :  { %910 = vmatmul.mubr.bf16.gmra.mrb[28].mxu0 %v270_v22  ;;  %628 = vmatprep.mubr.bf16.mxu1 %v273_v23  ;;  %v214_v22 = vld [vmem:[#allocation11 + $0x130] sm:$0xff]  ;;  %v312_v23 = vunpack.c.l.s8.bf16 %v212_v21 }
  0xea   :  { %917 = vmatprep.mubr.bf16.mxu0 %v275_v24  ;;  %v314_v24 = vunpack.c.l.s8.bf16 %v214_v22 }
  0xf0   :  { %629 = vmatmul.mubr.bf16.gmra.mrb[32].mxu1 %v272_v27  ;;  %v217_v27 = vld [vmem:[#allocation11 + $0x148] sm:$0xff] }
  0xf1   :  { %918 = vmatmul.mubr.bf16.gmra.mrb[32].mxu0 %v274_v28  ;;  %636 = vmatprep.mubr.bf16.mxu1 %v277_v29  ;;  %v219_v28 = vld [vmem:[#allocation11 + $0x158] sm:$0xff]  ;;  %v316_v29 = vunpack.c.h.s8.bf16 %v212_v21  ;;  %v321_v31 = vunpack.c.l.s8.bf16 %v217_v27  ;;  %v325_v37 = vunpack.c.h.s8.bf16 %v217_v27 }
  0xf2   :  { %925 = vmatprep.mubr.bf16.mxu0 %v279_v30  ;;  %v318_v30 = vunpack.c.h.s8.bf16 %v214_v22  ;;  %v323_v32 = vunpack.c.l.s8.bf16 %v219_v28  ;;  %v327_v38 = vunpack.c.h.s8.bf16 %v219_v28 }
  0xf8   :  { %637 = vmatmul.mubr.bf16.gmra.mrb[36].mxu1 %v276_v33  ;;  %v216_v33 = vld [vmem:[#allocation11 + $0x140] sm:$0xff] }
  0xf9   :  { %926 = vmatmul.mubr.bf16.gmra.mrb[36].mxu0 %v278_v34  ;;  %644 = vmatprep.mubr.bf16.mxu1 %v281_v35  ;;  %v218_v34 = vld [vmem:[#allocation11 + $0x150] sm:$0xff]  ;;  %v320_v35 = vunpack.c.l.s8.bf16 %v216_v33 }
  0xfa   :  { %933 = vmatprep.mubr.bf16.mxu0 %v283_v36  ;;  %v322_v36 = vunpack.c.l.s8.bf16 %v218_v34 }
 0x100   :  { %645 = vmatmul.mubr.bf16.gmra.mrb[40].mxu1 %v280_v39  ;;  %v221_v39 = vld [vmem:[#allocation11 + $0x168] sm:$0xff] }
 0x101   :  { %934 = vmatmul.mubr.bf16.gmra.mrb[40].mxu0 %v282_v40  ;;  %652 = vmatprep.mubr.bf16.mxu1 %v285_v41  ;;  %v223_v40 = vld [vmem:[#allocation11 + $0x178] sm:$0xff]  ;;  %v324_v41 = vunpack.c.h.s8.bf16 %v216_v33  ;;  %v329_v43 = vunpack.c.l.s8.bf16 %v221_v39  ;;  %v333_v49 = vunpack.c.h.s8.bf16 %v221_v39  ;;  %v232_v33 = vld [vmem:[#allocation11 + $0x1c0] sm:$0xff] }
 0x102   :  { %941 = vmatprep.mubr.bf16.mxu0 %v287_v42  ;;  %v326_v42 = vunpack.c.h.s8.bf16 %v218_v34  ;;  %v331_v44 = vunpack.c.l.s8.bf16 %v223_v40  ;;  %v335_v50 = vunpack.c.h.s8.bf16 %v223_v40  ;;  %v234_v34 = vld [vmem:[#allocation11 + $0x1d0] sm:$0xff]  ;;  %v352_v39 = vunpack.c.l.s8.bf16 %v232_v33 }
 0x108   :  { %653 = vmatmul.mubr.bf16.gmra.mrb[44].mxu1 %v284_v45  ;;  %v220_v45 = vld [vmem:[#allocation11 + $0x160] sm:$0xff] }
 0x109   :  { %942 = vmatmul.mubr.bf16.gmra.mrb[44].mxu0 %v286_v46  ;;  %660 = vmatprep.mubr.bf16.mxu1 %v289_v47  ;;  %v222_v46 = vld [vmem:[#allocation11 + $0x170] sm:$0xff]  ;;  %v328_v47 = vunpack.c.l.s8.bf16 %v220_v45 }
 0x10a   :  { %949 = vmatprep.mubr.bf16.mxu0 %v291_v48  ;;  %v330_v48 = vunpack.c.l.s8.bf16 %v222_v46 }
 0x110   :  { %661 = vmatmul.mubr.bf16.gmra.mrb[48].mxu1 %v288_v51  ;;  %v225_v51 = vld [vmem:[#allocation11 + $0x188] sm:$0xff] }
 0x111   :  { %950 = vmatmul.mubr.bf16.gmra.mrb[48].mxu0 %v290_v52  ;;  %668 = vmatprep.mubr.bf16.mxu1 %v293_v3  ;;  %v227_v52 = vld [vmem:[#allocation11 + $0x198] sm:$0xff]  ;;  %v332_v3 = vunpack.c.h.s8.bf16 %v220_v45  ;;  %v337_v53 = vunpack.c.l.s8.bf16 %v225_v51  ;;  %v341_v58 = vunpack.c.h.s8.bf16 %v225_v51  ;;  %v469_v45 = vld [vmem:[#allocation3 + $0x10] sm:$0xff] }
 0x112   :  { %957 = vmatprep.mubr.bf16.mxu0 %v295_v1  ;;  %v334_v1 = vunpack.c.h.s8.bf16 %v222_v46  ;;  %v339_v54 = vunpack.c.l.s8.bf16 %v227_v52  ;;  %v343_v59 = vunpack.c.h.s8.bf16 %v227_v52  ;;  %v470_v52 = vld [vmem:[#allocation3 + $0x18] sm:$0xff] }
 0x118   :  { %669 = vmatmul.mubr.bf16.gmra.mrb[52].mxu1 %v292_v55  ;;  %v224_v55 = vld [vmem:[#allocation11 + $0x180] sm:$0xff] }
 0x119   :  { %958 = vmatmul.mubr.bf16.gmra.mrb[52].mxu0 %v294_v2  ;;  %676 = vmatprep.mubr.bf16.mxu1 %v297_v56  ;;  %v226_v2 = vld [vmem:[#allocation11 + $0x190] sm:$0xff]  ;;  %v336_v56 = vunpack.c.l.s8.bf16 %v224_v55 }
 0x11a   :  { %965 = vmatprep.mubr.bf16.mxu0 %v299_v57  ;;  %v338_v57 = vunpack.c.l.s8.bf16 %v226_v2 }
 0x120   :  { %677 = vmatmul.mubr.bf16.gmra.mrb[56].mxu1 %v296_v60  ;;  %v229_v60 = vld [vmem:[#allocation11 + $0x1a8] sm:$0xff] }
 0x121   :  { %966 = vmatmul.mubr.bf16.gmra.mrb[56].mxu0 %v298_v61  ;;  %684 = vmatprep.mubr.bf16.mxu1 %v301_v62  ;;  %v231_v61 = vld [vmem:[#allocation11 + $0x1b8] sm:$0xff]  ;;  %v340_v62 = vunpack.c.h.s8.bf16 %v224_v55  ;;  %v345_v0 = vunpack.c.l.s8.bf16 %v229_v60  ;;  %v349_v9 = vunpack.c.h.s8.bf16 %v229_v60 }
 0x122   :  { %973 = vmatprep.mubr.bf16.mxu0 %v303_v63  ;;  %v342_v63 = vunpack.c.h.s8.bf16 %v226_v2  ;;  %v347_v4 = vunpack.c.l.s8.bf16 %v231_v61  ;;  %v351_v10 = vunpack.c.h.s8.bf16 %v231_v61  ;;  %v239_v2 = vld [vmem:[#allocation11 + $0x1f8] sm:$0xff] }
 0x128   :  { %685 = vmatmul.mubr.bf16.gmra.mrb[60].mxu1 %v300_v5  ;;  %v228_v5 = vld [vmem:[#allocation11 + $0x1a0] sm:$0xff] }
 0x129   :  { %974 = vmatmul.mubr.bf16.gmra.mrb[60].mxu0 %v302_v6  ;;  %692 = vmatprep.mubr.bf16.mxu1 %v305_v7  ;;  %v230_v6 = vld [vmem:[#allocation11 + $0x1b0] sm:$0xff]  ;;  %v344_v7 = vunpack.c.l.s8.bf16 %v228_v5 }
 0x12a   :  { %981 = vmatprep.mubr.bf16.mxu0 %v307_v8  ;;  %v346_v8 = vunpack.c.l.s8.bf16 %v230_v6  ;;  %v350_v21 = vunpack.c.h.s8.bf16 %v230_v6  ;;  %v363_v6 = vunpack.c.l.s8.bf16 %v239_v2 }
 0x130   :  { %693 = vmatmul.mubr.bf16.gmra.mrb[64].mxu1 %v304_v11  ;;  %v233_v11 = vld [vmem:[#allocation11 + $0x1c8] sm:$0xff] }
 0x131   :  { %982 = vmatmul.mubr.bf16.gmra.mrb[64].mxu0 %v306_v12  ;;  %700 = vmatprep.mubr.bf16.mxu1 %v309_v13  ;;  %v235_v13 = vld [vmem:[#allocation11 + $0x1d8] sm:$0xff]  ;;  %v353_v22 = vunpack.c.l.s8.bf16 %v233_v11 }
 0x132   :  { %989 = vmatprep.mubr.bf16.mxu0 %v311_v14 }
 0x138   :  { %701 = vmatmul.mubr.bf16.gmra.mrb[68].mxu1 %v308_v17  ;;  %v348_v17 = vunpack.c.h.s8.bf16 %v228_v5 }
 0x139   :  { %990 = vmatmul.mubr.bf16.gmra.mrb[68].mxu0 %v310_v18  ;;  %708 = vmatprep.mubr.bf16.mxu1 %v313_v19 }
 0x13a   :  { %997 = vmatprep.mubr.bf16.mxu0 %v315_v20 }
 0x140   :  { %709 = vmatmul.mubr.bf16.gmra.mrb[72].mxu1 %v312_v23  ;;  %v467_v23 = vld [vmem:[#allocation3] sm:$0xff] }
 0x141   :  { %998 = vmatmul.mubr.bf16.gmra.mrb[72].mxu0 %v314_v24  ;;  %716 = vmatprep.mubr.bf16.mxu1 %v317_v25 }
 0x142   :  { %1005 = vmatprep.mubr.bf16.mxu0 %v319_v26  ;;  %v355_v26 = vunpack.c.l.s8.bf16 %v235_v13 }
 0x148   :  { %717 = vmatmul.mubr.bf16.gmra.mrb[76].mxu1 %v316_v29 }
 0x149   :  { %1006 = vmatmul.mubr.bf16.gmra.mrb[76].mxu0 %v318_v30  ;;  %724 = vmatprep.mubr.bf16.mxu1 %v321_v31  ;;  %v468_v30 = vld [vmem:[#allocation3 + $0x8] sm:$0xff] }
 0x14a   :  { %1013 = vmatprep.mubr.bf16.mxu0 %v323_v32 }
 0x150   :  { %725 = vmatmul.mubr.bf16.gmra.mrb[80].mxu1 %v320_v35 }
 0x151   :  { %1014 = vmatmul.mubr.bf16.gmra.mrb[80].mxu0 %v322_v36  ;;  %732 = vmatprep.mubr.bf16.mxu1 %v325_v37 }
 0x152   :  { %1021 = vmatprep.mubr.bf16.mxu0 %v327_v38 }
 0x158   :  { %733 = vmatmul.mubr.bf16.gmra.mrb[84].mxu1 %v324_v41 }
 0x159   :  { %1022 = vmatmul.mubr.bf16.gmra.mrb[84].mxu0 %v326_v42  ;;  %740 = vmatprep.mubr.bf16.mxu1 %v329_v43  ;;  %v354_v43 = vunpack.c.l.s8.bf16 %v234_v34 }
 0x15a   :  { %1029 = vmatprep.mubr.bf16.mxu0 %v331_v44  ;;  %v357_v44 = vunpack.c.h.s8.bf16 %v233_v11 }
 0x160   :  { %741 = vmatmul.mubr.bf16.gmra.mrb[88].mxu1 %v328_v47 }
 0x161   :  { %1030 = vmatmul.mubr.bf16.gmra.mrb[88].mxu0 %v330_v48  ;;  %748 = vmatprep.mubr.bf16.mxu1 %v333_v49  ;;  %v359_v48 = vunpack.c.h.s8.bf16 %v235_v13  ;;  %v236_v13 = vld [vmem:[#allocation11 + $0x1e0] sm:$0xff] }
 0x162   :  { %1037 = vmatprep.mubr.bf16.mxu0 %v335_v50 }
 0x168   :  { %749 = vmatmul.mubr.bf16.gmra.mrb[92].mxu1 %v332_v3 }
 0x169   :  { %1038 = vmatmul.mubr.bf16.gmra.mrb[92].mxu0 %v334_v1  ;;  %756 = vmatprep.mubr.bf16.mxu1 %v337_v53  ;;  %v237_v53 = vld [vmem:[#allocation11 + $0x1e8] sm:$0xff] }
 0x16a   :  { %1045 = vmatprep.mubr.bf16.mxu0 %v339_v54 }
 0x170   :  { %757 = vmatmul.mubr.bf16.gmra.mrb[96].mxu1 %v336_v56 }
 0x171   :  { %1046 = vmatmul.mubr.bf16.gmra.mrb[96].mxu0 %v338_v57  ;;  %764 = vmatprep.mubr.bf16.mxu1 %v341_v58  ;;  %v356_v58 = vunpack.c.h.s8.bf16 %v232_v33  ;;  %v474_v33 = vld [vmem:[#allocation3 + $0x38] sm:$0xff] }
 0x172   :  { %1053 = vmatprep.mubr.bf16.mxu0 %v343_v59 }
 0x178   :  { %765 = vmatmul.mubr.bf16.gmra.mrb[100].mxu1 %v340_v62  ;;  %v358_v62 = vunpack.c.h.s8.bf16 %v234_v34 }
 0x179   :  { %1054 = vmatmul.mubr.bf16.gmra.mrb[100].mxu0 %v342_v63  ;;  %772 = vmatprep.mubr.bf16.mxu1 %v345_v0  ;;  %v361_v63 = vunpack.c.l.s8.bf16 %v237_v53  ;;  %v471_v0 = vld [vmem:[#allocation3 + $0x20] sm:$0xff] }
 0x17a   :  { %1061 = vmatprep.mubr.bf16.mxu0 %v347_v4 }
 0x180   :  { %773 = vmatmul.mubr.bf16.gmra.mrb[104].mxu1 %v344_v7 }
 0x181   :  { %1062 = vmatmul.mubr.bf16.gmra.mrb[104].mxu0 %v346_v8  ;;  %780 = vmatprep.mubr.bf16.mxu1 %v349_v9 }
 0x182   :  { %1069 = vmatprep.mubr.bf16.mxu0 %v351_v10  ;;  %v472_v10 = vld [vmem:[#allocation3 + $0x28] sm:$0xff] }
 0x183   :  { %v566_v12 = vpop.f32.mrb[0].mxu1 }
 0x184   :  { %v855_v14 = vpop.f32.mrb[0].mxu0  ;;  %v568_v16 = vpop.f32.mrb[1].mxu1 }
 0x185   :  { %v856_v18 = vadd.f32 %v855_v14, %v566_v12  ;;  %v857_v19 = vpop.f32.mrb[1].mxu0  ;;  %v569_v20 = vpop.f32.mrb[2].mxu1  ;;  %v238_v14 = vld [vmem:[#allocation11 + $0x1f0] sm:$0xff] }
 0x186   :  { %v858_v24 = vpop.f32.mrb[2].mxu0  ;;  %v571_v25 = vpop.f32.mrb[3].mxu1 }
 0x187   :  { %v1111_v27 = vmul.f32 %v2140_v15, %v856_v18  ;;  %v859_v28 = vadd.f32 %v858_v24, %v569_v20  ;;  %v860_v29 = vpop.f32.mrb[3].mxu0  ;;  %v360_v20 = vunpack.c.l.s8.bf16 %v236_v13  ;;  %v362_v24 = vunpack.c.l.s8.bf16 %v238_v14 }
 0x188   :  { %781 = vmatmul.mubr.bf16.gmra.mrb[108].mxu1 %v348_v17  ;;  %v365_v25 = vunpack.c.h.s8.bf16 %v237_v53  ;;  %v367_v29 = vunpack.c.h.s8.bf16 %v239_v2 }
 0x189   :  { %v1175_v31 = vadd.f32 %v1111_v27, %v467_v23  ;;  %v1112_v32 = vmul.f32 %v2140_v15, %v859_v28  ;;  %1070 = vmatmul.mubr.bf16.gmra.mrb[108].mxu0 %v350_v21  ;;  %788 = vmatprep.mubr.bf16.mxu1 %v353_v22 }
 0x18a   :  { %1077 = vmatprep.mubr.bf16.mxu0 %v355_v26  ;;  %v473_v26 = vld [vmem:[#allocation3 + $0x30] sm:$0xff] }
 0x18b   :  { %1239 = vst [vmem:[#allocation3] sm:$0xff] %v1175_v31  ;;  %v1176_v35 = vadd.f32 %v1112_v32, %v468_v30  ;;  %v574_v36 = vpop.f32.mrb[4].mxu1 }
 0x18c   :  { %v863_v37 = vpop.f32.mrb[4].mxu0  ;;  %v576_v38 = vpop.f32.mrb[5].mxu1 }
 0x18d   :  { %1240 = vst [vmem:[#allocation3 + $0x8] sm:$0xff] %v1176_v35  ;;  %v864_v40 = vadd.f32 %v863_v37, %v574_v36  ;;  %v865_v41 = vpop.f32.mrb[5].mxu0  ;;  %v577_v42 = vpop.f32.mrb[6].mxu1 }
 0x18e   :  { %v866_v46 = vpop.f32.mrb[6].mxu0  ;;  %v579_v47 = vpop.f32.mrb[7].mxu1 }
 0x18f   :  { %v1113_v49 = vmul.f32 %v2140_v15, %v864_v40  ;;  %v867_v50 = vadd.f32 %v866_v46, %v577_v42  ;;  %v868_v51 = vpop.f32.mrb[7].mxu0  ;;  %v364_v40 = vunpack.c.h.s8.bf16 %v236_v13  ;;  %v479_v13 = vld [vmem:[#allocation3 + $0x60] sm:$0xff] }
 0x190   :  { %789 = vmatmul.mubr.bf16.gmra.mrb[112].mxu1 %v352_v39  ;;  %v476_v51 = vld [vmem:[#allocation3 + $0x48] sm:$0xff] }
 0x191   :  { %v1177_v3 = vadd.f32 %v1113_v49, %v469_v45  ;;  %v1114_v1 = vmul.f32 %v2140_v15, %v867_v50  ;;  %1078 = vmatmul.mubr.bf16.gmra.mrb[112].mxu0 %v354_v43  ;;  %796 = vmatprep.mubr.bf16.mxu1 %v357_v44  ;;  %v366_v44 = vunpack.c.h.s8.bf16 %v238_v14  ;;  %v475_v45 = vld [vmem:[#allocation3 + $0x40] sm:$0xff] }
 0x192   :  { %1085 = vmatprep.mubr.bf16.mxu0 %v359_v48 }
 0x193   :  { %1241 = vst [vmem:[#allocation3 + $0x10] sm:$0xff] %v1177_v3  ;;  %v1178_v54 = vadd.f32 %v1114_v1, %v470_v52  ;;  %v582_v55 = vpop.f32.mrb[8].mxu1 }
 0x194   :  { %v871_v56 = vpop.f32.mrb[8].mxu0  ;;  %v584_v57 = vpop.f32.mrb[9].mxu1 }
 0x195   :  { %1242 = vst [vmem:[#allocation3 + $0x18] sm:$0xff] %v1178_v54  ;;  %v872_v59 = vadd.f32 %v871_v56, %v582_v55  ;;  %v873_v60 = vpop.f32.mrb[9].mxu0  ;;  %v585_v61 = vpop.f32.mrb[10].mxu1 }
 0x196   :  { %v874_v4 = vpop.f32.mrb[10].mxu0  ;;  %v587_v5 = vpop.f32.mrb[11].mxu1 }
 0x197   :  { %v1115_v7 = vmul.f32 %v2140_v15, %v872_v59  ;;  %v875_v8 = vadd.f32 %v874_v4, %v585_v61  ;;  %v876_v9 = vpop.f32.mrb[11].mxu0 }
 0x198   :  { %797 = vmatmul.mubr.bf16.gmra.mrb[116].mxu1 %v356_v58  ;;  %v477_v58 = vld [vmem:[#allocation3 + $0x50] sm:$0xff] }
 0x199   :  { %v1179_v11 = vadd.f32 %v1115_v7, %v471_v0  ;;  %v1116_v12 = vmul.f32 %v2140_v15, %v875_v8  ;;  %1086 = vmatmul.mubr.bf16.gmra.mrb[116].mxu0 %v358_v62  ;;  %804 = vmatprep.mubr.bf16.mxu1 %v361_v63  ;;  %v478_v0 = vld [vmem:[#allocation3 + $0x58] sm:$0xff] }
 0x19a   :  { %1093 = vmatprep.mubr.bf16.mxu0 %v363_v6 }
 0x19b   :  { %1243 = vst [vmem:[#allocation3 + $0x20] sm:$0xff] %v1179_v11  ;;  %v1180_v16 = vadd.f32 %v1116_v12, %v472_v10  ;;  %v590_v17 = vpop.f32.mrb[12].mxu1 }
 0x19c   :  { %v879_v18 = vpop.f32.mrb[12].mxu0  ;;  %v592_v19 = vpop.f32.mrb[13].mxu1 }
 0x19d   :  { %1244 = vst [vmem:[#allocation3 + $0x28] sm:$0xff] %v1180_v16  ;;  %v880_v21 = vadd.f32 %v879_v18, %v590_v17  ;;  %v881_v22 = vpop.f32.mrb[13].mxu0  ;;  %v593_v23 = vpop.f32.mrb[14].mxu1 }
 0x19e   :  { %v882_v27 = vpop.f32.mrb[14].mxu0  ;;  %v595_v28 = vpop.f32.mrb[15].mxu1 }
 0x19f   :  { %v1117_v30 = vmul.f32 %v2140_v15, %v880_v21  ;;  %v883_v31 = vadd.f32 %v882_v27, %v593_v23  ;;  %v884_v32 = vpop.f32.mrb[15].mxu0 }
 0x1a0   :  { %805 = vmatmul.mubr.bf16.gmra.mrb[120].mxu1 %v360_v20  ;;  %v480_v20 = vld [vmem:[#allocation3 + $0x68] sm:$0xff] }
 0x1a1   :  { %v1181_v34 = vadd.f32 %v1117_v30, %v473_v26  ;;  %v1118_v35 = vmul.f32 %v2140_v15, %v883_v31  ;;  %1094 = vmatmul.mubr.bf16.gmra.mrb[120].mxu0 %v362_v24  ;;  %812 = vmatprep.mubr.bf16.mxu1 %v365_v25  ;;  %v481_v30 = vld [vmem:[#allocation3 + $0x70] sm:$0xff] }
 0x1a2   :  { %1101 = vmatprep.mubr.bf16.mxu0 %v367_v29 }
 0x1a3   :  { %1245 = vst [vmem:[#allocation3 + $0x30] sm:$0xff] %v1181_v34  ;;  %v1182_v36 = vadd.f32 %v1118_v35, %v474_v33  ;;  %v598_v37 = vpop.f32.mrb[16].mxu1 }
 0x1a4   :  { %v887_v38 = vpop.f32.mrb[16].mxu0  ;;  %v600_v39 = vpop.f32.mrb[17].mxu1 }
 0x1a5   :  { %1246 = vst [vmem:[#allocation3 + $0x38] sm:$0xff] %v1182_v36  ;;  %v888_v41 = vadd.f32 %v887_v38, %v598_v37  ;;  %v889_v42 = vpop.f32.mrb[17].mxu0  ;;  %v601_v43 = vpop.f32.mrb[18].mxu1  ;;  %v482_v36 = vld [vmem:[#allocation3 + $0x78] sm:$0xff] }
 0x1a6   :  { %v890_v46 = vpop.f32.mrb[18].mxu0  ;;  %v603_v47 = vpop.f32.mrb[19].mxu1 }
 0x1a7   :  { %v1119_v48 = vmul.f32 %v2140_v15, %v888_v41  ;;  %v891_v49 = vadd.f32 %v890_v46, %v601_v43  ;;  %v892_v50 = vpop.f32.mrb[19].mxu0  ;;  %v483_v46 = vld [vmem:[#allocation3 + $0x80] sm:$0xff] }
 0x1a8   :  { %813 = vmatmul.mubr.bf16.gmra.mrb[124].mxu1 %v364_v40 }
 0x1a9   :  { %v1183_v52 = vadd.f32 %v1119_v48, %v475_v45  ;;  %v1120_v3 = vmul.f32 %v2140_v15, %v891_v49  ;;  %1102 = vmatmul.mubr.bf16.gmra.mrb[124].mxu0 %v366_v44 }
 0x1ab   :  { %1247 = vst [vmem:[#allocation3 + $0x40] sm:$0xff] %v1183_v52  ;;  %v1184_v1 = vadd.f32 %v1120_v3, %v476_v51  ;;  %v606_v53 = vpop.f32.mrb[20].mxu1  ;;  %v484_v52 = vld [vmem:[#allocation3 + $0x88] sm:$0xff] }
 0x1ac   :  { %v895_v54 = vpop.f32.mrb[20].mxu0  ;;  %v608_v55 = vpop.f32.mrb[21].mxu1 }
 0x1ad   :  { %1248 = vst [vmem:[#allocation3 + $0x48] sm:$0xff] %v1184_v1  ;;  %v896_v2 = vadd.f32 %v895_v54, %v606_v53  ;;  %v897_v56 = vpop.f32.mrb[21].mxu0  ;;  %v609_v57 = vpop.f32.mrb[22].mxu1 }
 0x1ae   :  { %v898_v59 = vpop.f32.mrb[22].mxu0  ;;  %v611_v60 = vpop.f32.mrb[23].mxu1 }
 0x1af   :  { %v1121_v61 = vmul.f32 %v2140_v15, %v896_v2  ;;  %v899_v62 = vadd.f32 %v898_v59, %v609_v57  ;;  %v900_v63 = vpop.f32.mrb[23].mxu0  ;;  %v485_v59 = vld [vmem:[#allocation3 + $0x90] sm:$0xff] }
 0x1b1   :  { %v1185_v4 = vadd.f32 %v1121_v61, %v477_v58  ;;  %v1122_v5 = vmul.f32 %v2140_v15, %v899_v62 }
 0x1b3   :  { %1249 = vst [vmem:[#allocation3 + $0x50] sm:$0xff] %v1185_v4  ;;  %v1186_v6 = vadd.f32 %v1122_v5, %v478_v0  ;;  %v614_v7 = vpop.f32.mrb[24].mxu1  ;;  %v486_v4 = vld [vmem:[#allocation3 + $0x98] sm:$0xff] }
 0x1b4   :  { %v903_v8 = vpop.f32.mrb[24].mxu0  ;;  %v616_v9 = vpop.f32.mrb[25].mxu1 }
 0x1b5   :  { %1250 = vst [vmem:[#allocation3 + $0x58] sm:$0xff] %v1186_v6  ;;  %v904_v10 = vadd.f32 %v903_v8, %v614_v7  ;;  %v905_v11 = vpop.f32.mrb[25].mxu0  ;;  %v617_v12 = vpop.f32.mrb[26].mxu1 }
 0x1b6   :  { %v906_v14 = vpop.f32.mrb[26].mxu0  ;;  %v619_v16 = vpop.f32.mrb[27].mxu1 }
 0x1b7   :  { %v1123_v17 = vmul.f32 %v2140_v15, %v904_v10  ;;  %v907_v18 = vadd.f32 %v906_v14, %v617_v12  ;;  %v908_v19 = vpop.f32.mrb[27].mxu0  ;;  %v487_v14 = vld [vmem:[#allocation3 + $0xa0] sm:$0xff] }
 0x1b9   :  { %v1187_v21 = vadd.f32 %v1123_v17, %v479_v13  ;;  %v1124_v22 = vmul.f32 %v2140_v15, %v907_v18 }
 0x1bb   :  { %1251 = vst [vmem:[#allocation3 + $0x60] sm:$0xff] %v1187_v21  ;;  %v1188_v23 = vadd.f32 %v1124_v22, %v480_v20  ;;  %v622_v24 = vpop.f32.mrb[28].mxu1  ;;  %v488_v21 = vld [vmem:[#allocation3 + $0xa8] sm:$0xff] }
 0x1bc   :  { %v911_v25 = vpop.f32.mrb[28].mxu0  ;;  %v624_v26 = vpop.f32.mrb[29].mxu1 }
 0x1bd   :  { %1252 = vst [vmem:[#allocation3 + $0x68] sm:$0xff] %v1188_v23  ;;  %v912_v27 = vadd.f32 %v911_v25, %v622_v24  ;;  %v913_v28 = vpop.f32.mrb[29].mxu0  ;;  %v625_v29 = vpop.f32.mrb[30].mxu1 }
 0x1be   :  { %v914_v31 = vpop.f32.mrb[30].mxu0  ;;  %v627_v32 = vpop.f32.mrb[31].mxu1 }
 0x1bf   :  { %v1125_v33 = vmul.f32 %v2140_v15, %v912_v27  ;;  %v915_v34 = vadd.f32 %v914_v31, %v625_v29  ;;  %v916_v35 = vpop.f32.mrb[31].mxu0  ;;  %v489_v31 = vld [vmem:[#allocation3 + $0xb0] sm:$0xff] }
 0x1c1   :  { %v1189_v37 = vadd.f32 %v1125_v33, %v481_v30  ;;  %v1126_v38 = vmul.f32 %v2140_v15, %v915_v34 }
 0x1c3   :  { %1253 = vst [vmem:[#allocation3 + $0x70] sm:$0xff] %v1189_v37  ;;  %v1190_v39 = vadd.f32 %v1126_v38, %v482_v36  ;;  %v630_v40 = vpop.f32.mrb[32].mxu1  ;;  %v490_v37 = vld [vmem:[#allocation3 + $0xb8] sm:$0xff] }
 0x1c4   :  { %v919_v41 = vpop.f32.mrb[32].mxu0  ;;  %v632_v42 = vpop.f32.mrb[33].mxu1 }
 0x1c5   :  { %1254 = vst [vmem:[#allocation3 + $0x78] sm:$0xff] %v1190_v39  ;;  %v920_v43 = vadd.f32 %v919_v41, %v630_v40  ;;  %v921_v44 = vpop.f32.mrb[33].mxu0  ;;  %v633_v45 = vpop.f32.mrb[34].mxu1 }
 0x1c6   :  { %v922_v47 = vpop.f32.mrb[34].mxu0  ;;  %v635_v48 = vpop.f32.mrb[35].mxu1 }
 0x1c7   :  { %v1127_v49 = vmul.f32 %v2140_v15, %v920_v43  ;;  %v923_v50 = vadd.f32 %v922_v47, %v633_v45  ;;  %v924_v51 = vpop.f32.mrb[35].mxu0  ;;  %v491_v47 = vld [vmem:[#allocation3 + $0xc0] sm:$0xff] }
 0x1c9   :  { %v1191_v3 = vadd.f32 %v1127_v49, %v483_v46  ;;  %v1128_v1 = vmul.f32 %v2140_v15, %v923_v50 }
 0x1cb   :  { %1255 = vst [vmem:[#allocation3 + $0x80] sm:$0xff] %v1191_v3  ;;  %v1192_v53 = vadd.f32 %v1128_v1, %v484_v52  ;;  %v638_v54 = vpop.f32.mrb[36].mxu1  ;;  %v492_v3 = vld [vmem:[#allocation3 + $0xc8] sm:$0xff] }
 0x1cc   :  { %v927_v55 = vpop.f32.mrb[36].mxu0  ;;  %v640_v2 = vpop.f32.mrb[37].mxu1 }
 0x1cd   :  { %1256 = vst [vmem:[#allocation3 + $0x88] sm:$0xff] %v1192_v53  ;;  %v928_v56 = vadd.f32 %v927_v55, %v638_v54  ;;  %v929_v57 = vpop.f32.mrb[37].mxu0  ;;  %v641_v58 = vpop.f32.mrb[38].mxu1 }
 0x1ce   :  { %v930_v60 = vpop.f32.mrb[38].mxu0  ;;  %v643_v61 = vpop.f32.mrb[39].mxu1 }
 0x1cf   :  { %v1129_v62 = vmul.f32 %v2140_v15, %v928_v56  ;;  %v931_v63 = vadd.f32 %v930_v60, %v641_v58  ;;  %v932_v0 = vpop.f32.mrb[39].mxu0  ;;  %v493_v60 = vld [vmem:[#allocation3 + $0xd0] sm:$0xff] }
 0x1d1   :  { %v1193_v5 = vadd.f32 %v1129_v62, %v485_v59  ;;  %v1130_v6 = vmul.f32 %v2140_v15, %v931_v63 }
 0x1d3   :  { %1257 = vst [vmem:[#allocation3 + $0x90] sm:$0xff] %v1193_v5  ;;  %v1194_v7 = vadd.f32 %v1130_v6, %v486_v4  ;;  %v646_v8 = vpop.f32.mrb[40].mxu1  ;;  %v494_v5 = vld [vmem:[#allocation3 + $0xd8] sm:$0xff] }
 0x1d4   :  { %v935_v9 = vpop.f32.mrb[40].mxu0  ;;  %v648_v10 = vpop.f32.mrb[41].mxu1 }
 0x1d5   :  { %1258 = vst [vmem:[#allocation3 + $0x98] sm:$0xff] %v1194_v7  ;;  %v936_v11 = vadd.f32 %v935_v9, %v646_v8  ;;  %v937_v12 = vpop.f32.mrb[41].mxu0  ;;  %v649_v13 = vpop.f32.mrb[42].mxu1 }
 0x1d6   :  { %v938_v16 = vpop.f32.mrb[42].mxu0  ;;  %v651_v17 = vpop.f32.mrb[43].mxu1 }
 0x1d7   :  { %v1131_v18 = vmul.f32 %v2140_v15, %v936_v11  ;;  %v939_v19 = vadd.f32 %v938_v16, %v649_v13  ;;  %v940_v20 = vpop.f32.mrb[43].mxu0  ;;  %v495_v16 = vld [vmem:[#allocation3 + $0xe0] sm:$0xff] }
 0x1d9   :  { %v1195_v22 = vadd.f32 %v1131_v18, %v487_v14  ;;  %v1132_v23 = vmul.f32 %v2140_v15, %v939_v19 }
 0x1db   :  { %1259 = vst [vmem:[#allocation3 + $0xa0] sm:$0xff] %v1195_v22  ;;  %v1196_v24 = vadd.f32 %v1132_v23, %v488_v21  ;;  %v654_v25 = vpop.f32.mrb[44].mxu1  ;;  %v496_v22 = vld [vmem:[#allocation3 + $0xe8] sm:$0xff] }
 0x1dc   :  { %v943_v26 = vpop.f32.mrb[44].mxu0  ;;  %v656_v27 = vpop.f32.mrb[45].mxu1 }
 0x1dd   :  { %1260 = vst [vmem:[#allocation3 + $0xa8] sm:$0xff] %v1196_v24  ;;  %v944_v28 = vadd.f32 %v943_v26, %v654_v25  ;;  %v945_v29 = vpop.f32.mrb[45].mxu0  ;;  %v657_v30 = vpop.f32.mrb[46].mxu1 }
 0x1de   :  { %v946_v32 = vpop.f32.mrb[46].mxu0  ;;  %v659_v33 = vpop.f32.mrb[47].mxu1 }
 0x1df   :  { %v1133_v34 = vmul.f32 %v2140_v15, %v944_v28  ;;  %v947_v35 = vadd.f32 %v946_v32, %v657_v30  ;;  %v948_v36 = vpop.f32.mrb[47].mxu0  ;;  %v497_v32 = vld [vmem:[#allocation3 + $0xf0] sm:$0xff] }
 0x1e1   :  { %v1197_v38 = vadd.f32 %v1133_v34, %v489_v31  ;;  %v1134_v39 = vmul.f32 %v2140_v15, %v947_v35 }
 0x1e3   :  { %1261 = vst [vmem:[#allocation3 + $0xb0] sm:$0xff] %v1197_v38  ;;  %v1198_v40 = vadd.f32 %v1134_v39, %v490_v37  ;;  %v662_v41 = vpop.f32.mrb[48].mxu1  ;;  %v498_v38 = vld [vmem:[#allocation3 + $0xf8] sm:$0xff] }
 0x1e4   :  { %v951_v42 = vpop.f32.mrb[48].mxu0  ;;  %v664_v43 = vpop.f32.mrb[49].mxu1 }
 0x1e5   :  { %1262 = vst [vmem:[#allocation3 + $0xb8] sm:$0xff] %v1198_v40  ;;  %v952_v44 = vadd.f32 %v951_v42, %v662_v41  ;;  %v953_v45 = vpop.f32.mrb[49].mxu0  ;;  %v665_v46 = vpop.f32.mrb[50].mxu1 }
 0x1e6   :  { %v954_v48 = vpop.f32.mrb[50].mxu0  ;;  %v667_v49 = vpop.f32.mrb[51].mxu1 }
 0x1e7   :  { %v1135_v50 = vmul.f32 %v2140_v15, %v952_v44  ;;  %v955_v51 = vadd.f32 %v954_v48, %v665_v46  ;;  %v956_v52 = vpop.f32.mrb[51].mxu0  ;;  %v499_v48 = vld [vmem:[#allocation3 + $0x100] sm:$0xff] }
 0x1e9   :  { %v1199_v1 = vadd.f32 %v1135_v50, %v491_v47  ;;  %v1136_v53 = vmul.f32 %v2140_v15, %v955_v51 }
 0x1eb   :  { %1263 = vst [vmem:[#allocation3 + $0xc0] sm:$0xff] %v1199_v1  ;;  %v1200_v54 = vadd.f32 %v1136_v53, %v492_v3  ;;  %v670_v55 = vpop.f32.mrb[52].mxu1  ;;  %v500_v1 = vld [vmem:[#allocation3 + $0x108] sm:$0xff] }
 0x1ec   :  { %v959_v2 = vpop.f32.mrb[52].mxu0  ;;  %v672_v56 = vpop.f32.mrb[53].mxu1 }
 0x1ed   :  { %1264 = vst [vmem:[#allocation3 + $0xc8] sm:$0xff] %v1200_v54  ;;  %v960_v57 = vadd.f32 %v959_v2, %v670_v55  ;;  %v961_v58 = vpop.f32.mrb[53].mxu0  ;;  %v673_v59 = vpop.f32.mrb[54].mxu1 }
 0x1ee   :  { %v962_v61 = vpop.f32.mrb[54].mxu0  ;;  %v675_v62 = vpop.f32.mrb[55].mxu1 }
 0x1ef   :  { %v1137_v63 = vmul.f32 %v2140_v15, %v960_v57  ;;  %v963_v0 = vadd.f32 %v962_v61, %v673_v59  ;;  %v964_v4 = vpop.f32.mrb[55].mxu0  ;;  %v501_v61 = vld [vmem:[#allocation3 + $0x110] sm:$0xff] }
 0x1f1   :  { %v1201_v6 = vadd.f32 %v1137_v63, %v493_v60  ;;  %v1138_v7 = vmul.f32 %v2140_v15, %v963_v0 }
 0x1f3   :  { %1265 = vst [vmem:[#allocation3 + $0xd0] sm:$0xff] %v1201_v6  ;;  %v1202_v8 = vadd.f32 %v1138_v7, %v494_v5  ;;  %v678_v9 = vpop.f32.mrb[56].mxu1  ;;  %v502_v6 = vld [vmem:[#allocation3 + $0x118] sm:$0xff] }
 0x1f4   :  { %v967_v10 = vpop.f32.mrb[56].mxu0  ;;  %v680_v11 = vpop.f32.mrb[57].mxu1 }
 0x1f5   :  { %1266 = vst [vmem:[#allocation3 + $0xd8] sm:$0xff] %v1202_v8  ;;  %v968_v12 = vadd.f32 %v967_v10, %v678_v9  ;;  %v969_v13 = vpop.f32.mrb[57].mxu0  ;;  %v681_v14 = vpop.f32.mrb[58].mxu1 }
 0x1f6   :  { %v970_v17 = vpop.f32.mrb[58].mxu0  ;;  %v683_v18 = vpop.f32.mrb[59].mxu1 }
 0x1f7   :  { %v1139_v19 = vmul.f32 %v2140_v15, %v968_v12  ;;  %v971_v20 = vadd.f32 %v970_v17, %v681_v14  ;;  %v972_v21 = vpop.f32.mrb[59].mxu0  ;;  %v503_v17 = vld [vmem:[#allocation3 + $0x120] sm:$0xff] }
 0x1f9   :  { %v1203_v23 = vadd.f32 %v1139_v19, %v495_v16  ;;  %v1140_v24 = vmul.f32 %v2140_v15, %v971_v20 }
 0x1fb   :  { %1267 = vst [vmem:[#allocation3 + $0xe0] sm:$0xff] %v1203_v23  ;;  %v1204_v25 = vadd.f32 %v1140_v24, %v496_v22  ;;  %v686_v26 = vpop.f32.mrb[60].mxu1  ;;  %v504_v23 = vld [vmem:[#allocation3 + $0x128] sm:$0xff] }
 0x1fc   :  { %v975_v27 = vpop.f32.mrb[60].mxu0  ;;  %v688_v28 = vpop.f32.mrb[61].mxu1 }
 0x1fd   :  { %1268 = vst [vmem:[#allocation3 + $0xe8] sm:$0xff] %v1204_v25  ;;  %v976_v29 = vadd.f32 %v975_v27, %v686_v26  ;;  %v977_v30 = vpop.f32.mrb[61].mxu0  ;;  %v689_v31 = vpop.f32.mrb[62].mxu1 }
 0x1fe   :  { %v978_v33 = vpop.f32.mrb[62].mxu0  ;;  %v691_v34 = vpop.f32.mrb[63].mxu1 }
 0x1ff   :  { %v1141_v35 = vmul.f32 %v2140_v15, %v976_v29  ;;  %v979_v36 = vadd.f32 %v978_v33, %v689_v31  ;;  %v980_v37 = vpop.f32.mrb[63].mxu0  ;;  %v505_v33 = vld [vmem:[#allocation3 + $0x130] sm:$0xff] }
 0x201   :  { %v1205_v39 = vadd.f32 %v1141_v35, %v497_v32  ;;  %v1142_v40 = vmul.f32 %v2140_v15, %v979_v36 }
 0x203   :  { %1269 = vst [vmem:[#allocation3 + $0xf0] sm:$0xff] %v1205_v39  ;;  %v1206_v41 = vadd.f32 %v1142_v40, %v498_v38  ;;  %v694_v42 = vpop.f32.mrb[64].mxu1  ;;  %v506_v39 = vld [vmem:[#allocation3 + $0x138] sm:$0xff] }
 0x204   :  { %v983_v43 = vpop.f32.mrb[64].mxu0  ;;  %v696_v44 = vpop.f32.mrb[65].mxu1 }
 0x205   :  { %1270 = vst [vmem:[#allocation3 + $0xf8] sm:$0xff] %v1206_v41  ;;  %v984_v45 = vadd.f32 %v983_v43, %v694_v42  ;;  %v985_v46 = vpop.f32.mrb[65].mxu0  ;;  %v697_v47 = vpop.f32.mrb[66].mxu1 }
 0x206   :  { %v986_v49 = vpop.f32.mrb[66].mxu0  ;;  %v699_v50 = vpop.f32.mrb[67].mxu1 }
 0x207   :  { %v1143_v51 = vmul.f32 %v2140_v15, %v984_v45  ;;  %v987_v52 = vadd.f32 %v986_v49, %v697_v47  ;;  %v988_v3 = vpop.f32.mrb[67].mxu0  ;;  %v507_v49 = vld [vmem:[#allocation3 + $0x140] sm:$0xff] }
 0x209   :  { %v1207_v53 = vadd.f32 %v1143_v51, %v499_v48  ;;  %v1144_v54 = vmul.f32 %v2140_v15, %v987_v52 }
 0x20b   :  { %1271 = vst [vmem:[#allocation3 + $0x100] sm:$0xff] %v1207_v53  ;;  %v1208_v55 = vadd.f32 %v1144_v54, %v500_v1  ;;  %v702_v2 = vpop.f32.mrb[68].mxu1  ;;  %v508_v53 = vld [vmem:[#allocation3 + $0x148] sm:$0xff] }
 0x20c   :  { %v991_v56 = vpop.f32.mrb[68].mxu0  ;;  %v704_v57 = vpop.f32.mrb[69].mxu1 }
 0x20d   :  { %1272 = vst [vmem:[#allocation3 + $0x108] sm:$0xff] %v1208_v55  ;;  %v992_v58 = vadd.f32 %v991_v56, %v702_v2  ;;  %v993_v59 = vpop.f32.mrb[69].mxu0  ;;  %v705_v60 = vpop.f32.mrb[70].mxu1 }
 0x20e   :  { %v994_v62 = vpop.f32.mrb[70].mxu0  ;;  %v707_v63 = vpop.f32.mrb[71].mxu1 }
 0x20f   :  { %v1145_v0 = vmul.f32 %v2140_v15, %v992_v58  ;;  %v995_v4 = vadd.f32 %v994_v62, %v705_v60  ;;  %v996_v5 = vpop.f32.mrb[71].mxu0  ;;  %v509_v62 = vld [vmem:[#allocation3 + $0x150] sm:$0xff] }
 0x211   :  { %v1209_v7 = vadd.f32 %v1145_v0, %v501_v61  ;;  %v1146_v8 = vmul.f32 %v2140_v15, %v995_v4 }
 0x213   :  { %1273 = vst [vmem:[#allocation3 + $0x110] sm:$0xff] %v1209_v7  ;;  %v1210_v9 = vadd.f32 %v1146_v8, %v502_v6  ;;  %v710_v10 = vpop.f32.mrb[72].mxu1  ;;  %v510_v7 = vld [vmem:[#allocation3 + $0x158] sm:$0xff] }
 0x214   :  { %v999_v11 = vpop.f32.mrb[72].mxu0  ;;  %v712_v12 = vpop.f32.mrb[73].mxu1 }
 0x215   :  { %1274 = vst [vmem:[#allocation3 + $0x118] sm:$0xff] %v1210_v9  ;;  %v1000_v13 = vadd.f32 %v999_v11, %v710_v10  ;;  %v1001_v14 = vpop.f32.mrb[73].mxu0  ;;  %v713_v16 = vpop.f32.mrb[74].mxu1 }
 0x216   :  { %v1002_v18 = vpop.f32.mrb[74].mxu0  ;;  %v715_v19 = vpop.f32.mrb[75].mxu1 }
 0x217   :  { %v1147_v20 = vmul.f32 %v2140_v15, %v1000_v13  ;;  %v1003_v21 = vadd.f32 %v1002_v18, %v713_v16  ;;  %v1004_v22 = vpop.f32.mrb[75].mxu0  ;;  %v511_v18 = vld [vmem:[#allocation3 + $0x160] sm:$0xff] }
 0x219   :  { %v1211_v24 = vadd.f32 %v1147_v20, %v503_v17  ;;  %v1148_v25 = vmul.f32 %v2140_v15, %v1003_v21 }
 0x21b   :  { %1275 = vst [vmem:[#allocation3 + $0x120] sm:$0xff] %v1211_v24  ;;  %v1212_v26 = vadd.f32 %v1148_v25, %v504_v23  ;;  %v718_v27 = vpop.f32.mrb[76].mxu1  ;;  %v512_v24 = vld [vmem:[#allocation3 + $0x168] sm:$0xff] }
 0x21c   :  { %v1007_v28 = vpop.f32.mrb[76].mxu0  ;;  %v720_v29 = vpop.f32.mrb[77].mxu1 }
 0x21d   :  { %1276 = vst [vmem:[#allocation3 + $0x128] sm:$0xff] %v1212_v26  ;;  %v1008_v30 = vadd.f32 %v1007_v28, %v718_v27  ;;  %v1009_v31 = vpop.f32.mrb[77].mxu0  ;;  %v721_v32 = vpop.f32.mrb[78].mxu1 }
 0x21e   :  { %v1010_v34 = vpop.f32.mrb[78].mxu0  ;;  %v723_v35 = vpop.f32.mrb[79].mxu1 }
 0x21f   :  { %v1149_v36 = vmul.f32 %v2140_v15, %v1008_v30  ;;  %v1011_v37 = vadd.f32 %v1010_v34, %v721_v32  ;;  %v1012_v38 = vpop.f32.mrb[79].mxu0  ;;  %v513_v34 = vld [vmem:[#allocation3 + $0x170] sm:$0xff] }
 0x221   :  { %v1213_v40 = vadd.f32 %v1149_v36, %v505_v33  ;;  %v1150_v41 = vmul.f32 %v2140_v15, %v1011_v37 }
 0x223   :  { %1277 = vst [vmem:[#allocation3 + $0x130] sm:$0xff] %v1213_v40  ;;  %v1214_v42 = vadd.f32 %v1150_v41, %v506_v39  ;;  %v726_v43 = vpop.f32.mrb[80].mxu1  ;;  %v514_v40 = vld [vmem:[#allocation3 + $0x178] sm:$0xff] }
 0x224   :  { %v1015_v44 = vpop.f32.mrb[80].mxu0  ;;  %v728_v45 = vpop.f32.mrb[81].mxu1 }
 0x225   :  { %1278 = vst [vmem:[#allocation3 + $0x138] sm:$0xff] %v1214_v42  ;;  %v1016_v46 = vadd.f32 %v1015_v44, %v726_v43  ;;  %v1017_v47 = vpop.f32.mrb[81].mxu0  ;;  %v729_v48 = vpop.f32.mrb[82].mxu1 }
 0x226   :  { %v1018_v50 = vpop.f32.mrb[82].mxu0  ;;  %v731_v51 = vpop.f32.mrb[83].mxu1 }
 0x227   :  { %v1151_v52 = vmul.f32 %v2140_v15, %v1016_v46  ;;  %v1019_v3 = vadd.f32 %v1018_v50, %v729_v48  ;;  %v1020_v1 = vpop.f32.mrb[83].mxu0  ;;  %v515_v50 = vld [vmem:[#allocation3 + $0x180] sm:$0xff] }
 0x229   :  { %v1215_v54 = vadd.f32 %v1151_v52, %v507_v49  ;;  %v1152_v55 = vmul.f32 %v2140_v15, %v1019_v3 }
 0x22b   :  { %1279 = vst [vmem:[#allocation3 + $0x140] sm:$0xff] %v1215_v54  ;;  %v1216_v2 = vadd.f32 %v1152_v55, %v508_v53  ;;  %v734_v56 = vpop.f32.mrb[84].mxu1  ;;  %v516_v54 = vld [vmem:[#allocation3 + $0x188] sm:$0xff] }
 0x22c   :  { %v1023_v57 = vpop.f32.mrb[84].mxu0  ;;  %v736_v58 = vpop.f32.mrb[85].mxu1 }
 0x22d   :  { %1280 = vst [vmem:[#allocation3 + $0x148] sm:$0xff] %v1216_v2  ;;  %v1024_v59 = vadd.f32 %v1023_v57, %v734_v56  ;;  %v1025_v60 = vpop.f32.mrb[85].mxu0  ;;  %v737_v61 = vpop.f32.mrb[86].mxu1 }
 0x22e   :  { %v1026_v63 = vpop.f32.mrb[86].mxu0  ;;  %v739_v0 = vpop.f32.mrb[87].mxu1 }
 0x22f   :  { %v1153_v4 = vmul.f32 %v2140_v15, %v1024_v59  ;;  %v1027_v5 = vadd.f32 %v1026_v63, %v737_v61  ;;  %v1028_v6 = vpop.f32.mrb[87].mxu0  ;;  %v517_v63 = vld [vmem:[#allocation3 + $0x190] sm:$0xff] }
 0x231   :  { %v1217_v8 = vadd.f32 %v1153_v4, %v509_v62  ;;  %v1154_v9 = vmul.f32 %v2140_v15, %v1027_v5 }
 0x233   :  { %1281 = vst [vmem:[#allocation3 + $0x150] sm:$0xff] %v1217_v8  ;;  %v1218_v10 = vadd.f32 %v1154_v9, %v510_v7  ;;  %v742_v11 = vpop.f32.mrb[88].mxu1  ;;  %v518_v8 = vld [vmem:[#allocation3 + $0x198] sm:$0xff] }
 0x234   :  { %v1031_v12 = vpop.f32.mrb[88].mxu0  ;;  %v744_v13 = vpop.f32.mrb[89].mxu1 }
 0x235   :  { %1282 = vst [vmem:[#allocation3 + $0x158] sm:$0xff] %v1218_v10  ;;  %v1032_v14 = vadd.f32 %v1031_v12, %v742_v11  ;;  %v1033_v16 = vpop.f32.mrb[89].mxu0  ;;  %v745_v17 = vpop.f32.mrb[90].mxu1 }
 0x236   :  { %v1034_v19 = vpop.f32.mrb[90].mxu0  ;;  %v747_v20 = vpop.f32.mrb[91].mxu1 }
 0x237   :  { %v1155_v21 = vmul.f32 %v2140_v15, %v1032_v14  ;;  %v1035_v22 = vadd.f32 %v1034_v19, %v745_v17  ;;  %v1036_v23 = vpop.f32.mrb[91].mxu0  ;;  %v519_v19 = vld [vmem:[#allocation3 + $0x1a0] sm:$0xff] }
 0x239   :  { %v1219_v25 = vadd.f32 %v1155_v21, %v511_v18  ;;  %v1156_v26 = vmul.f32 %v2140_v15, %v1035_v22 }
 0x23b   :  { %1283 = vst [vmem:[#allocation3 + $0x160] sm:$0xff] %v1219_v25  ;;  %v1220_v27 = vadd.f32 %v1156_v26, %v512_v24  ;;  %v750_v28 = vpop.f32.mrb[92].mxu1  ;;  %v520_v25 = vld [vmem:[#allocation3 + $0x1a8] sm:$0xff] }
 0x23c   :  { %v1039_v29 = vpop.f32.mrb[92].mxu0  ;;  %v752_v30 = vpop.f32.mrb[93].mxu1 }
 0x23d   :  { %1284 = vst [vmem:[#allocation3 + $0x168] sm:$0xff] %v1220_v27  ;;  %v1040_v31 = vadd.f32 %v1039_v29, %v750_v28  ;;  %v1041_v32 = vpop.f32.mrb[93].mxu0  ;;  %v753_v33 = vpop.f32.mrb[94].mxu1 }
 0x23e   :  { %v1042_v35 = vpop.f32.mrb[94].mxu0  ;;  %v755_v36 = vpop.f32.mrb[95].mxu1 }
 0x23f   :  { %v1157_v37 = vmul.f32 %v2140_v15, %v1040_v31  ;;  %v1043_v38 = vadd.f32 %v1042_v35, %v753_v33  ;;  %v1044_v39 = vpop.f32.mrb[95].mxu0  ;;  %v521_v35 = vld [vmem:[#allocation3 + $0x1b0] sm:$0xff] }
 0x241   :  { %v1221_v41 = vadd.f32 %v1157_v37, %v513_v34  ;;  %v1158_v42 = vmul.f32 %v2140_v15, %v1043_v38 }
 0x243   :  { %1285 = vst [vmem:[#allocation3 + $0x170] sm:$0xff] %v1221_v41  ;;  %v1222_v43 = vadd.f32 %v1158_v42, %v514_v40  ;;  %v758_v44 = vpop.f32.mrb[96].mxu1  ;;  %v522_v41 = vld [vmem:[#allocation3 + $0x1b8] sm:$0xff] }
 0x244   :  { %v1047_v45 = vpop.f32.mrb[96].mxu0  ;;  %v760_v46 = vpop.f32.mrb[97].mxu1 }
 0x245   :  { %1286 = vst [vmem:[#allocation3 + $0x178] sm:$0xff] %v1222_v43  ;;  %v1048_v47 = vadd.f32 %v1047_v45, %v758_v44  ;;  %v1049_v48 = vpop.f32.mrb[97].mxu0  ;;  %v761_v49 = vpop.f32.mrb[98].mxu1 }
 0x246   :  { %v1050_v51 = vpop.f32.mrb[98].mxu0  ;;  %v763_v52 = vpop.f32.mrb[99].mxu1 }
 0x247   :  { %v1159_v3 = vmul.f32 %v2140_v15, %v1048_v47  ;;  %v1051_v1 = vadd.f32 %v1050_v51, %v761_v49  ;;  %v1052_v53 = vpop.f32.mrb[99].mxu0  ;;  %v523_v51 = vld [vmem:[#allocation3 + $0x1c0] sm:$0xff] }
 0x249   :  { %v1223_v55 = vadd.f32 %v1159_v3, %v515_v50  ;;  %v1160_v2 = vmul.f32 %v2140_v15, %v1051_v1 }
 0x24b   :  { %1287 = vst [vmem:[#allocation3 + $0x180] sm:$0xff] %v1223_v55  ;;  %v1224_v56 = vadd.f32 %v1160_v2, %v516_v54  ;;  %v766_v57 = vpop.f32.mrb[100].mxu1  ;;  %v524_v55 = vld [vmem:[#allocation3 + $0x1c8] sm:$0xff] }
 0x24c   :  { %v1055_v58 = vpop.f32.mrb[100].mxu0  ;;  %v768_v59 = vpop.f32.mrb[101].mxu1 }
 0x24d   :  { %1288 = vst [vmem:[#allocation3 + $0x188] sm:$0xff] %v1224_v56  ;;  %v1056_v60 = vadd.f32 %v1055_v58, %v766_v57  ;;  %v1057_v61 = vpop.f32.mrb[101].mxu0  ;;  %v769_v62 = vpop.f32.mrb[102].mxu1 }
 0x24e   :  { %v1058_v0 = vpop.f32.mrb[102].mxu0  ;;  %v771_v4 = vpop.f32.mrb[103].mxu1 }
 0x24f   :  { %v1161_v5 = vmul.f32 %v2140_v15, %v1056_v60  ;;  %v1059_v6 = vadd.f32 %v1058_v0, %v769_v62  ;;  %v1060_v7 = vpop.f32.mrb[103].mxu0  ;;  %v525_v0 = vld [vmem:[#allocation3 + $0x1d0] sm:$0xff] }
 0x251   :  { %v1225_v9 = vadd.f32 %v1161_v5, %v517_v63  ;;  %v1162_v10 = vmul.f32 %v2140_v15, %v1059_v6 }
 0x253   :  { %1289 = vst [vmem:[#allocation3 + $0x190] sm:$0xff] %v1225_v9  ;;  %v1226_v11 = vadd.f32 %v1162_v10, %v518_v8  ;;  %v774_v12 = vpop.f32.mrb[104].mxu1  ;;  %v526_v9 = vld [vmem:[#allocation3 + $0x1d8] sm:$0xff] }
 0x254   :  { %v1063_v13 = vpop.f32.mrb[104].mxu0  ;;  %v776_v14 = vpop.f32.mrb[105].mxu1 }
 0x255   :  { %1290 = vst [vmem:[#allocation3 + $0x198] sm:$0xff] %v1226_v11  ;;  %v1064_v16 = vadd.f32 %v1063_v13, %v774_v12  ;;  %v1065_v17 = vpop.f32.mrb[105].mxu0  ;;  %v777_v18 = vpop.f32.mrb[106].mxu1 }
 0x256   :  { %v1066_v20 = vpop.f32.mrb[106].mxu0  ;;  %v779_v21 = vpop.f32.mrb[107].mxu1 }
 0x257   :  { %v1163_v22 = vmul.f32 %v2140_v15, %v1064_v16  ;;  %v1067_v23 = vadd.f32 %v1066_v20, %v777_v18  ;;  %v1068_v24 = vpop.f32.mrb[107].mxu0  ;;  %v527_v20 = vld [vmem:[#allocation3 + $0x1e0] sm:$0xff] }
 0x259   :  { %v1227_v26 = vadd.f32 %v1163_v22, %v519_v19  ;;  %v1164_v27 = vmul.f32 %v2140_v15, %v1067_v23 }
 0x25b   :  { %1291 = vst [vmem:[#allocation3 + $0x1a0] sm:$0xff] %v1227_v26  ;;  %v1228_v28 = vadd.f32 %v1164_v27, %v520_v25  ;;  %v782_v29 = vpop.f32.mrb[108].mxu1  ;;  %v528_v26 = vld [vmem:[#allocation3 + $0x1e8] sm:$0xff] }
 0x25c   :  { %v1071_v30 = vpop.f32.mrb[108].mxu0  ;;  %v784_v31 = vpop.f32.mrb[109].mxu1 }
 0x25d   :  { %1292 = vst [vmem:[#allocation3 + $0x1a8] sm:$0xff] %v1228_v28  ;;  %v1072_v32 = vadd.f32 %v1071_v30, %v782_v29  ;;  %v1073_v33 = vpop.f32.mrb[109].mxu0  ;;  %v785_v34 = vpop.f32.mrb[110].mxu1 }
 0x25e   :  { %v1074_v36 = vpop.f32.mrb[110].mxu0  ;;  %v787_v37 = vpop.f32.mrb[111].mxu1 }
 0x25f   :  { %v1165_v38 = vmul.f32 %v2140_v15, %v1072_v32  ;;  %v1075_v39 = vadd.f32 %v1074_v36, %v785_v34  ;;  %v1076_v40 = vpop.f32.mrb[111].mxu0  ;;  %v529_v36 = vld [vmem:[#allocation3 + $0x1f0] sm:$0xff] }
 0x261   :  { %v1229_v42 = vadd.f32 %v1165_v38, %v521_v35  ;;  %v1166_v43 = vmul.f32 %v2140_v15, %v1075_v39 }
 0x263   :  { %1293 = vst [vmem:[#allocation3 + $0x1b0] sm:$0xff] %v1229_v42  ;;  %v1230_v44 = vadd.f32 %v1166_v43, %v522_v41  ;;  %v790_v45 = vpop.f32.mrb[112].mxu1  ;;  %v530_v42 = vld [vmem:[#allocation3 + $0x1f8] sm:$0xff] }
 0x264   :  { %v1079_v46 = vpop.f32.mrb[112].mxu0  ;;  %v792_v47 = vpop.f32.mrb[113].mxu1 }
 0x265   :  { %1294 = vst [vmem:[#allocation3 + $0x1b8] sm:$0xff] %v1230_v44  ;;  %v1080_v48 = vadd.f32 %v1079_v46, %v790_v45  ;;  %v1081_v49 = vpop.f32.mrb[113].mxu0  ;;  %v793_v50 = vpop.f32.mrb[114].mxu1 }
 0x266   :  { %v1082_v52 = vpop.f32.mrb[114].mxu0  ;;  %v795_v3 = vpop.f32.mrb[115].mxu1 }
 0x267   :  { %v1167_v1 = vmul.f32 %v2140_v15, %v1080_v48  ;;  %v1083_v53 = vadd.f32 %v1082_v52, %v793_v50  ;;  %v1084_v54 = vpop.f32.mrb[115].mxu0 }
 0x269   :  { %v1231_v2 = vadd.f32 %v1167_v1, %v523_v51  ;;  %v1168_v56 = vmul.f32 %v2140_v15, %v1083_v53 }
 0x26b   :  { %1295 = vst [vmem:[#allocation3 + $0x1c0] sm:$0xff] %v1231_v2  ;;  %v1232_v57 = vadd.f32 %v1168_v56, %v524_v55  ;;  %v798_v58 = vpop.f32.mrb[116].mxu1 }
 0x26c   :  { %v1087_v59 = vpop.f32.mrb[116].mxu0  ;;  %v800_v60 = vpop.f32.mrb[117].mxu1 }
 0x26d   :  { %1296 = vst [vmem:[#allocation3 + $0x1c8] sm:$0xff] %v1232_v57  ;;  %v1088_v61 = vadd.f32 %v1087_v59, %v798_v58  ;;  %v1089_v62 = vpop.f32.mrb[117].mxu0  ;;  %v801_v63 = vpop.f32.mrb[118].mxu1 }
 0x26e   :  { %v1090_v4 = vpop.f32.mrb[118].mxu0  ;;  %v803_v5 = vpop.f32.mrb[119].mxu1 }
 0x26f   :  { %v1169_v6 = vmul.f32 %v2140_v15, %v1088_v61  ;;  %v1091_v7 = vadd.f32 %v1090_v4, %v801_v63  ;;  %v1092_v8 = vpop.f32.mrb[119].mxu0 }
 0x271   :  { %v1233_v10 = vadd.f32 %v1169_v6, %v525_v0  ;;  %v1170_v11 = vmul.f32 %v2140_v15, %v1091_v7 }
 0x273   :  { %1297 = vst [vmem:[#allocation3 + $0x1d0] sm:$0xff] %v1233_v10  ;;  %v1234_v12 = vadd.f32 %v1170_v11, %v526_v9  ;;  %v806_v13 = vpop.f32.mrb[120].mxu1 }
 0x274   :  { %v1095_v14 = vpop.f32.mrb[120].mxu0  ;;  %v808_v16 = vpop.f32.mrb[121].mxu1 }
 0x275   :  { %1298 = vst [vmem:[#allocation3 + $0x1d8] sm:$0xff] %v1234_v12  ;;  %v1096_v17 = vadd.f32 %v1095_v14, %v806_v13  ;;  %v1097_v18 = vpop.f32.mrb[121].mxu0  ;;  %v809_v19 = vpop.f32.mrb[122].mxu1 }
 0x276   :  { %v1098_v21 = vpop.f32.mrb[122].mxu0  ;;  %v811_v22 = vpop.f32.mrb[123].mxu1 }
 0x277   :  { %v1171_v23 = vmul.f32 %v2140_v15, %v1096_v17  ;;  %v1099_v24 = vadd.f32 %v1098_v21, %v809_v19  ;;  %v1100_v25 = vpop.f32.mrb[123].mxu0 }
 0x279   :  { %v1235_v27 = vadd.f32 %v1171_v23, %v527_v20  ;;  %v1172_v28 = vmul.f32 %v2140_v15, %v1099_v24 }
 0x27b   :  { %1299 = vst [vmem:[#allocation3 + $0x1e0] sm:$0xff] %v1235_v27  ;;  %v1236_v29 = vadd.f32 %v1172_v28, %v528_v26  ;;  %v814_v30 = vpop.f32.mrb[124].mxu1 }
 0x27c   :  { %v1103_v31 = vpop.f32.mrb[124].mxu0  ;;  %v816_v32 = vpop.f32.mrb[125].mxu1 }
 0x27d   :  { %1300 = vst [vmem:[#allocation3 + $0x1e8] sm:$0xff] %v1236_v29  ;;  %v1104_v33 = vadd.f32 %v1103_v31, %v814_v30  ;;  %v1105_v34 = vpop.f32.mrb[125].mxu0  ;;  %v817_v35 = vpop.f32.mrb[126].mxu1 }
 0x27e   :  { %v1106_v37 = vpop.f32.mrb[126].mxu0  ;;  %v819_v38 = vpop.f32.mrb[127].mxu1 }
 0x27f   :  { %v1173_v39 = vmul.f32 %v2140_v15, %v1104_v33  ;;  %v1107_v40 = vadd.f32 %v1106_v37, %v817_v35  ;;  %v1108_v41 = vpop.f32.mrb[127].mxu0  ;;  %1307 = sbr.rel (%p1700_p2) target bundleno = 719 (0x2cf), region = 37 }
 0x281   :  { %v1237_v43 = vadd.f32 %v1173_v39, %v529_v36  ;;  %v1174_v44 = vmul.f32 %v2140_v15, %v1107_v40 }
 0x283   :  { %1301 = vst [vmem:[#allocation3 + $0x1f0] sm:$0xff] %v1237_v43  ;;  %v1238_v45 = vadd.f32 %v1174_v44, %v530_v42 }
 0x285   :  { %1302 = vst [vmem:[#allocation3 + $0x1f8] sm:$0xff] %v1238_v45 }
 0x286   :  { %v2209_v46 = vld [vmem:[#allocation3] sm:$0xff]  ;;  %v2211_v47 = vld [vmem:[#allocation3 + $0x8] sm:$0xff]  ;;  %v2213_v15 = vld [vmem:[#allocation3 + $0x10] sm:$0xff] }
 0x287   :  { %1372 = vst [vmem:[%s1960_s13] sm:$0xff] %v2209_v46  ;;  %1373 = vst [vmem:[%s1960_s13 + $0x8] sm:$0xff] %v2211_v47  ;;  %v2221_v48 = vld [vmem:[#allocation3 + $0x18] sm:$0xff]  ;;  %v2223_v49 = vld [vmem:[#allocation3 + $0x20] sm:$0xff] }
 0x288   :  { %1374 = vst [vmem:[%s1960_s13 + $0x10] sm:$0xff] %v2213_v15  ;;  %v2225_v50 = vld [vmem:[#allocation3 + $0x28] sm:$0xff]  ;;  %1375 = vst [vmem:[%s1960_s13 + $0x18] sm:$0xff] %v2221_v48  ;;  %v2233_v51 = vld [vmem:[#allocation3 + $0x30] sm:$0xff] }
 0x289   :  { %1376 = vst [vmem:[%s1960_s13 + $0x20] sm:$0xff] %v2223_v49  ;;  %1377 = vst [vmem:[%s1960_s13 + $0x28] sm:$0xff] %v2225_v50  ;;  %v2235_v52 = vld [vmem:[#allocation3 + $0x38] sm:$0xff]  ;;  %v2237_v3 = vld [vmem:[#allocation3 + $0x40] sm:$0xff] }
 0x28a   :  { %1378 = vst [vmem:[%s1960_s13 + $0x30] sm:$0xff] %v2233_v51  ;;  %1379 = vst [vmem:[%s1960_s13 + $0x38] sm:$0xff] %v2235_v52  ;;  %v2245_v1 = vld [vmem:[#allocation3 + $0x48] sm:$0xff]  ;;  %v2247_v53 = vld [vmem:[#allocation3 + $0x50] sm:$0xff] }
 0x28b   :  { %1380 = vst [vmem:[%s1960_s13 + $0x40] sm:$0xff] %v2237_v3  ;;  %v2249_v54 = vld [vmem:[#allocation3 + $0x58] sm:$0xff]  ;;  %1381 = vst [vmem:[%s1960_s13 + $0x48] sm:$0xff] %v2245_v1  ;;  %v2257_v55 = vld [vmem:[#allocation3 + $0x60] sm:$0xff] }
 0x28c   :  { %1382 = vst [vmem:[%s1960_s13 + $0x50] sm:$0xff] %v2247_v53  ;;  %1383 = vst [vmem:[%s1960_s13 + $0x58] sm:$0xff] %v2249_v54  ;;  %v2259_v2 = vld [vmem:[#allocation3 + $0x68] sm:$0xff]  ;;  %v2261_v56 = vld [vmem:[#allocation3 + $0x70] sm:$0xff] }
 0x28d   :  { %1384 = vst [vmem:[%s1960_s13 + $0x60] sm:$0xff] %v2257_v55  ;;  %1385 = vst [vmem:[%s1960_s13 + $0x68] sm:$0xff] %v2259_v2  ;;  %v2269_v57 = vld [vmem:[#allocation3 + $0x78] sm:$0xff]  ;;  %v2271_v58 = vld [vmem:[#allocation3 + $0x80] sm:$0xff] }
 0x28e   :  { %1386 = vst [vmem:[%s1960_s13 + $0x70] sm:$0xff] %v2261_v56  ;;  %v2273_v59 = vld [vmem:[#allocation3 + $0x88] sm:$0xff]  ;;  %1387 = vst [vmem:[%s1960_s13 + $0x78] sm:$0xff] %v2269_v57  ;;  %v2281_v60 = vld [vmem:[#allocation3 + $0x90] sm:$0xff] }
 0x28f   :  { %1388 = vst [vmem:[%s1960_s13 + $0x80] sm:$0xff] %v2271_v58  ;;  %1389 = vst [vmem:[%s1960_s13 + $0x88] sm:$0xff] %v2273_v59  ;;  %v2283_v61 = vld [vmem:[#allocation3 + $0x98] sm:$0xff]  ;;  %v2285_v62 = vld [vmem:[#allocation3 + $0xa0] sm:$0xff] }
 0x290   :  { %1390 = vst [vmem:[%s1960_s13 + $0x90] sm:$0xff] %v2281_v60  ;;  %1391 = vst [vmem:[%s1960_s13 + $0x98] sm:$0xff] %v2283_v61  ;;  %v2293_v63 = vld [vmem:[#allocation3 + $0xa8] sm:$0xff]  ;;  %v2295_v0 = vld [vmem:[#allocation3 + $0xb0] sm:$0xff] }
 0x291   :  { %1392 = vst [vmem:[%s1960_s13 + $0xa0] sm:$0xff] %v2285_v62  ;;  %v2297_v4 = vld [vmem:[#allocation3 + $0xb8] sm:$0xff]  ;;  %1393 = vst [vmem:[%s1960_s13 + $0xa8] sm:$0xff] %v2293_v63  ;;  %v2305_v5 = vld [vmem:[#allocation3 + $0xc0] sm:$0xff] }
 0x292   :  { %1394 = vst [vmem:[%s1960_s13 + $0xb0] sm:$0xff] %v2295_v0  ;;  %1395 = vst [vmem:[%s1960_s13 + $0xb8] sm:$0xff] %v2297_v4  ;;  %v2307_v6 = vld [vmem:[#allocation3 + $0xc8] sm:$0xff]  ;;  %v2309_v7 = vld [vmem:[#allocation3 + $0xd0] sm:$0xff] }
 0x293   :  { %1396 = vst [vmem:[%s1960_s13 + $0xc0] sm:$0xff] %v2305_v5  ;;  %1397 = vst [vmem:[%s1960_s13 + $0xc8] sm:$0xff] %v2307_v6  ;;  %v2317_v8 = vld [vmem:[#allocation3 + $0xd8] sm:$0xff]  ;;  %v2319_v9 = vld [vmem:[#allocation3 + $0xe0] sm:$0xff] }
 0x294   :  { %1398 = vst [vmem:[%s1960_s13 + $0xd0] sm:$0xff] %v2309_v7  ;;  %v2321_v10 = vld [vmem:[#allocation3 + $0xe8] sm:$0xff]  ;;  %1399 = vst [vmem:[%s1960_s13 + $0xd8] sm:$0xff] %v2317_v8  ;;  %v2329_v11 = vld [vmem:[#allocation3 + $0xf0] sm:$0xff] }
 0x295   :  { %1400 = vst [vmem:[%s1960_s13 + $0xe0] sm:$0xff] %v2319_v9  ;;  %1401 = vst [vmem:[%s1960_s13 + $0xe8] sm:$0xff] %v2321_v10  ;;  %v2331_v12 = vld [vmem:[#allocation3 + $0xf8] sm:$0xff]  ;;  %v2333_v13 = vld [vmem:[#allocation3 + $0x100] sm:$0xff] }
 0x296   :  { %1402 = vst [vmem:[%s1960_s13 + $0xf0] sm:$0xff] %v2329_v11  ;;  %1403 = vst [vmem:[%s1960_s13 + $0xf8] sm:$0xff] %v2331_v12  ;;  %v2341_v14 = vld [vmem:[#allocation3 + $0x108] sm:$0xff]  ;;  %v2343_v16 = vld [vmem:[#allocation3 + $0x110] sm:$0xff] }
 0x297   :  { %1404 = vst [vmem:[%s1960_s13 + $0x100] sm:$0xff] %v2333_v13  ;;  %v2345_v17 = vld [vmem:[#allocation3 + $0x118] sm:$0xff]  ;;  %1405 = vst [vmem:[%s1960_s13 + $0x108] sm:$0xff] %v2341_v14  ;;  %v2353_v18 = vld [vmem:[#allocation3 + $0x120] sm:$0xff] }
 0x298   :  { %1406 = vst [vmem:[%s1960_s13 + $0x110] sm:$0xff] %v2343_v16  ;;  %1407 = vst [vmem:[%s1960_s13 + $0x118] sm:$0xff] %v2345_v17  ;;  %v2355_v19 = vld [vmem:[#allocation3 + $0x128] sm:$0xff]  ;;  %v2357_v20 = vld [vmem:[#allocation3 + $0x130] sm:$0xff] }
 0x299   :  { %1408 = vst [vmem:[%s1960_s13 + $0x120] sm:$0xff] %v2353_v18  ;;  %1409 = vst [vmem:[%s1960_s13 + $0x128] sm:$0xff] %v2355_v19  ;;  %v2365_v21 = vld [vmem:[#allocation3 + $0x138] sm:$0xff]  ;;  %v2367_v22 = vld [vmem:[#allocation3 + $0x140] sm:$0xff] }
 0x29a   :  { %1410 = vst [vmem:[%s1960_s13 + $0x130] sm:$0xff] %v2357_v20  ;;  %v2369_v23 = vld [vmem:[#allocation3 + $0x148] sm:$0xff]  ;;  %1411 = vst [vmem:[%s1960_s13 + $0x138] sm:$0xff] %v2365_v21  ;;  %v2377_v24 = vld [vmem:[#allocation3 + $0x150] sm:$0xff] }
 0x29b   :  { %1412 = vst [vmem:[%s1960_s13 + $0x140] sm:$0xff] %v2367_v22  ;;  %1413 = vst [vmem:[%s1960_s13 + $0x148] sm:$0xff] %v2369_v23  ;;  %v2379_v25 = vld [vmem:[#allocation3 + $0x158] sm:$0xff]  ;;  %v2381_v26 = vld [vmem:[#allocation3 + $0x160] sm:$0xff] }
 0x29c   :  { %1414 = vst [vmem:[%s1960_s13 + $0x150] sm:$0xff] %v2377_v24  ;;  %1415 = vst [vmem:[%s1960_s13 + $0x158] sm:$0xff] %v2379_v25  ;;  %v2389_v27 = vld [vmem:[#allocation3 + $0x168] sm:$0xff]  ;;  %v2391_v28 = vld [vmem:[#allocation3 + $0x170] sm:$0xff] }
 0x29d   :  { %1416 = vst [vmem:[%s1960_s13 + $0x160] sm:$0xff] %v2381_v26  ;;  %v2393_v29 = vld [vmem:[#allocation3 + $0x178] sm:$0xff]  ;;  %1417 = vst [vmem:[%s1960_s13 + $0x168] sm:$0xff] %v2389_v27  ;;  %v2401_v30 = vld [vmem:[#allocation3 + $0x180] sm:$0xff] }
 0x29e   :  { %1418 = vst [vmem:[%s1960_s13 + $0x170] sm:$0xff] %v2391_v28  ;;  %1419 = vst [vmem:[%s1960_s13 + $0x178] sm:$0xff] %v2393_v29  ;;  %v2403_v31 = vld [vmem:[#allocation3 + $0x188] sm:$0xff]  ;;  %v2405_v32 = vld [vmem:[#allocation3 + $0x190] sm:$0xff] }
 0x29f   :  { %2616 = vst [vmem:[#allocation22_spill] sm:$0xff] %v2405_v32  ;;  %1420 = vst [vmem:[%s1960_s13 + $0x180] sm:$0xff] %v2401_v30  ;;  %v2413_v33 = vld [vmem:[#allocation3 + $0x198] sm:$0xff]  ;;  %v2415_v34 = vld [vmem:[#allocation3 + $0x1a0] sm:$0xff] }
 0x2a0   :  { %1421 = vst [vmem:[%s1960_s13 + $0x188] sm:$0xff] %v2403_v31  ;;  %1422 = vst [vmem:[%s1960_s13 + $0x190] sm:$0xff] %v2405_v32  ;;  %v2417_v35 = vld [vmem:[#allocation3 + $0x1a8] sm:$0xff]  ;;  %v2425_v36 = vld [vmem:[#allocation3 + $0x1b0] sm:$0xff] }
 0x2a1   :  { %2617 = vst [vmem:[#allocation23_spill] sm:$0xff] %v2413_v33  ;;  %2618 = vst [vmem:[#allocation24_spill] sm:$0xff] %v2415_v34  ;;  %v2427_v37 = vld [vmem:[#allocation3 + $0x1b8] sm:$0xff]  ;;  %v2429_v38 = vld [vmem:[#allocation3 + $0x1c0] sm:$0xff] }
 0x2a2   :  { %2619 = vst [vmem:[#allocation25_spill] sm:$0xff] %v2417_v35  ;;  %1423 = vst [vmem:[%s1960_s13 + $0x198] sm:$0xff] %v2413_v33  ;;  %v2437_v39 = vld [vmem:[#allocation3 + $0x1c8] sm:$0xff]  ;;  %v2439_v40 = vld [vmem:[#allocation3 + $0x1d0] sm:$0xff] }
 0x2a3   :  { %1424 = vst [vmem:[%s1960_s13 + $0x1a0] sm:$0xff] %v2415_v34  ;;  %1425 = vst [vmem:[%s1960_s13 + $0x1a8] sm:$0xff] %v2417_v35  ;;  %v2441_v41 = vld [vmem:[#allocation3 + $0x1d8] sm:$0xff]  ;;  %v2449_v42 = vld [vmem:[#allocation3 + $0x1e0] sm:$0xff] }
 0x2a4   :  { %2620 = vst [vmem:[#allocation26_spill] sm:$0xff] %v2425_v36  ;;  %2621 = vst [vmem:[#allocation27_spill] sm:$0xff] %v2427_v37  ;;  %v2451_v43 = vld [vmem:[#allocation3 + $0x1e8] sm:$0xff]  ;;  %v2453_v44 = vld [vmem:[#allocation3 + $0x1f0] sm:$0xff] }
 0x2a5   :  { %2622 = vst [vmem:[#allocation28_spill] sm:$0xff] %v2429_v38  ;;  %1426 = vst [vmem:[%s1960_s13 + $0x1b0] sm:$0xff] %v2425_v36  ;;  %v2461_v45 = vld [vmem:[#allocation3 + $0x1f8] sm:$0xff]  ;;  %v1441_v34 = vld [vmem:[#allocation13 + $0x28] sm:$0xff] }
 0x2a6   :  { %1427 = vst [vmem:[%s1960_s13 + $0x1b8] sm:$0xff] %v2427_v37  ;;  %1428 = vst [vmem:[%s1960_s13 + $0x1c0] sm:$0xff] %v2429_v38  ;;  %v1438_v37 = vld [vmem:[#allocation13 + $0x10] sm:$0xff]  ;;  %v1439_v36 = vld [vmem:[#allocation13 + $0x18] sm:$0xff] }
 0x2a7   :  { %2623 = vst [vmem:[#allocation29_spill] sm:$0xff] %v2437_v39  ;;  %2624 = vst [vmem:[#allocation30_spill] sm:$0xff] %v2439_v40  ;;  %v1442_v33 = vld [vmem:[#allocation13 + $0x30] sm:$0xff]  ;;  %v1443_v32 = vld [vmem:[#allocation13 + $0x38] sm:$0xff] }
 0x2a8   :  { %2625 = vst [vmem:[#allocation31_spill] sm:$0xff] %v2441_v41  ;;  %1429 = vst [vmem:[%s1960_s13 + $0x1c8] sm:$0xff] %v2437_v39  ;;  %v1436_v39 = vld [vmem:[#allocation13] sm:$0xff] }
 0x2a9   :  { %1430 = vst [vmem:[%s1960_s13 + $0x1d0] sm:$0xff] %v2439_v40  ;;  %1431 = vst [vmem:[%s1960_s13 + $0x1d8] sm:$0xff] %v2441_v41  ;;  %v1437_v40 = vld [vmem:[#allocation13 + $0x8] sm:$0xff]  ;;  %v1500_v41 = vadd.f32 %v1436_v39, %v2209_v46  ;;  %v1505_v46 = vadd.f32 %v1441_v34, %v2225_v50  ;;  %v1507_v39 = vadd.f32 %v1443_v32, %v2235_v52  ;;  %v1447_v34 = vld [vmem:[#allocation13 + $0x58] sm:$0xff] }
 0x2aa   :  { %2626 = vst [vmem:[#allocation32_spill] sm:$0xff] %v2449_v42  ;;  %2627 = vst [vmem:[#allocation33_spill] sm:$0xff] %v2451_v43  ;;  %v1501_v38 = vadd.f32 %v1437_v40, %v2211_v47  ;;  %v1506_v47 = vadd.f32 %v1442_v33, %v2233_v51  ;;  %v1446_v40 = vld [vmem:[#allocation13 + $0x50] sm:$0xff]  ;;  %v1448_v51 = vld [vmem:[#allocation13 + $0x60] sm:$0xff]  ;;  %v1511_v52 = vadd.f32 %v1447_v34, %v2249_v54 }
 0x2ab   :  { %2628 = vst [vmem:[#allocation34_spill] sm:$0xff] %v2453_v44  ;;  %1432 = vst [vmem:[%s1960_s13 + $0x1e0] sm:$0xff] %v2449_v42  ;;  %v1440_v42 = vld [vmem:[#allocation13 + $0x20] sm:$0xff]  ;;  %v1510_v50 = vadd.f32 %v1446_v40, %v2247_v53  ;;  %v1449_v33 = vld [vmem:[#allocation13 + $0x68] sm:$0xff]  ;;  %v1512_v32 = vadd.f32 %v1448_v51, %v2257_v55 }
 0x2ac   :  { %1433 = vst [vmem:[%s1960_s13 + $0x1e8] sm:$0xff] %v2451_v43  ;;  %1434 = vst [vmem:[%s1960_s13 + $0x1f0] sm:$0xff] %v2453_v44  ;;  %v1502_v43 = vadd.f32 %v1438_v37, %v2213_v15  ;;  %v1503_v44 = vadd.f32 %v1439_v36, %v2221_v48  ;;  %v1504_v35 = vadd.f32 %v1440_v42, %v2223_v49  ;;  %v1444_v15 = vld [vmem:[#allocation13 + $0x40] sm:$0xff]  ;;  %v1445_v37 = vld [vmem:[#allocation13 + $0x48] sm:$0xff] }
 0x2ad   :  { %1435 = vst [vmem:[%s1960_s13 + $0x1f8] sm:$0xff] %v2461_v45  ;;  %1564 = vst [vmem:[%s1965_s17] sm:$0xff] %v1500_v41  ;;  %v1508_v48 = vadd.f32 %v1444_v15, %v2237_v3  ;;  %v1509_v49 = vadd.f32 %v1445_v37, %v2245_v1  ;;  %v1513_v3 = vadd.f32 %v1449_v33, %v2259_v2  ;;  %v1451_v1 = vld [vmem:[#allocation13 + $0x78] sm:$0xff]  ;;  %v1452_v36 = vld [vmem:[#allocation13 + $0x80] sm:$0xff] }
 0x2ae   :  { %1565 = vst [vmem:[%s1965_s17 + $0x8] sm:$0xff] %v1501_v38  ;;  %1566 = vst [vmem:[%s1965_s17 + $0x10] sm:$0xff] %v1502_v43  ;;  %v1515_v38 = vadd.f32 %v1451_v1, %v2269_v57  ;;  %v1516_v54 = vadd.f32 %v1452_v36, %v2271_v58  ;;  %v1453_v41 = vld [vmem:[#allocation13 + $0x88] sm:$0xff]  ;;  %v1454_v55 = vld [vmem:[#allocation13 + $0x90] sm:$0xff] }
 0x2af   :  { %1567 = vst [vmem:[%s1965_s17 + $0x18] sm:$0xff] %v1503_v44  ;;  %1568 = vst [vmem:[%s1965_s17 + $0x20] sm:$0xff] %v1504_v35  ;;  %v1450_v35 = vld [vmem:[#allocation13 + $0x70] sm:$0xff]  ;;  %v1455_v42 = vld [vmem:[#allocation13 + $0x98] sm:$0xff]  ;;  %v1517_v2 = vadd.f32 %v1453_v41, %v2273_v59  ;;  %v1518_v43 = vadd.f32 %v1454_v55, %v2281_v60 }
 0x2b0   :  { %1569 = vst [vmem:[%s1965_s17 + $0x28] sm:$0xff] %v1505_v46  ;;  %1570 = vst [vmem:[%s1965_s17 + $0x30] sm:$0xff] %v1506_v47  ;;  %v1514_v53 = vadd.f32 %v1450_v35, %v2261_v56  ;;  %v1519_v56 = vadd.f32 %v1455_v42, %v2283_v61  ;;  %v1456_v44 = vld [vmem:[#allocation13 + $0xa0] sm:$0xff]  ;;  %v1457_v57 = vld [vmem:[#allocation13 + $0xa8] sm:$0xff] }
 0x2b1   :  { %1571 = vst [vmem:[%s1965_s17 + $0x38] sm:$0xff] %v1507_v39  ;;  %1572 = vst [vmem:[%s1965_s17 + $0x40] sm:$0xff] %v1508_v48  ;;  %v1458_v46 = vld [vmem:[#allocation13 + $0xb0] sm:$0xff]  ;;  %v1520_v58 = vadd.f32 %v1456_v44, %v2285_v62  ;;  %v1521_v47 = vadd.f32 %v1457_v57, %v2293_v63  ;;  %v1459_v39 = vld [vmem:[#allocation13 + $0xb8] sm:$0xff] }
 0x2b2   :  { %1573 = vst [vmem:[%s1965_s17 + $0x48] sm:$0xff] %v1509_v49  ;;  %1574 = vst [vmem:[%s1965_s17 + $0x50] sm:$0xff] %v1510_v50  ;;  %v1522_v59 = vadd.f32 %v1458_v46, %v2295_v0  ;;  %v1460_v60 = vld [vmem:[#allocation13 + $0xc0] sm:$0xff]  ;;  %v1461_v15 = vld [vmem:[#allocation13 + $0xc8] sm:$0xff]  ;;  %v1523_v61 = vadd.f32 %v1459_v39, %v2297_v4 }
 0x2b3   :  { %1575 = vst [vmem:[%s1965_s17 + $0x58] sm:$0xff] %v1511_v52  ;;  %1576 = vst [vmem:[%s1965_s17 + $0x60] sm:$0xff] %v1512_v32  ;;  %v1524_v37 = vadd.f32 %v1460_v60, %v2305_v5  ;;  %v1525_v62 = vadd.f32 %v1461_v15, %v2307_v6  ;;  %v1462_v40 = vld [vmem:[#allocation13 + $0xd0] sm:$0xff]  ;;  %v1463_v63 = vld [vmem:[#allocation13 + $0xd8] sm:$0xff] }
 0x2b4   :  { %1577 = vst [vmem:[%s1965_s17 + $0x68] sm:$0xff] %v1513_v3  ;;  %1578 = vst [vmem:[%s1965_s17 + $0x70] sm:$0xff] %v1514_v53  ;;  %v1464_v48 = vld [vmem:[#allocation13 + $0xe0] sm:$0xff]  ;;  %v1526_v0 = vadd.f32 %v1462_v40, %v2309_v7  ;;  %v1527_v49 = vadd.f32 %v1463_v63, %v2317_v8  ;;  %v1465_v50 = vld [vmem:[#allocation13 + $0xe8] sm:$0xff] }
 0x2b5   :  { %1579 = vst [vmem:[%s1965_s17 + $0x78] sm:$0xff] %v1515_v38  ;;  %1580 = vst [vmem:[%s1965_s17 + $0x80] sm:$0xff] %v1516_v54  ;;  %v1528_v4 = vadd.f32 %v1464_v48, %v2319_v9  ;;  %v1466_v5 = vld [vmem:[#allocation13 + $0xf0] sm:$0xff]  ;;  %v1467_v34 = vld [vmem:[#allocation13 + $0xf8] sm:$0xff]  ;;  %v1529_v6 = vadd.f32 %v1465_v50, %v2321_v10 }
 0x2b6   :  { %1581 = vst [vmem:[%s1965_s17 + $0x88] sm:$0xff] %v1517_v2  ;;  %1582 = vst [vmem:[%s1965_s17 + $0x90] sm:$0xff] %v1518_v43  ;;  %v1530_v51 = vadd.f32 %v1466_v5, %v2329_v11  ;;  %v1531_v7 = vadd.f32 %v1467_v34, %v2331_v12  ;;  %v1468_v33 = vld [vmem:[#allocation13 + $0x100] sm:$0xff]  ;;  %v1469_v8 = vld [vmem:[#allocation13 + $0x108] sm:$0xff] }
 0x2b7   :  { %1583 = vst [vmem:[%s1965_s17 + $0x98] sm:$0xff] %v1519_v56  ;;  %1584 = vst [vmem:[%s1965_s17 + $0xa0] sm:$0xff] %v1520_v58  ;;  %v1470_v52 = vld [vmem:[#allocation13 + $0x110] sm:$0xff]  ;;  %v1532_v9 = vadd.f32 %v1468_v33, %v2333_v13  ;;  %v1533_v32 = vadd.f32 %v1469_v8, %v2341_v14  ;;  %v1471_v3 = vld [vmem:[#allocation13 + $0x118] sm:$0xff] }
 0x2b8   :  { %1585 = vst [vmem:[%s1965_s17 + $0xa8] sm:$0xff] %v1521_v47  ;;  %1586 = vst [vmem:[%s1965_s17 + $0xb0] sm:$0xff] %v1522_v59  ;;  %v1534_v10 = vadd.f32 %v1470_v52, %v2343_v16  ;;  %v1472_v11 = vld [vmem:[#allocation13 + $0x120] sm:$0xff]  ;;  %v1473_v35 = vld [vmem:[#allocation13 + $0x128] sm:$0xff]  ;;  %v1535_v12 = vadd.f32 %v1471_v3, %v2345_v17 }
 0x2b9   :  { %1587 = vst [vmem:[%s1965_s17 + $0xb8] sm:$0xff] %v1523_v61  ;;  %1588 = vst [vmem:[%s1965_s17 + $0xc0] sm:$0xff] %v1524_v37  ;;  %v1536_v1 = vadd.f32 %v1472_v11, %v2353_v18  ;;  %v1537_v13 = vadd.f32 %v1473_v35, %v2355_v19  ;;  %v1474_v36 = vld [vmem:[#allocation13 + $0x130] sm:$0xff]  ;;  %v1475_v14 = vld [vmem:[#allocation13 + $0x138] sm:$0xff] }
 0x2ba   :  { %1589 = vst [vmem:[%s1965_s17 + $0xc8] sm:$0xff] %v1525_v62  ;;  %1590 = vst [vmem:[%s1965_s17 + $0xd0] sm:$0xff] %v1526_v0  ;;  %v1476_v53 = vld [vmem:[#allocation13 + $0x140] sm:$0xff]  ;;  %v1538_v16 = vadd.f32 %v1474_v36, %v2357_v20  ;;  %v1539_v38 = vadd.f32 %v1475_v14, %v2365_v21  ;;  %v1477_v54 = vld [vmem:[#allocation13 + $0x148] sm:$0xff] }
 0x2bb   :  { %1591 = vst [vmem:[%s1965_s17 + $0xd8] sm:$0xff] %v1527_v49  ;;  %1592 = vst [vmem:[%s1965_s17 + $0xe0] sm:$0xff] %v1528_v4  ;;  %v1540_v17 = vadd.f32 %v1476_v53, %v2367_v22  ;;  %v1478_v18 = vld [vmem:[#allocation13 + $0x150] sm:$0xff]  ;;  %v1479_v41 = vld [vmem:[#allocation13 + $0x158] sm:$0xff]  ;;  %v1541_v19 = vadd.f32 %v1477_v54, %v2369_v23 }
 0x2bc   :  { %1593 = vst [vmem:[%s1965_s17 + $0xe8] sm:$0xff] %v1529_v6  ;;  %1594 = vst [vmem:[%s1965_s17 + $0xf0] sm:$0xff] %v1530_v51  ;;  %v1542_v55 = vadd.f32 %v1478_v18, %v2377_v24  ;;  %v1543_v20 = vadd.f32 %v1479_v41, %v2379_v25  ;;  %v1480_v42 = vld [vmem:[#allocation13 + $0x160] sm:$0xff]  ;;  %v1481_v21 = vld [vmem:[#allocation13 + $0x168] sm:$0xff] }
 0x2bd   :  { %1595 = vst [vmem:[%s1965_s17 + $0xf8] sm:$0xff] %v1531_v7  ;;  %1596 = vst [vmem:[%s1965_s17 + $0x100] sm:$0xff] %v1532_v9  ;;  %v1482_v2 = vld [vmem:[#allocation13 + $0x170] sm:$0xff]  ;;  %v1544_v22 = vadd.f32 %v1480_v42, %v2381_v26  ;;  %v1545_v43 = vadd.f32 %v1481_v21, %v2389_v27  ;;  %v1483_v56 = vld [vmem:[#allocation13 + $0x178] sm:$0xff] }
 0x2be   :  { %1597 = vst [vmem:[%s1965_s17 + $0x108] sm:$0xff] %v1533_v32  ;;  %1598 = vst [vmem:[%s1965_s17 + $0x110] sm:$0xff] %v1534_v10  ;;  %v1546_v23 = vadd.f32 %v1482_v2, %v2391_v28  ;;  %v1484_v24 = vld [vmem:[#allocation13 + $0x180] sm:$0xff]  ;;  %v1485_v44 = vld [vmem:[#allocation13 + $0x188] sm:$0xff]  ;;  %v1547_v25 = vadd.f32 %v1483_v56, %v2393_v29 }
 0x2bf   :  { %1599 = vst [vmem:[%s1965_s17 + $0x118] sm:$0xff] %v1535_v12  ;;  %1600 = vst [vmem:[%s1965_s17 + $0x120] sm:$0xff] %v1536_v1  ;;  %v1548_v57 = vadd.f32 %v1484_v24, %v2401_v30  ;;  %v1549_v26 = vadd.f32 %v1485_v44, %v2403_v31  ;;  %v1486_v46 = vld [vmem:[#allocation13 + $0x190] sm:$0xff]  ;;  %v1487_v27 = vld [vmem:[#allocation13 + $0x198] sm:$0xff] }
 0x2c0   :  { %1601 = vst [vmem:[%s1965_s17 + $0x128] sm:$0xff] %v1537_v13  ;;  %1602 = vst [vmem:[%s1965_s17 + $0x130] sm:$0xff] %v1538_v16  ;;  %v1488_v58 = vld [vmem:[#allocation13 + $0x1a0] sm:$0xff]  ;;  %v2630_v59 = vld [vmem:[#allocation23_spill] sm:$0xff] }
 0x2c1   :  { %1603 = vst [vmem:[%s1965_s17 + $0x138] sm:$0xff] %v1539_v38  ;;  %1604 = vst [vmem:[%s1965_s17 + $0x140] sm:$0xff] %v1540_v17  ;;  %v2629_v28 = vld [vmem:[#allocation22_spill] sm:$0xff]  ;;  %v1551_v39 = vadd.f32 %v1487_v27, %v2630_v59  ;;  %v2631_v60 = vld [vmem:[#allocation24_spill] sm:$0xff] }
 0x2c2   :  { %1605 = vst [vmem:[%s1965_s17 + $0x148] sm:$0xff] %v1541_v19  ;;  %1606 = vst [vmem:[%s1965_s17 + $0x150] sm:$0xff] %v1542_v55  ;;  %v1550_v47 = vadd.f32 %v1486_v46, %v2629_v28  ;;  %v1552_v29 = vadd.f32 %v1488_v58, %v2631_v60  ;;  %v1489_v15 = vld [vmem:[#allocation13 + $0x1a8] sm:$0xff]  ;;  %v1490_v30 = vld [vmem:[#allocation13 + $0x1b0] sm:$0xff] }
 0x2c3   :  { %1607 = vst [vmem:[%s1965_s17 + $0x158] sm:$0xff] %v1543_v20  ;;  %1608 = vst [vmem:[%s1965_s17 + $0x160] sm:$0xff] %v1544_v22  ;;  %v1491_v61 = vld [vmem:[#allocation13 + $0x1b8] sm:$0xff]  ;;  %v2633_v62 = vld [vmem:[#allocation26_spill] sm:$0xff] }
 0x2c4   :  { %1609 = vst [vmem:[%s1965_s17 + $0x168] sm:$0xff] %v1545_v43  ;;  %1610 = vst [vmem:[%s1965_s17 + $0x170] sm:$0xff] %v1546_v23  ;;  %v2632_v31 = vld [vmem:[#allocation25_spill] sm:$0xff]  ;;  %v1554_v40 = vadd.f32 %v1490_v30, %v2633_v62  ;;  %v2634_v63 = vld [vmem:[#allocation27_spill] sm:$0xff] }
 0x2c5   :  { %1611 = vst [vmem:[%s1965_s17 + $0x178] sm:$0xff] %v1547_v25  ;;  %1612 = vst [vmem:[%s1965_s17 + $0x180] sm:$0xff] %v1548_v57  ;;  %v1553_v37 = vadd.f32 %v1489_v15, %v2632_v31  ;;  %v1555_v48 = vadd.f32 %v1491_v61, %v2634_v63  ;;  %v1492_v0 = vld [vmem:[#allocation13 + $0x1c0] sm:$0xff]  ;;  %v1493_v49 = vld [vmem:[#allocation13 + $0x1c8] sm:$0xff] }
 0x2c6   :  { %1613 = vst [vmem:[%s1965_s17 + $0x188] sm:$0xff] %v1549_v26  ;;  %v1494_v4 = vld [vmem:[#allocation13 + $0x1d0] sm:$0xff]  ;;  %1614 = vst [vmem:[%s1965_s17 + $0x190] sm:$0xff] %v1550_v47  ;;  %v2636_v34 = vld [vmem:[#allocation29_spill] sm:$0xff] }
 0x2c7   :  { %1615 = vst [vmem:[%s1965_s17 + $0x198] sm:$0xff] %v1551_v39  ;;  %1616 = vst [vmem:[%s1965_s17 + $0x1a0] sm:$0xff] %v1552_v29  ;;  %v2635_v50 = vld [vmem:[#allocation28_spill] sm:$0xff]  ;;  %v1557_v6 = vadd.f32 %v1493_v49, %v2636_v34  ;;  %v2637_v51 = vld [vmem:[#allocation30_spill] sm:$0xff] }
 0x2c8   :  { %v1556_v5 = vadd.f32 %v1492_v0, %v2635_v50  ;;  %v1558_v7 = vadd.f32 %v1494_v4, %v2637_v51  ;;  %v1495_v33 = vld [vmem:[#allocation13 + $0x1d8] sm:$0xff]  ;;  %v1496_v8 = vld [vmem:[#allocation13 + $0x1e0] sm:$0xff]  ;;  %v1497_v52 = vld [vmem:[#allocation13 + $0x1e8] sm:$0xff]  ;;  %1617 = vst [vmem:[%s1965_s17 + $0x1a8] sm:$0xff] %v1553_v37 }
 0x2c9   :  { %1618 = vst [vmem:[%s1965_s17 + $0x1b0] sm:$0xff] %v1554_v40  ;;  %1619 = vst [vmem:[%s1965_s17 + $0x1b8] sm:$0xff] %v1555_v48  ;;  %v2638_v9 = vld [vmem:[#allocation31_spill] sm:$0xff]  ;;  %v2639_v10 = vld [vmem:[#allocation32_spill] sm:$0xff] }
 0x2ca   :  { %v1559_v32 = vadd.f32 %v1495_v33, %v2638_v9  ;;  %v1560_v3 = vadd.f32 %v1496_v8, %v2639_v10  ;;  %v2640_v11 = vld [vmem:[#allocation33_spill] sm:$0xff]  ;;  %v1498_v12 = vld [vmem:[#allocation13 + $0x1f0] sm:$0xff]  ;;  %1620 = vst [vmem:[%s1965_s17 + $0x1c0] sm:$0xff] %v1556_v5  ;;  %1621 = vst [vmem:[%s1965_s17 + $0x1c8] sm:$0xff] %v1557_v6 }
 0x2cb   :  { %v1561_v35 = vadd.f32 %v1497_v52, %v2640_v11  ;;  %v1499_v1 = vld [vmem:[#allocation13 + $0x1f8] sm:$0xff]  ;;  %1622 = vst [vmem:[%s1965_s17 + $0x1d0] sm:$0xff] %v1558_v7  ;;  %v2641_v13 = vld [vmem:[#allocation34_spill] sm:$0xff] }
 0x2cc   :  { %v1562_v36 = vadd.f32 %v1498_v12, %v2641_v13  ;;  %v1563_v14 = vadd.f32 %v1499_v1, %v2461_v45  ;;  %1623 = vst [vmem:[%s1965_s17 + $0x1d8] sm:$0xff] %v1559_v32  ;;  %1624 = vst [vmem:[%s1965_s17 + $0x1e0] sm:$0xff] %v1560_v3 }
 0x2cd   :  { %1625 = vst [vmem:[%s1965_s17 + $0x1e8] sm:$0xff] %v1561_v35 }
 0x2ce   :  { %1626 = vst [vmem:[%s1965_s17 + $0x1f0] sm:$0xff] %v1562_v36  ;;  %1627 = vst [vmem:[%s1965_s17 + $0x1f8] sm:$0xff] %v1563_v14 }
 0x2cf PF:  { %1664 = vsyncpa [#allocation12], 1 }
 0x2d0   :  { %1665 = vsyncpa [#allocation14], 1 }
 0x2d1   :  { %1666 = vsyncmov [#allocation4] }
 0x2d4   :  { %s1667_s16 = vpop.sfrf %1666 }
 0x2d5   :  { %p1701_p3 = scmp.ne.s32.totalorder %s1667_s16, 0 }
 0x2d7   :  { %1671 = shalt.err (%p1701_p3)  }

// kernel: lightgcn_forward_device.4
= control target key start
LH: loop header
LB: loop body
LE: loop exit
PB: predicated region body
PF: predicated region fallthrough
CT: control target
= control target key end

     0   :  { %s2710_s0 = inlined_call_operand.<no memory space> [shape: s32[1], index: 0, kind: input, shape index: {}]   ;;  %s2711_s1 = inlined_call_operand.<no memory space> [shape: s32[1], index: 1, kind: input, shape index: {}]   ;;  %s2712_s2 = inlined_call_operand.<no memory space> [shape: s32[1], index: 2, kind: input, shape index: {}]   ;;  %s2713_s3 = inlined_call_operand.<no memory space> [shape: s32[1], index: 3, kind: input, shape index: {}]   ;;  %s2714_s4 = inlined_call_operand.vmem [shape: s8[1,512,512], index: 4, kind: input, shape index: {}]   ;;  %s2715_s5 = inlined_call_operand.vmem [shape: f32[512,128], index: 5, kind: input, shape index: {}]   ;;  %s2716_s7 = inlined_call_operand.<no memory space> [shape: f32[1], index: 7, kind: input, shape index: {}]   ;;  %s2717_s6 = inlined_call_operand.vmem [shape: f32[512,128], index: 6, kind: input, shape index: {}]   ;;  %s2718_s8 = inlined_call_operand.vmem [shape: f32[512,128], index: 8, kind: output, shape index: {}]  }
   0x1   :  { %14 = sst [smem:[#allocation7]] %s2711_s1  ;;  %s1805_s9 = sshll.u32 %s2710_s0, 6  ;;  %v97_v0 = vld [vmem:[%s2715_s5] sm:$0xff]  ;;  %v99_v1 = vld [vmem:[%s2715_s5 + $0x8] sm:$0xff]  ;;  %v101_v2 = vld [vmem:[%s2715_s5 + $0x10] sm:$0xff] }
   0x2   :  { %16 = sst [smem:[#allocation9]] %s2713_s3  ;;  %p1946_p0 = scmp.lt.s32.totalorder %s1805_s9, 63  ;;  %98 = vst [vmem:[#allocation2] sm:$0xff] %v97_v0  ;;  %100 = vst [vmem:[#allocation2 + $0x8] sm:$0xff] %v99_v1  ;;  %v103_v3 = vld [vmem:[%s2715_s5 + $0x18] sm:$0xff]  ;;  %v105_v4 = vld [vmem:[%s2715_s5 + $0x20] sm:$0xff] }
   0x3   :  { %102 = vst [vmem:[#allocation2 + $0x10] sm:$0xff] %v101_v2  ;;  %v107_v5 = vld [vmem:[%s2715_s5 + $0x28] sm:$0xff]  ;;  %17 = sst [smem:[#allocation10]] %s2716_s7  ;;  %104 = vst [vmem:[#allocation2 + $0x18] sm:$0xff] %v103_v3  ;;  %v109_v6 = vld [vmem:[%s2715_s5 + $0x30] sm:$0xff] }
   0x4   :  { %106 = vst [vmem:[#allocation2 + $0x20] sm:$0xff] %v105_v4  ;;  %108 = vst [vmem:[#allocation2 + $0x28] sm:$0xff] %v107_v5  ;;  %v111_v7 = vld [vmem:[%s2715_s5 + $0x38] sm:$0xff]  ;;  %v113_v8 = vld [vmem:[%s2715_s5 + $0x40] sm:$0xff]  ;;  %s2721_s9 = smov (!%p1946_p0, %s1805_s9), 63 }
   0x5   :  { %110 = vst [vmem:[#allocation2 + $0x30] sm:$0xff] %v109_v6  ;;  %112 = vst [vmem:[#allocation2 + $0x38] sm:$0xff] %v111_v7  ;;  %v115_v9 = vld [vmem:[%s2715_s5 + $0x48] sm:$0xff]  ;;  %v117_v10 = vld [vmem:[%s2715_s5 + $0x50] sm:$0xff]  ;;  %s1806_s18 = sshll.u32 %s2721_s9, 3 }
   0x6   :  { %114 = vst [vmem:[#allocation2 + $0x40] sm:$0xff] %v113_v8  ;;  %v119_v11 = vld [vmem:[%s2715_s5 + $0x58] sm:$0xff]  ;;  %116 = vst [vmem:[#allocation2 + $0x48] sm:$0xff] %v115_v9  ;;  %v121_v12 = vld [vmem:[%s2715_s5 + $0x60] sm:$0xff]  ;;  %s2003_s26 = scalar_lea.vmem %s2717_s6, %s1806_s18  ;;  %s2008_s28 = scalar_lea.vmem %s2718_s8, %s1806_s18 }
   0x7   :  { %118 = vst [vmem:[#allocation2 + $0x50] sm:$0xff] %v117_v10  ;;  %120 = vst [vmem:[#allocation2 + $0x58] sm:$0xff] %v119_v11  ;;  %v123_v13 = vld [vmem:[%s2715_s5 + $0x68] sm:$0xff]  ;;  %v125_v14 = vld [vmem:[%s2715_s5 + $0x70] sm:$0xff] }
   0x8   :  { %122 = vst [vmem:[#allocation2 + $0x60] sm:$0xff] %v121_v12  ;;  %124 = vst [vmem:[#allocation2 + $0x68] sm:$0xff] %v123_v13  ;;  %v127_v15 = vld [vmem:[%s2715_s5 + $0x78] sm:$0xff]  ;;  %v129_v16 = vld [vmem:[%s2715_s5 + $0x80] sm:$0xff] }
   0x9   :  { %126 = vst [vmem:[#allocation2 + $0x70] sm:$0xff] %v125_v14  ;;  %v131_v17 = vld [vmem:[%s2715_s5 + $0x88] sm:$0xff]  ;;  %128 = vst [vmem:[#allocation2 + $0x78] sm:$0xff] %v127_v15  ;;  %v133_v18 = vld [vmem:[%s2715_s5 + $0x90] sm:$0xff] }
   0xa   :  { %130 = vst [vmem:[#allocation2 + $0x80] sm:$0xff] %v129_v16  ;;  %132 = vst [vmem:[#allocation2 + $0x88] sm:$0xff] %v131_v17  ;;  %v135_v19 = vld [vmem:[%s2715_s5 + $0x98] sm:$0xff]  ;;  %v137_v20 = vld [vmem:[%s2715_s5 + $0xa0] sm:$0xff] }
   0xb   :  { %134 = vst [vmem:[#allocation2 + $0x90] sm:$0xff] %v133_v18  ;;  %136 = vst [vmem:[#allocation2 + $0x98] sm:$0xff] %v135_v19  ;;  %v139_v21 = vld [vmem:[%s2715_s5 + $0xa8] sm:$0xff]  ;;  %v141_v22 = vld [vmem:[%s2715_s5 + $0xb0] sm:$0xff] }
   0xc   :  { %138 = vst [vmem:[#allocation2 + $0xa0] sm:$0xff] %v137_v20  ;;  %v143_v23 = vld [vmem:[%s2715_s5 + $0xb8] sm:$0xff]  ;;  %140 = vst [vmem:[#allocation2 + $0xa8] sm:$0xff] %v139_v21  ;;  %v145_v24 = vld [vmem:[%s2715_s5 + $0xc0] sm:$0xff] }
   0xd   :  { %142 = vst [vmem:[#allocation2 + $0xb0] sm:$0xff] %v141_v22  ;;  %144 = vst [vmem:[#allocation2 + $0xb8] sm:$0xff] %v143_v23  ;;  %v147_v25 = vld [vmem:[%s2715_s5 + $0xc8] sm:$0xff]  ;;  %v149_v26 = vld [vmem:[%s2715_s5 + $0xd0] sm:$0xff] }
   0xe   :  { %146 = vst [vmem:[#allocation2 + $0xc0] sm:$0xff] %v145_v24  ;;  %148 = vst [vmem:[#allocation2 + $0xc8] sm:$0xff] %v147_v25  ;;  %v151_v27 = vld [vmem:[%s2715_s5 + $0xd8] sm:$0xff]  ;;  %v153_v28 = vld [vmem:[%s2715_s5 + $0xe0] sm:$0xff] }
   0xf   :  { %150 = vst [vmem:[#allocation2 + $0xd0] sm:$0xff] %v149_v26  ;;  %v155_v29 = vld [vmem:[%s2715_s5 + $0xe8] sm:$0xff]  ;;  %152 = vst [vmem:[#allocation2 + $0xd8] sm:$0xff] %v151_v27  ;;  %v157_v30 = vld [vmem:[%s2715_s5 + $0xf0] sm:$0xff] }
  0x10   :  { %154 = vst [vmem:[#allocation2 + $0xe0] sm:$0xff] %v153_v28  ;;  %156 = vst [vmem:[#allocation2 + $0xe8] sm:$0xff] %v155_v29  ;;  %v159_v31 = vld [vmem:[%s2715_s5 + $0xf8] sm:$0xff]  ;;  %v161_v32 = vld [vmem:[%s2715_s5 + $0x100] sm:$0xff] }
  0x11   :  { %158 = vst [vmem:[#allocation2 + $0xf0] sm:$0xff] %v157_v30  ;;  %160 = vst [vmem:[#allocation2 + $0xf8] sm:$0xff] %v159_v31  ;;  %v163_v33 = vld [vmem:[%s2715_s5 + $0x108] sm:$0xff]  ;;  %v165_v34 = vld [vmem:[%s2715_s5 + $0x110] sm:$0xff] }
  0x12   :  { %162 = vst [vmem:[#allocation2 + $0x100] sm:$0xff] %v161_v32  ;;  %v167_v35 = vld [vmem:[%s2715_s5 + $0x118] sm:$0xff]  ;;  %164 = vst [vmem:[#allocation2 + $0x108] sm:$0xff] %v163_v33  ;;  %v169_v36 = vld [vmem:[%s2715_s5 + $0x120] sm:$0xff] }
  0x13   :  { %166 = vst [vmem:[#allocation2 + $0x110] sm:$0xff] %v165_v34  ;;  %168 = vst [vmem:[#allocation2 + $0x118] sm:$0xff] %v167_v35  ;;  %v171_v37 = vld [vmem:[%s2715_s5 + $0x128] sm:$0xff]  ;;  %v173_v38 = vld [vmem:[%s2715_s5 + $0x130] sm:$0xff] }
  0x14   :  { %170 = vst [vmem:[#allocation2 + $0x120] sm:$0xff] %v169_v36  ;;  %172 = vst [vmem:[#allocation2 + $0x128] sm:$0xff] %v171_v37  ;;  %v175_v39 = vld [vmem:[%s2715_s5 + $0x138] sm:$0xff]  ;;  %v177_v40 = vld [vmem:[%s2715_s5 + $0x140] sm:$0xff] }
  0x15   :  { %174 = vst [vmem:[#allocation2 + $0x130] sm:$0xff] %v173_v38  ;;  %v179_v41 = vld [vmem:[%s2715_s5 + $0x148] sm:$0xff]  ;;  %176 = vst [vmem:[#allocation2 + $0x138] sm:$0xff] %v175_v39  ;;  %v181_v42 = vld [vmem:[%s2715_s5 + $0x150] sm:$0xff] }
  0x16   :  { %178 = vst [vmem:[#allocation2 + $0x140] sm:$0xff] %v177_v40  ;;  %180 = vst [vmem:[#allocation2 + $0x148] sm:$0xff] %v179_v41  ;;  %v183_v43 = vld [vmem:[%s2715_s5 + $0x158] sm:$0xff]  ;;  %v185_v44 = vld [vmem:[%s2715_s5 + $0x160] sm:$0xff] }
  0x17   :  { %182 = vst [vmem:[#allocation2 + $0x150] sm:$0xff] %v181_v42  ;;  %184 = vst [vmem:[#allocation2 + $0x158] sm:$0xff] %v183_v43  ;;  %v187_v45 = vld [vmem:[%s2715_s5 + $0x168] sm:$0xff]  ;;  %v189_v46 = vld [vmem:[%s2715_s5 + $0x170] sm:$0xff] }
  0x18   :  { %186 = vst [vmem:[#allocation2 + $0x160] sm:$0xff] %v185_v44  ;;  %v191_v47 = vld [vmem:[%s2715_s5 + $0x178] sm:$0xff]  ;;  %188 = vst [vmem:[#allocation2 + $0x168] sm:$0xff] %v187_v45  ;;  %v193_v48 = vld [vmem:[%s2715_s5 + $0x180] sm:$0xff] }
  0x19   :  { %190 = vst [vmem:[#allocation2 + $0x170] sm:$0xff] %v189_v46  ;;  %192 = vst [vmem:[#allocation2 + $0x178] sm:$0xff] %v191_v47  ;;  %v195_v49 = vld [vmem:[%s2715_s5 + $0x188] sm:$0xff]  ;;  %v197_v50 = vld [vmem:[%s2715_s5 + $0x190] sm:$0xff] }
  0x1a   :  { %194 = vst [vmem:[#allocation2 + $0x180] sm:$0xff] %v193_v48  ;;  %196 = vst [vmem:[#allocation2 + $0x188] sm:$0xff] %v195_v49  ;;  %v199_v51 = vld [vmem:[%s2715_s5 + $0x198] sm:$0xff]  ;;  %v201_v52 = vld [vmem:[%s2715_s5 + $0x1a0] sm:$0xff] }
  0x1b   :  { %198 = vst [vmem:[#allocation2 + $0x190] sm:$0xff] %v197_v50  ;;  %v203_v53 = vld [vmem:[%s2715_s5 + $0x1a8] sm:$0xff]  ;;  %200 = vst [vmem:[#allocation2 + $0x198] sm:$0xff] %v199_v51  ;;  %v205_v54 = vld [vmem:[%s2715_s5 + $0x1b0] sm:$0xff] }
  0x1c   :  { %202 = vst [vmem:[#allocation2 + $0x1a0] sm:$0xff] %v201_v52  ;;  %204 = vst [vmem:[#allocation2 + $0x1a8] sm:$0xff] %v203_v53  ;;  %v207_v55 = vld [vmem:[%s2715_s5 + $0x1b8] sm:$0xff]  ;;  %v209_v56 = vld [vmem:[%s2715_s5 + $0x1c0] sm:$0xff] }
  0x1d   :  { %206 = vst [vmem:[#allocation2 + $0x1b0] sm:$0xff] %v205_v54  ;;  %208 = vst [vmem:[#allocation2 + $0x1b8] sm:$0xff] %v207_v55  ;;  %v211_v57 = vld [vmem:[%s2715_s5 + $0x1c8] sm:$0xff]  ;;  %v213_v58 = vld [vmem:[%s2715_s5 + $0x1d0] sm:$0xff] }
  0x1e   :  { %210 = vst [vmem:[#allocation2 + $0x1c0] sm:$0xff] %v209_v56  ;;  %v215_v59 = vld [vmem:[%s2715_s5 + $0x1d8] sm:$0xff]  ;;  %212 = vst [vmem:[#allocation2 + $0x1c8] sm:$0xff] %v211_v57  ;;  %v217_v60 = vld [vmem:[%s2715_s5 + $0x1e0] sm:$0xff] }
  0x1f   :  { %214 = vst [vmem:[#allocation2 + $0x1d0] sm:$0xff] %v213_v58  ;;  %216 = vst [vmem:[#allocation2 + $0x1d8] sm:$0xff] %v215_v59  ;;  %v219_v61 = vld [vmem:[%s2715_s5 + $0x1e8] sm:$0xff]  ;;  %v221_v62 = vld [vmem:[%s2715_s5 + $0x1f0] sm:$0xff] }
  0x20   :  { %218 = vst [vmem:[#allocation2 + $0x1e0] sm:$0xff] %v217_v60  ;;  %220 = vst [vmem:[#allocation2 + $0x1e8] sm:$0xff] %v219_v61  ;;  %v223_v63 = vld [vmem:[%s2715_s5 + $0x1f8] sm:$0xff] }
  0x21   :  { %222 = vst [vmem:[#allocation2 + $0x1f0] sm:$0xff] %v221_v62  ;;  %224 = vst [vmem:[#allocation2 + $0x1f8] sm:$0xff] %v223_v63 }
  0x22   :  { %232 = vsyncadd [#allocation4], 8192 }
  0x23   :  { %1879 = dma.done.wait [#allocation4], 8192 }
  0x24   :  { %1880 = vsyncadd [#allocation4], 4294959104  ;;  %p1809_p1 = scmp.ne.s32.totalorder %s2712_s2, 1 }
  0x25   :  { %v1881_v0 = vmov (!%p1809_p1), 0.0  }
  0x26   :  { %240 = sbr.rel (%p1809_p1) target bundleno = 70 (0x46), region = 55  ;;  %241 = vst [vmem:[#allocation3] sm:$0xff] (!%p1809_p1), %v1881_v0  ;;  %242 = vst [vmem:[#allocation3 + $0x8] sm:$0xff] (!%p1809_p1), %v1881_v0 }
  0x27   :  { %243 = vst [vmem:[#allocation3 + $0x10] sm:$0xff] (!%p1809_p1), %v1881_v0  ;;  %244 = vst [vmem:[#allocation3 + $0x18] sm:$0xff] (!%p1809_p1), %v1881_v0 }
  0x28   :  { %245 = vst [vmem:[#allocation3 + $0x20] sm:$0xff] (!%p1809_p1), %v1881_v0  ;;  %246 = vst [vmem:[#allocation3 + $0x28] sm:$0xff] (!%p1809_p1), %v1881_v0 }
  0x29   :  { %247 = vst [vmem:[#allocation3 + $0x30] sm:$0xff] (!%p1809_p1), %v1881_v0  ;;  %248 = vst [vmem:[#allocation3 + $0x38] sm:$0xff] (!%p1809_p1), %v1881_v0 }
  0x2a   :  { %249 = vst [vmem:[#allocation3 + $0x40] sm:$0xff] (!%p1809_p1), %v1881_v0  ;;  %250 = vst [vmem:[#allocation3 + $0x48] sm:$0xff] (!%p1809_p1), %v1881_v0 }
  0x2b   :  { %251 = vst [vmem:[#allocation3 + $0x50] sm:$0xff] (!%p1809_p1), %v1881_v0  ;;  %252 = vst [vmem:[#allocation3 + $0x58] sm:$0xff] (!%p1809_p1), %v1881_v0 }
  0x2c   :  { %253 = vst [vmem:[#allocation3 + $0x60] sm:$0xff] (!%p1809_p1), %v1881_v0  ;;  %254 = vst [vmem:[#allocation3 + $0x68] sm:$0xff] (!%p1809_p1), %v1881_v0 }
  0x2d   :  { %255 = vst [vmem:[#allocation3 + $0x70] sm:$0xff] %v1881_v0  ;;  %256 = vst [vmem:[#allocation3 + $0x78] sm:$0xff] %v1881_v0 }
  0x2e   :  { %257 = vst [vmem:[#allocation3 + $0x80] sm:$0xff] %v1881_v0  ;;  %258 = vst [vmem:[#allocation3 + $0x88] sm:$0xff] %v1881_v0 }
  0x2f   :  { %259 = vst [vmem:[#allocation3 + $0x90] sm:$0xff] %v1881_v0  ;;  %260 = vst [vmem:[#allocation3 + $0x98] sm:$0xff] %v1881_v0 }
  0x30   :  { %261 = vst [vmem:[#allocation3 + $0xa0] sm:$0xff] %v1881_v0  ;;  %262 = vst [vmem:[#allocation3 + $0xa8] sm:$0xff] %v1881_v0 }
  0x31   :  { %263 = vst [vmem:[#allocation3 + $0xb0] sm:$0xff] %v1881_v0  ;;  %264 = vst [vmem:[#allocation3 + $0xb8] sm:$0xff] %v1881_v0 }
  0x32   :  { %265 = vst [vmem:[#allocation3 + $0xc0] sm:$0xff] %v1881_v0  ;;  %266 = vst [vmem:[#allocation3 + $0xc8] sm:$0xff] %v1881_v0 }
  0x33   :  { %267 = vst [vmem:[#allocation3 + $0xd0] sm:$0xff] %v1881_v0  ;;  %268 = vst [vmem:[#allocation3 + $0xd8] sm:$0xff] %v1881_v0 }
  0x34   :  { %269 = vst [vmem:[#allocation3 + $0xe0] sm:$0xff] %v1881_v0  ;;  %270 = vst [vmem:[#allocation3 + $0xe8] sm:$0xff] %v1881_v0 }
  0x35   :  { %271 = vst [vmem:[#allocation3 + $0xf0] sm:$0xff] %v1881_v0  ;;  %272 = vst [vmem:[#allocation3 + $0xf8] sm:$0xff] %v1881_v0 }
  0x36   :  { %273 = vst [vmem:[#allocation3 + $0x100] sm:$0xff] %v1881_v0  ;;  %274 = vst [vmem:[#allocation3 + $0x108] sm:$0xff] %v1881_v0 }
  0x37   :  { %275 = vst [vmem:[#allocation3 + $0x110] sm:$0xff] %v1881_v0  ;;  %276 = vst [vmem:[#allocation3 + $0x118] sm:$0xff] %v1881_v0 }
  0x38   :  { %277 = vst [vmem:[#allocation3 + $0x120] sm:$0xff] %v1881_v0  ;;  %278 = vst [vmem:[#allocation3 + $0x128] sm:$0xff] %v1881_v0 }
  0x39   :  { %279 = vst [vmem:[#allocation3 + $0x130] sm:$0xff] %v1881_v0  ;;  %280 = vst [vmem:[#allocation3 + $0x138] sm:$0xff] %v1881_v0 }
  0x3a   :  { %281 = vst [vmem:[#allocation3 + $0x140] sm:$0xff] %v1881_v0  ;;  %282 = vst [vmem:[#allocation3 + $0x148] sm:$0xff] %v1881_v0 }
  0x3b   :  { %283 = vst [vmem:[#allocation3 + $0x150] sm:$0xff] %v1881_v0  ;;  %284 = vst [vmem:[#allocation3 + $0x158] sm:$0xff] %v1881_v0 }
  0x3c   :  { %285 = vst [vmem:[#allocation3 + $0x160] sm:$0xff] %v1881_v0  ;;  %286 = vst [vmem:[#allocation3 + $0x168] sm:$0xff] %v1881_v0 }
  0x3d   :  { %287 = vst [vmem:[#allocation3 + $0x170] sm:$0xff] %v1881_v0  ;;  %288 = vst [vmem:[#allocation3 + $0x178] sm:$0xff] %v1881_v0 }
  0x3e   :  { %289 = vst [vmem:[#allocation3 + $0x180] sm:$0xff] %v1881_v0  ;;  %290 = vst [vmem:[#allocation3 + $0x188] sm:$0xff] %v1881_v0 }
  0x3f   :  { %291 = vst [vmem:[#allocation3 + $0x190] sm:$0xff] %v1881_v0  ;;  %292 = vst [vmem:[#allocation3 + $0x198] sm:$0xff] %v1881_v0 }
  0x40   :  { %293 = vst [vmem:[#allocation3 + $0x1a0] sm:$0xff] %v1881_v0  ;;  %294 = vst [vmem:[#allocation3 + $0x1a8] sm:$0xff] %v1881_v0 }
  0x41   :  { %295 = vst [vmem:[#allocation3 + $0x1b0] sm:$0xff] %v1881_v0  ;;  %296 = vst [vmem:[#allocation3 + $0x1b8] sm:$0xff] %v1881_v0 }
  0x42   :  { %297 = vst [vmem:[#allocation3 + $0x1c0] sm:$0xff] %v1881_v0  ;;  %298 = vst [vmem:[#allocation3 + $0x1c8] sm:$0xff] %v1881_v0 }
  0x43   :  { %299 = vst [vmem:[#allocation3 + $0x1d0] sm:$0xff] %v1881_v0  ;;  %300 = vst [vmem:[#allocation3 + $0x1d8] sm:$0xff] %v1881_v0 }
  0x44   :  { %301 = vst [vmem:[#allocation3 + $0x1e0] sm:$0xff] %v1881_v0  ;;  %302 = vst [vmem:[#allocation3 + $0x1e8] sm:$0xff] %v1881_v0 }
  0x45   :  { %303 = vst [vmem:[#allocation3 + $0x1f0] sm:$0xff] %v1881_v0  ;;  %304 = vst [vmem:[#allocation3 + $0x1f8] sm:$0xff] %v1881_v0 }
  0x46 PF:  { %s497_s2 = sld [smem:[#allocation7]]  ;;  %v2218_v1 = vld [vmem:[%s2714_s4 + $0x8] sm:$0xff]  ;;  %v2223_v2 = vld [vmem:[%s2714_s4 + $0x18] sm:$0xff]  ;;  %v1882_v3 = vmov 0  }
  0x47   :  { %661 = vmatprep.subr.bf16.mxu1 %v1882_v3  ;;  %950 = vmatprep.subr.bf16.mxu0 %v1882_v3  ;;  %v370_v4 = vunpack.c.l.s8.bf16 %v2218_v1  ;;  %v372_v5 = vunpack.c.l.s8.bf16 %v2223_v2  ;;  %s660_s20 = sld [smem:[#allocation10]] }
  0x49   :  { %693 = vmatprep.mubr.bf16.mxu1 %v370_v4  ;;  %982 = vmatprep.mubr.bf16.mxu0 %v372_v5 }
  0x4c   :  { %s1810_s22 = sshll.u32 %s497_s2, 9 }
  0x4d   :  { %s2229_s3 = scalar_lea.vmem [#allocation2], %s1810_s22 }
  0x4e   :  { %v500_v6 = vld [vmem:[%s2229_s3] sm:$0xff]  ;;  %v501_v7 = vld [vmem:[%s2229_s3 + $0x8] sm:$0xff]  ;;  %v502_v11 = vld [vmem:[%s2229_s3 + $0x10] sm:$0xff] }
  0x4f   :  { %v532_v8 = vld [vmem:[%s2229_s3 + $0x100] sm:$0xff]  ;;  %v564_v9 = vpack.c.bf16 %v501_v7, %v500_v6  ;;  %v533_v10 = vld [vmem:[%s2229_s3 + $0x108] sm:$0xff]  ;;  %v503_v12 = vld [vmem:[%s2229_s3 + $0x18] sm:$0xff] }
  0x50   :  { %v580_v13 = vpack.c.bf16 %v533_v10, %v532_v8  ;;  %v534_v14 = vld [vmem:[%s2229_s3 + $0x110] sm:$0xff]  ;;  %v535_v15 = vld [vmem:[%s2229_s3 + $0x118] sm:$0xff]  ;;  %v565_v16 = vpack.c.bf16 %v503_v12, %v502_v11  ;;  %v504_v18 = vld [vmem:[%s2229_s3 + $0x20] sm:$0xff] }
  0x51   :  { %662 = vmatpush1.bf16.msra.mxu1 %v564_v9  ;;  %v581_v17 = vpack.c.bf16 %v535_v15, %v534_v14  ;;  %v505_v19 = vld [vmem:[%s2229_s3 + $0x28] sm:$0xff]  ;;  %v536_v20 = vld [vmem:[%s2229_s3 + $0x120] sm:$0xff]  ;;  %v506_v24 = vld [vmem:[%s2229_s3 + $0x30] sm:$0xff] }
  0x52   :  { %951 = vmatpush1.bf16.msra.mxu0 %v580_v13  ;;  %663 = vmatprep.subr.bf16.mxu1 %v1882_v3  ;;  %v537_v21 = vld [vmem:[%s2229_s3 + $0x128] sm:$0xff]  ;;  %v566_v22 = vpack.c.bf16 %v505_v19, %v504_v18  ;;  %v507_v25 = vld [vmem:[%s2229_s3 + $0x38] sm:$0xff]  ;;  %v538_v26 = vld [vmem:[%s2229_s3 + $0x130] sm:$0xff] }
  0x53   :  { %952 = vmatprep.subr.bf16.mxu0 %v1882_v3  ;;  %v582_v23 = vpack.c.bf16 %v537_v21, %v536_v20  ;;  %v539_v27 = vld [vmem:[%s2229_s3 + $0x138] sm:$0xff]  ;;  %v567_v28 = vpack.c.bf16 %v507_v25, %v506_v24  ;;  %v508_v30 = vld [vmem:[%s2229_s3 + $0x40] sm:$0xff]  ;;  %v509_v31 = vld [vmem:[%s2229_s3 + $0x48] sm:$0xff] }
  0x54   :  { %v583_v29 = vpack.c.bf16 %v539_v27, %v538_v26  ;;  %v540_v32 = vld [vmem:[%s2229_s3 + $0x140] sm:$0xff]  ;;  %v541_v33 = vld [vmem:[%s2229_s3 + $0x148] sm:$0xff]  ;;  %v568_v34 = vpack.c.bf16 %v509_v31, %v508_v30  ;;  %v510_v36 = vld [vmem:[%s2229_s3 + $0x50] sm:$0xff] }
  0x55   :  { %664 = vmatpush1.bf16.msra.mxu1 %v565_v16  ;;  %v584_v35 = vpack.c.bf16 %v541_v33, %v540_v32  ;;  %v511_v37 = vld [vmem:[%s2229_s3 + $0x58] sm:$0xff]  ;;  %v542_v38 = vld [vmem:[%s2229_s3 + $0x150] sm:$0xff]  ;;  %v512_v42 = vld [vmem:[%s2229_s3 + $0x60] sm:$0xff] }
  0x56   :  { %953 = vmatpush1.bf16.msra.mxu0 %v581_v17  ;;  %665 = vmatprep.subr.bf16.mxu1 %v1882_v3  ;;  %v543_v39 = vld [vmem:[%s2229_s3 + $0x158] sm:$0xff]  ;;  %v569_v40 = vpack.c.bf16 %v511_v37, %v510_v36  ;;  %v513_v43 = vld [vmem:[%s2229_s3 + $0x68] sm:$0xff]  ;;  %v544_v44 = vld [vmem:[%s2229_s3 + $0x160] sm:$0xff] }
  0x57   :  { %954 = vmatprep.subr.bf16.mxu0 %v1882_v3  ;;  %v585_v41 = vpack.c.bf16 %v543_v39, %v542_v38  ;;  %v545_v45 = vld [vmem:[%s2229_s3 + $0x168] sm:$0xff]  ;;  %v570_v46 = vpack.c.bf16 %v513_v43, %v512_v42  ;;  %v514_v48 = vld [vmem:[%s2229_s3 + $0x70] sm:$0xff]  ;;  %v515_v49 = vld [vmem:[%s2229_s3 + $0x78] sm:$0xff] }
  0x58   :  { %v586_v47 = vpack.c.bf16 %v545_v45, %v544_v44  ;;  %v546_v50 = vld [vmem:[%s2229_s3 + $0x170] sm:$0xff]  ;;  %v547_v51 = vld [vmem:[%s2229_s3 + $0x178] sm:$0xff]  ;;  %v571_v52 = vpack.c.bf16 %v515_v49, %v514_v48  ;;  %v516_v54 = vld [vmem:[%s2229_s3 + $0x80] sm:$0xff]  ;;  %v374_v44 = vunpack.c.h.s8.bf16 %v2218_v1 }
  0x59   :  { %666 = vmatpush1.bf16.msra.mxu1 %v566_v22  ;;  %v587_v53 = vpack.c.bf16 %v547_v51, %v546_v50  ;;  %v517_v55 = vld [vmem:[%s2229_s3 + $0x88] sm:$0xff]  ;;  %v548_v56 = vld [vmem:[%s2229_s3 + $0x180] sm:$0xff]  ;;  %v518_v60 = vld [vmem:[%s2229_s3 + $0x90] sm:$0xff] }
  0x5a   :  { %955 = vmatpush1.bf16.msra.mxu0 %v582_v23  ;;  %667 = vmatprep.subr.bf16.mxu1 %v1882_v3  ;;  %v549_v57 = vld [vmem:[%s2229_s3 + $0x188] sm:$0xff]  ;;  %v572_v58 = vpack.c.bf16 %v517_v55, %v516_v54  ;;  %v519_v61 = vld [vmem:[%s2229_s3 + $0x98] sm:$0xff]  ;;  %v550_v62 = vld [vmem:[%s2229_s3 + $0x190] sm:$0xff] }
  0x5b   :  { %956 = vmatprep.subr.bf16.mxu0 %v1882_v3  ;;  %v588_v59 = vpack.c.bf16 %v549_v57, %v548_v56  ;;  %v551_v63 = vld [vmem:[%s2229_s3 + $0x198] sm:$0xff]  ;;  %v573_v0 = vpack.c.bf16 %v519_v61, %v518_v60  ;;  %v520_v5 = vld [vmem:[%s2229_s3 + $0xa0] sm:$0xff]  ;;  %v521_v6 = vld [vmem:[%s2229_s3 + $0xa8] sm:$0xff] }
  0x5c   :  { %v589_v4 = vpack.c.bf16 %v551_v63, %v550_v62  ;;  %v552_v7 = vld [vmem:[%s2229_s3 + $0x1a0] sm:$0xff]  ;;  %v553_v8 = vld [vmem:[%s2229_s3 + $0x1a8] sm:$0xff]  ;;  %v574_v9 = vpack.c.bf16 %v521_v6, %v520_v5  ;;  %v522_v11 = vld [vmem:[%s2229_s3 + $0xb0] sm:$0xff] }
  0x5d   :  { %668 = vmatpush1.bf16.msra.mxu1 %v567_v28  ;;  %v590_v10 = vpack.c.bf16 %v553_v8, %v552_v7  ;;  %v523_v12 = vld [vmem:[%s2229_s3 + $0xb8] sm:$0xff]  ;;  %v554_v13 = vld [vmem:[%s2229_s3 + $0x1b0] sm:$0xff]  ;;  %v524_v17 = vld [vmem:[%s2229_s3 + $0xc0] sm:$0xff] }
  0x5e   :  { %957 = vmatpush1.bf16.msra.mxu0 %v583_v29  ;;  %669 = vmatprep.subr.bf16.mxu1 %v1882_v3  ;;  %v555_v14 = vld [vmem:[%s2229_s3 + $0x1b8] sm:$0xff]  ;;  %v575_v15 = vpack.c.bf16 %v523_v12, %v522_v11  ;;  %v525_v18 = vld [vmem:[%s2229_s3 + $0xc8] sm:$0xff]  ;;  %v556_v19 = vld [vmem:[%s2229_s3 + $0x1c0] sm:$0xff] }
  0x5f   :  { %958 = vmatprep.subr.bf16.mxu0 %v1882_v3  ;;  %v591_v16 = vpack.c.bf16 %v555_v14, %v554_v13  ;;  %v557_v20 = vld [vmem:[%s2229_s3 + $0x1c8] sm:$0xff]  ;;  %v576_v21 = vpack.c.bf16 %v525_v18, %v524_v17  ;;  %v526_v23 = vld [vmem:[%s2229_s3 + $0xd0] sm:$0xff]  ;;  %v527_v24 = vld [vmem:[%s2229_s3 + $0xd8] sm:$0xff] }
  0x60   :  { %v592_v22 = vpack.c.bf16 %v557_v20, %v556_v19  ;;  %v558_v25 = vld [vmem:[%s2229_s3 + $0x1d0] sm:$0xff]  ;;  %v559_v26 = vld [vmem:[%s2229_s3 + $0x1d8] sm:$0xff]  ;;  %v577_v27 = vpack.c.bf16 %v527_v24, %v526_v23  ;;  %v528_v29 = vld [vmem:[%s2229_s3 + $0xe0] sm:$0xff] }
  0x61   :  { %670 = vmatpush1.bf16.msra.mxu1 %v568_v34  ;;  %v593_v28 = vpack.c.bf16 %v559_v26, %v558_v25  ;;  %v529_v30 = vld [vmem:[%s2229_s3 + $0xe8] sm:$0xff]  ;;  %v560_v31 = vld [vmem:[%s2229_s3 + $0x1e0] sm:$0xff]  ;;  %v531_v36 = vld [vmem:[%s2229_s3 + $0xf8] sm:$0xff] }
  0x62   :  { %959 = vmatpush1.bf16.msra.mxu0 %v584_v35  ;;  %671 = vmatprep.subr.bf16.mxu1 %v1882_v3  ;;  %v561_v32 = vld [vmem:[%s2229_s3 + $0x1e8] sm:$0xff]  ;;  %v578_v33 = vpack.c.bf16 %v529_v30, %v528_v29  ;;  %v530_v35 = vld [vmem:[%s2229_s3 + $0xf0] sm:$0xff]  ;;  %v563_v38 = vld [vmem:[%s2229_s3 + $0x1f8] sm:$0xff] }
  0x63   :  { %960 = vmatprep.subr.bf16.mxu0 %v1882_v3  ;;  %v594_v34 = vpack.c.bf16 %v561_v32, %v560_v31  ;;  %v562_v37 = vld [vmem:[%s2229_s3 + $0x1f0] sm:$0xff]  ;;  %v579_v39 = vpack.c.bf16 %v531_v36, %v530_v35  ;;  %v314_v56 = vld [vmem:[%s2714_s4 + $0x48] sm:$0xff]  ;;  %v316_v57 = vld [vmem:[%s2714_s4 + $0x58] sm:$0xff] }
  0x64   :  { %v307_v42 = vld [vmem:[%s2714_s4 + $0x10] sm:$0xff]  ;;  %v386_v60 = vunpack.c.l.s8.bf16 %v314_v56  ;;  %v388_v61 = vunpack.c.l.s8.bf16 %v316_v57  ;;  %v313_v62 = vld [vmem:[%s2714_s4 + $0x40] sm:$0xff]  ;;  %v390_v5 = vunpack.c.h.s8.bf16 %v314_v56  ;;  %v392_v6 = vunpack.c.h.s8.bf16 %v316_v57  ;;  %v318_v7 = vld [vmem:[%s2714_s4 + $0x68] sm:$0xff] }
  0x65   :  { %672 = vmatpush1.bf16.msra.mxu1 %v569_v40  ;;  %v305_v40 = vld [vmem:[%s2714_s4] sm:$0xff]  ;;  %v371_v45 = vunpack.c.l.s8.bf16 %v307_v42  ;;  %v375_v49 = vunpack.c.h.s8.bf16 %v307_v42  ;;  %v311_v51 = vld [vmem:[%s2714_s4 + $0x30] sm:$0xff]  ;;  %v320_v8 = vld [vmem:[%s2714_s4 + $0x78] sm:$0xff]  ;;  %v394_v11 = vunpack.c.l.s8.bf16 %v318_v7  ;;  %v398_v17 = vunpack.c.h.s8.bf16 %v318_v7 }
  0x66   :  { %961 = vmatpush1.bf16.msra.mxu0 %v585_v41  ;;  %673 = vmatprep.subr.bf16.mxu1 %v1882_v3  ;;  %v595_v41 = vpack.c.bf16 %v563_v38, %v562_v37  ;;  %v369_v43 = vunpack.c.l.s8.bf16 %v305_v40  ;;  %v373_v48 = vunpack.c.h.s8.bf16 %v305_v40  ;;  %v315_v63 = vld [vmem:[%s2714_s4 + $0x50] sm:$0xff]  ;;  %v396_v12 = vunpack.c.l.s8.bf16 %v320_v8  ;;  %v317_v13 = vld [vmem:[%s2714_s4 + $0x60] sm:$0xff]  ;;  %v322_v19 = vld [vmem:[%s2714_s4 + $0x88] sm:$0xff] }
  0x67   :  { %962 = vmatprep.subr.bf16.mxu0 %v1882_v3  ;;  %v319_v14 = vld [vmem:[%s2714_s4 + $0x70] sm:$0xff]  ;;  %v400_v18 = vunpack.c.h.s8.bf16 %v320_v8  ;;  %v324_v20 = vld [vmem:[%s2714_s4 + $0x98] sm:$0xff]  ;;  %v402_v23 = vunpack.c.l.s8.bf16 %v322_v19  ;;  %v321_v25 = vld [vmem:[%s2714_s4 + $0x80] sm:$0xff]  ;;  %v406_v29 = vunpack.c.h.s8.bf16 %v322_v19 }
  0x68   :  { %v404_v24 = vunpack.c.l.s8.bf16 %v324_v20  ;;  %v323_v26 = vld [vmem:[%s2714_s4 + $0x90] sm:$0xff]  ;;  %v408_v30 = vunpack.c.h.s8.bf16 %v324_v20  ;;  %v326_v31 = vld [vmem:[%s2714_s4 + $0xa8] sm:$0xff]  ;;  %v328_v32 = vld [vmem:[%s2714_s4 + $0xb8] sm:$0xff] }
  0x69   :  { %674 = vmatpush1.bf16.msra.mxu1 %v570_v46  ;;  %v376_v46 = vunpack.c.h.s8.bf16 %v2223_v2  ;;  %v309_v2 = vld [vmem:[%s2714_s4 + $0x20] sm:$0xff]  ;;  %v410_v35 = vunpack.c.l.s8.bf16 %v326_v31  ;;  %v412_v36 = vunpack.c.l.s8.bf16 %v328_v32  ;;  %v327_v38 = vld [vmem:[%s2714_s4 + $0xb0] sm:$0xff]  ;;  %v416_v42 = vunpack.c.h.s8.bf16 %v328_v32 }
  0x6a   :  { %963 = vmatpush1.bf16.msra.mxu0 %v586_v47  ;;  %675 = vmatprep.subr.bf16.mxu1 %v1882_v3  ;;  %v310_v47 = vld [vmem:[%s2714_s4 + $0x28] sm:$0xff]  ;;  %v325_v37 = vld [vmem:[%s2714_s4 + $0xa0] sm:$0xff]  ;;  %v411_v40 = vunpack.c.l.s8.bf16 %v327_v38 }
  0x6b   :  { %964 = vmatprep.subr.bf16.mxu0 %v1882_v3  ;;  %v378_v50 = vunpack.c.l.s8.bf16 %v310_v47  ;;  %v382_v54 = vunpack.c.h.s8.bf16 %v310_v47 }
  0x6d   :  { %676 = vmatpush1.bf16.msra.mxu1 %v571_v52  ;;  %v377_v52 = vunpack.c.l.s8.bf16 %v309_v2 }
  0x6e   :  { %965 = vmatpush1.bf16.msra.mxu0 %v587_v53  ;;  %677 = vmatprep.subr.bf16.mxu1 %v1882_v3  ;;  %v379_v53 = vunpack.c.l.s8.bf16 %v311_v51 }
  0x6f   :  { %966 = vmatprep.subr.bf16.mxu0 %v1882_v3 }
  0x71   :  { %678 = vmatpush1.bf16.msra.mxu1 %v572_v58  ;;  %v381_v58 = vunpack.c.h.s8.bf16 %v309_v2 }
  0x72   :  { %967 = vmatpush1.bf16.msra.mxu0 %v588_v59  ;;  %679 = vmatprep.subr.bf16.mxu1 %v1882_v3  ;;  %v383_v59 = vunpack.c.h.s8.bf16 %v311_v51 }
  0x73   :  { %968 = vmatprep.subr.bf16.mxu0 %v1882_v3 }
  0x75   :  { %680 = vmatpush1.bf16.msra.mxu1 %v573_v0  ;;  %v385_v0 = vunpack.c.l.s8.bf16 %v313_v62 }
  0x76   :  { %969 = vmatpush1.bf16.msra.mxu0 %v589_v4  ;;  %681 = vmatprep.subr.bf16.mxu1 %v1882_v3  ;;  %v387_v4 = vunpack.c.l.s8.bf16 %v315_v63 }
  0x77   :  { %970 = vmatprep.subr.bf16.mxu0 %v1882_v3 }
  0x79   :  { %682 = vmatpush1.bf16.msra.mxu1 %v574_v9  ;;  %v389_v9 = vunpack.c.h.s8.bf16 %v313_v62 }
  0x7a   :  { %971 = vmatpush1.bf16.msra.mxu0 %v590_v10  ;;  %683 = vmatprep.subr.bf16.mxu1 %v1882_v3  ;;  %v391_v10 = vunpack.c.h.s8.bf16 %v315_v63 }
  0x7b   :  { %972 = vmatprep.subr.bf16.mxu0 %v1882_v3 }
  0x7d   :  { %684 = vmatpush1.bf16.msra.mxu1 %v575_v15  ;;  %v393_v15 = vunpack.c.l.s8.bf16 %v317_v13 }
  0x7e   :  { %973 = vmatpush1.bf16.msra.mxu0 %v591_v16  ;;  %685 = vmatprep.subr.bf16.mxu1 %v1882_v3  ;;  %v395_v16 = vunpack.c.l.s8.bf16 %v319_v14 }
  0x7f   :  { %974 = vmatprep.subr.bf16.mxu0 %v1882_v3 }
  0x81   :  { %686 = vmatpush1.bf16.msra.mxu1 %v576_v21  ;;  %v397_v21 = vunpack.c.h.s8.bf16 %v317_v13 }
  0x82   :  { %975 = vmatpush1.bf16.msra.mxu0 %v592_v22  ;;  %687 = vmatprep.subr.bf16.mxu1 %v1882_v3  ;;  %v399_v22 = vunpack.c.h.s8.bf16 %v319_v14 }
  0x83   :  { %976 = vmatprep.subr.bf16.mxu0 %v1882_v3 }
  0x85   :  { %688 = vmatpush1.bf16.msra.mxu1 %v577_v27  ;;  %v401_v27 = vunpack.c.l.s8.bf16 %v321_v25 }
  0x86   :  { %977 = vmatpush1.bf16.msra.mxu0 %v593_v28  ;;  %689 = vmatprep.subr.bf16.mxu1 %v1882_v3  ;;  %v403_v28 = vunpack.c.l.s8.bf16 %v323_v26 }
  0x87   :  { %978 = vmatprep.subr.bf16.mxu0 %v1882_v3 }
  0x89   :  { %690 = vmatpush1.bf16.msra.mxu1 %v578_v33  ;;  %v405_v33 = vunpack.c.h.s8.bf16 %v321_v25 }
  0x8a   :  { %979 = vmatpush1.bf16.msra.mxu0 %v594_v34  ;;  %691 = vmatprep.subr.bf16.mxu1 %v1882_v3  ;;  %v407_v34 = vunpack.c.h.s8.bf16 %v323_v26 }
  0x8b   :  { %980 = vmatprep.subr.bf16.mxu0 %v1882_v3  ;;  %v312_v3 = vld [vmem:[%s2714_s4 + $0x38] sm:$0xff] }
  0x8c   :  { %v380_v1 = vunpack.c.l.s8.bf16 %v312_v3  ;;  %v384_v55 = vunpack.c.h.s8.bf16 %v312_v3 }
  0x8d   :  { %692 = vmatpush1.bf16.msra.mxu1 %v579_v39  ;;  %v409_v39 = vunpack.c.l.s8.bf16 %v325_v37 }
  0x8e   :  { %981 = vmatpush1.bf16.msra.mxu0 %v595_v41  ;;  %v414_v41 = vunpack.c.h.s8.bf16 %v326_v31 }
  0x90   :  { %694 = vmatmul.mubr.bf16.vlgmr.msra.gmra.mrb[0].mxu1 %v369_v43  ;;  %v330_v43 = vld [vmem:[%s2714_s4 + $0xc8] sm:$0xff] }
  0x91   :  { %983 = vmatmul.mubr.bf16.vlgmr.msra.gmra.mrb[0].mxu0 %v371_v45  ;;  %701 = vmatprep.mubr.bf16.mxu1 %v374_v44  ;;  %v332_v44 = vld [vmem:[%s2714_s4 + $0xd8] sm:$0xff]  ;;  %v413_v45 = vunpack.c.h.s8.bf16 %v325_v37  ;;  %v418_v47 = vunpack.c.l.s8.bf16 %v330_v43  ;;  %v422_v2 = vunpack.c.h.s8.bf16 %v330_v43 }
  0x92   :  { %990 = vmatprep.mubr.bf16.mxu0 %v376_v46  ;;  %v415_v46 = vunpack.c.h.s8.bf16 %v327_v38  ;;  %v420_v3 = vunpack.c.l.s8.bf16 %v332_v44  ;;  %v424_v51 = vunpack.c.h.s8.bf16 %v332_v44 }
  0x98   :  { %702 = vmatmul.mubr.bf16.gmra.mrb[4].mxu1 %v373_v48  ;;  %v329_v48 = vld [vmem:[%s2714_s4 + $0xc0] sm:$0xff] }
  0x99   :  { %991 = vmatmul.mubr.bf16.gmra.mrb[4].mxu0 %v375_v49  ;;  %709 = vmatprep.mubr.bf16.mxu1 %v378_v50  ;;  %v331_v49 = vld [vmem:[%s2714_s4 + $0xd0] sm:$0xff]  ;;  %v417_v50 = vunpack.c.l.s8.bf16 %v329_v48 }
  0x9a   :  { %998 = vmatprep.mubr.bf16.mxu0 %v380_v1  ;;  %v419_v1 = vunpack.c.l.s8.bf16 %v331_v49 }
  0xa0   :  { %710 = vmatmul.mubr.bf16.gmra.mrb[8].mxu1 %v377_v52  ;;  %v334_v52 = vld [vmem:[%s2714_s4 + $0xe8] sm:$0xff] }
  0xa1   :  { %999 = vmatmul.mubr.bf16.gmra.mrb[8].mxu0 %v379_v53  ;;  %717 = vmatprep.mubr.bf16.mxu1 %v382_v54  ;;  %v336_v53 = vld [vmem:[%s2714_s4 + $0xf8] sm:$0xff]  ;;  %v421_v54 = vunpack.c.h.s8.bf16 %v329_v48  ;;  %v426_v56 = vunpack.c.l.s8.bf16 %v334_v52  ;;  %v430_v62 = vunpack.c.h.s8.bf16 %v334_v52 }
  0xa2   :  { %1006 = vmatprep.mubr.bf16.mxu0 %v384_v55  ;;  %v423_v55 = vunpack.c.h.s8.bf16 %v331_v49  ;;  %v428_v57 = vunpack.c.l.s8.bf16 %v336_v53  ;;  %v432_v63 = vunpack.c.h.s8.bf16 %v336_v53 }
  0xa8   :  { %718 = vmatmul.mubr.bf16.gmra.mrb[12].mxu1 %v381_v58  ;;  %v333_v58 = vld [vmem:[%s2714_s4 + $0xe0] sm:$0xff] }
  0xa9   :  { %1007 = vmatmul.mubr.bf16.gmra.mrb[12].mxu0 %v383_v59  ;;  %725 = vmatprep.mubr.bf16.mxu1 %v386_v60  ;;  %v335_v59 = vld [vmem:[%s2714_s4 + $0xf0] sm:$0xff]  ;;  %v425_v60 = vunpack.c.l.s8.bf16 %v333_v58 }
  0xaa   :  { %1014 = vmatprep.mubr.bf16.mxu0 %v388_v61  ;;  %v427_v61 = vunpack.c.l.s8.bf16 %v335_v59 }
  0xb0   :  { %726 = vmatmul.mubr.bf16.gmra.mrb[16].mxu1 %v385_v0  ;;  %v338_v0 = vld [vmem:[%s2714_s4 + $0x108] sm:$0xff] }
  0xb1   :  { %1015 = vmatmul.mubr.bf16.gmra.mrb[16].mxu0 %v387_v4  ;;  %733 = vmatprep.mubr.bf16.mxu1 %v390_v5  ;;  %v340_v4 = vld [vmem:[%s2714_s4 + $0x118] sm:$0xff]  ;;  %v429_v5 = vunpack.c.h.s8.bf16 %v333_v58  ;;  %v434_v7 = vunpack.c.l.s8.bf16 %v338_v0  ;;  %v438_v13 = vunpack.c.h.s8.bf16 %v338_v0 }
  0xb2   :  { %1022 = vmatprep.mubr.bf16.mxu0 %v392_v6  ;;  %v431_v6 = vunpack.c.h.s8.bf16 %v335_v59  ;;  %v436_v8 = vunpack.c.l.s8.bf16 %v340_v4  ;;  %v440_v14 = vunpack.c.h.s8.bf16 %v340_v4 }
  0xb8   :  { %734 = vmatmul.mubr.bf16.gmra.mrb[20].mxu1 %v389_v9  ;;  %v337_v9 = vld [vmem:[%s2714_s4 + $0x100] sm:$0xff] }
  0xb9   :  { %1023 = vmatmul.mubr.bf16.gmra.mrb[20].mxu0 %v391_v10  ;;  %741 = vmatprep.mubr.bf16.mxu1 %v394_v11  ;;  %v339_v10 = vld [vmem:[%s2714_s4 + $0x110] sm:$0xff]  ;;  %v433_v11 = vunpack.c.l.s8.bf16 %v337_v9 }
  0xba   :  { %1030 = vmatprep.mubr.bf16.mxu0 %v396_v12  ;;  %v435_v12 = vunpack.c.l.s8.bf16 %v339_v10 }
  0xc0   :  { %742 = vmatmul.mubr.bf16.gmra.mrb[24].mxu1 %v393_v15  ;;  %v342_v15 = vld [vmem:[%s2714_s4 + $0x128] sm:$0xff] }
  0xc1   :  { %1031 = vmatmul.mubr.bf16.gmra.mrb[24].mxu0 %v395_v16  ;;  %749 = vmatprep.mubr.bf16.mxu1 %v398_v17  ;;  %v344_v16 = vld [vmem:[%s2714_s4 + $0x138] sm:$0xff]  ;;  %v437_v17 = vunpack.c.h.s8.bf16 %v337_v9  ;;  %v442_v19 = vunpack.c.l.s8.bf16 %v342_v15  ;;  %v446_v25 = vunpack.c.h.s8.bf16 %v342_v15  ;;  %v2495_v15 = vstv %s660_s20 }
  0xc2   :  { %1038 = vmatprep.mubr.bf16.mxu0 %v400_v18  ;;  %v439_v18 = vunpack.c.h.s8.bf16 %v339_v10  ;;  %v444_v20 = vunpack.c.l.s8.bf16 %v344_v16  ;;  %v448_v26 = vunpack.c.h.s8.bf16 %v344_v16 }
  0xc8   :  { %750 = vmatmul.mubr.bf16.gmra.mrb[28].mxu1 %v397_v21  ;;  %v341_v21 = vld [vmem:[%s2714_s4 + $0x120] sm:$0xff] }
  0xc9   :  { %1039 = vmatmul.mubr.bf16.gmra.mrb[28].mxu0 %v399_v22  ;;  %757 = vmatprep.mubr.bf16.mxu1 %v402_v23  ;;  %v343_v22 = vld [vmem:[%s2714_s4 + $0x130] sm:$0xff]  ;;  %v441_v23 = vunpack.c.l.s8.bf16 %v341_v21 }
  0xca   :  { %1046 = vmatprep.mubr.bf16.mxu0 %v404_v24  ;;  %v443_v24 = vunpack.c.l.s8.bf16 %v343_v22 }
  0xd0   :  { %758 = vmatmul.mubr.bf16.gmra.mrb[32].mxu1 %v401_v27  ;;  %v346_v27 = vld [vmem:[%s2714_s4 + $0x148] sm:$0xff] }
  0xd1   :  { %1047 = vmatmul.mubr.bf16.gmra.mrb[32].mxu0 %v403_v28  ;;  %765 = vmatprep.mubr.bf16.mxu1 %v406_v29  ;;  %v348_v28 = vld [vmem:[%s2714_s4 + $0x158] sm:$0xff]  ;;  %v445_v29 = vunpack.c.h.s8.bf16 %v341_v21  ;;  %v450_v31 = vunpack.c.l.s8.bf16 %v346_v27  ;;  %v454_v37 = vunpack.c.h.s8.bf16 %v346_v27 }
  0xd2   :  { %1054 = vmatprep.mubr.bf16.mxu0 %v408_v30  ;;  %v447_v30 = vunpack.c.h.s8.bf16 %v343_v22  ;;  %v452_v32 = vunpack.c.l.s8.bf16 %v348_v28  ;;  %v456_v38 = vunpack.c.h.s8.bf16 %v348_v28 }
  0xd8   :  { %766 = vmatmul.mubr.bf16.gmra.mrb[36].mxu1 %v405_v33  ;;  %v345_v33 = vld [vmem:[%s2714_s4 + $0x140] sm:$0xff] }
  0xd9   :  { %1055 = vmatmul.mubr.bf16.gmra.mrb[36].mxu0 %v407_v34  ;;  %773 = vmatprep.mubr.bf16.mxu1 %v410_v35  ;;  %v347_v34 = vld [vmem:[%s2714_s4 + $0x150] sm:$0xff]  ;;  %v449_v35 = vunpack.c.l.s8.bf16 %v345_v33 }
  0xda   :  { %1062 = vmatprep.mubr.bf16.mxu0 %v412_v36  ;;  %v451_v36 = vunpack.c.l.s8.bf16 %v347_v34 }
  0xe0   :  { %774 = vmatmul.mubr.bf16.gmra.mrb[40].mxu1 %v409_v39  ;;  %v350_v39 = vld [vmem:[%s2714_s4 + $0x168] sm:$0xff] }
  0xe1   :  { %1063 = vmatmul.mubr.bf16.gmra.mrb[40].mxu0 %v411_v40  ;;  %781 = vmatprep.mubr.bf16.mxu1 %v414_v41  ;;  %v352_v40 = vld [vmem:[%s2714_s4 + $0x178] sm:$0xff]  ;;  %v453_v41 = vunpack.c.h.s8.bf16 %v345_v33  ;;  %v458_v43 = vunpack.c.l.s8.bf16 %v350_v39  ;;  %v462_v48 = vunpack.c.h.s8.bf16 %v350_v39  ;;  %v361_v33 = vld [vmem:[%s2714_s4 + $0x1c0] sm:$0xff] }
  0xe2   :  { %1070 = vmatprep.mubr.bf16.mxu0 %v416_v42  ;;  %v455_v42 = vunpack.c.h.s8.bf16 %v347_v34  ;;  %v460_v44 = vunpack.c.l.s8.bf16 %v352_v40  ;;  %v464_v49 = vunpack.c.h.s8.bf16 %v352_v40  ;;  %v363_v34 = vld [vmem:[%s2714_s4 + $0x1d0] sm:$0xff]  ;;  %v481_v39 = vunpack.c.l.s8.bf16 %v361_v33 }
  0xe8   :  { %782 = vmatmul.mubr.bf16.gmra.mrb[44].mxu1 %v413_v45  ;;  %v349_v45 = vld [vmem:[%s2714_s4 + $0x160] sm:$0xff] }
  0xe9   :  { %1071 = vmatmul.mubr.bf16.gmra.mrb[44].mxu0 %v415_v46  ;;  %789 = vmatprep.mubr.bf16.mxu1 %v418_v47  ;;  %v351_v46 = vld [vmem:[%s2714_s4 + $0x170] sm:$0xff]  ;;  %v457_v47 = vunpack.c.l.s8.bf16 %v349_v45 }
  0xea   :  { %1078 = vmatprep.mubr.bf16.mxu0 %v420_v3  ;;  %v459_v3 = vunpack.c.l.s8.bf16 %v351_v46 }
  0xf0   :  { %790 = vmatmul.mubr.bf16.gmra.mrb[48].mxu1 %v417_v50  ;;  %v354_v50 = vld [vmem:[%s2714_s4 + $0x188] sm:$0xff] }
  0xf1   :  { %1079 = vmatmul.mubr.bf16.gmra.mrb[48].mxu0 %v419_v1  ;;  %797 = vmatprep.mubr.bf16.mxu1 %v422_v2  ;;  %v356_v1 = vld [vmem:[%s2714_s4 + $0x198] sm:$0xff]  ;;  %v461_v2 = vunpack.c.h.s8.bf16 %v349_v45  ;;  %v466_v52 = vunpack.c.l.s8.bf16 %v354_v50  ;;  %v470_v58 = vunpack.c.h.s8.bf16 %v354_v50  ;;  %v598_v45 = vld [vmem:[#allocation3 + $0x10] sm:$0xff] }
  0xf2   :  { %1086 = vmatprep.mubr.bf16.mxu0 %v424_v51  ;;  %v463_v51 = vunpack.c.h.s8.bf16 %v351_v46  ;;  %v468_v53 = vunpack.c.l.s8.bf16 %v356_v1  ;;  %v472_v59 = vunpack.c.h.s8.bf16 %v356_v1  ;;  %v599_v1 = vld [vmem:[#allocation3 + $0x18] sm:$0xff] }
  0xf8   :  { %798 = vmatmul.mubr.bf16.gmra.mrb[52].mxu1 %v421_v54  ;;  %v353_v54 = vld [vmem:[%s2714_s4 + $0x180] sm:$0xff] }
  0xf9   :  { %1087 = vmatmul.mubr.bf16.gmra.mrb[52].mxu0 %v423_v55  ;;  %805 = vmatprep.mubr.bf16.mxu1 %v426_v56  ;;  %v355_v55 = vld [vmem:[%s2714_s4 + $0x190] sm:$0xff]  ;;  %v465_v56 = vunpack.c.l.s8.bf16 %v353_v54 }
  0xfa   :  { %1094 = vmatprep.mubr.bf16.mxu0 %v428_v57  ;;  %v467_v57 = vunpack.c.l.s8.bf16 %v355_v55 }
 0x100   :  { %806 = vmatmul.mubr.bf16.gmra.mrb[56].mxu1 %v425_v60  ;;  %v358_v60 = vld [vmem:[%s2714_s4 + $0x1a8] sm:$0xff] }
 0x101   :  { %1095 = vmatmul.mubr.bf16.gmra.mrb[56].mxu0 %v427_v61  ;;  %813 = vmatprep.mubr.bf16.mxu1 %v430_v62  ;;  %v360_v61 = vld [vmem:[%s2714_s4 + $0x1b8] sm:$0xff]  ;;  %v469_v62 = vunpack.c.h.s8.bf16 %v353_v54  ;;  %v474_v0 = vunpack.c.l.s8.bf16 %v358_v60  ;;  %v478_v9 = vunpack.c.h.s8.bf16 %v358_v60 }
 0x102   :  { %1102 = vmatprep.mubr.bf16.mxu0 %v432_v63  ;;  %v471_v63 = vunpack.c.h.s8.bf16 %v355_v55  ;;  %v476_v4 = vunpack.c.l.s8.bf16 %v360_v61  ;;  %v480_v10 = vunpack.c.h.s8.bf16 %v360_v61  ;;  %v368_v55 = vld [vmem:[%s2714_s4 + $0x1f8] sm:$0xff] }
 0x108   :  { %814 = vmatmul.mubr.bf16.gmra.mrb[60].mxu1 %v429_v5  ;;  %v357_v5 = vld [vmem:[%s2714_s4 + $0x1a0] sm:$0xff] }
 0x109   :  { %1103 = vmatmul.mubr.bf16.gmra.mrb[60].mxu0 %v431_v6  ;;  %821 = vmatprep.mubr.bf16.mxu1 %v434_v7  ;;  %v359_v6 = vld [vmem:[%s2714_s4 + $0x1b0] sm:$0xff]  ;;  %v473_v7 = vunpack.c.l.s8.bf16 %v357_v5 }
 0x10a   :  { %1110 = vmatprep.mubr.bf16.mxu0 %v436_v8  ;;  %v475_v8 = vunpack.c.l.s8.bf16 %v359_v6  ;;  %v479_v21 = vunpack.c.h.s8.bf16 %v359_v6  ;;  %v492_v6 = vunpack.c.l.s8.bf16 %v368_v55 }
 0x110   :  { %822 = vmatmul.mubr.bf16.gmra.mrb[64].mxu1 %v433_v11  ;;  %v362_v11 = vld [vmem:[%s2714_s4 + $0x1c8] sm:$0xff] }
 0x111   :  { %1111 = vmatmul.mubr.bf16.gmra.mrb[64].mxu0 %v435_v12  ;;  %829 = vmatprep.mubr.bf16.mxu1 %v438_v13  ;;  %v364_v13 = vld [vmem:[%s2714_s4 + $0x1d8] sm:$0xff]  ;;  %v482_v22 = vunpack.c.l.s8.bf16 %v362_v11 }
 0x112   :  { %1118 = vmatprep.mubr.bf16.mxu0 %v440_v14 }
 0x118   :  { %830 = vmatmul.mubr.bf16.gmra.mrb[68].mxu1 %v437_v17  ;;  %v477_v17 = vunpack.c.h.s8.bf16 %v357_v5 }
 0x119   :  { %1119 = vmatmul.mubr.bf16.gmra.mrb[68].mxu0 %v439_v18  ;;  %837 = vmatprep.mubr.bf16.mxu1 %v442_v19 }
 0x11a   :  { %1126 = vmatprep.mubr.bf16.mxu0 %v444_v20 }
 0x120   :  { %838 = vmatmul.mubr.bf16.gmra.mrb[72].mxu1 %v441_v23  ;;  %v596_v23 = vld [vmem:[#allocation3] sm:$0xff] }
 0x121   :  { %1127 = vmatmul.mubr.bf16.gmra.mrb[72].mxu0 %v443_v24  ;;  %845 = vmatprep.mubr.bf16.mxu1 %v446_v25 }
 0x122   :  { %1134 = vmatprep.mubr.bf16.mxu0 %v448_v26  ;;  %v484_v26 = vunpack.c.l.s8.bf16 %v364_v13 }
 0x128   :  { %846 = vmatmul.mubr.bf16.gmra.mrb[76].mxu1 %v445_v29 }
 0x129   :  { %1135 = vmatmul.mubr.bf16.gmra.mrb[76].mxu0 %v447_v30  ;;  %853 = vmatprep.mubr.bf16.mxu1 %v450_v31  ;;  %v597_v30 = vld [vmem:[#allocation3 + $0x8] sm:$0xff] }
 0x12a   :  { %1142 = vmatprep.mubr.bf16.mxu0 %v452_v32 }
 0x130   :  { %854 = vmatmul.mubr.bf16.gmra.mrb[80].mxu1 %v449_v35 }
 0x131   :  { %1143 = vmatmul.mubr.bf16.gmra.mrb[80].mxu0 %v451_v36  ;;  %861 = vmatprep.mubr.bf16.mxu1 %v454_v37 }
 0x132   :  { %1150 = vmatprep.mubr.bf16.mxu0 %v456_v38 }
 0x138   :  { %862 = vmatmul.mubr.bf16.gmra.mrb[84].mxu1 %v453_v41 }
 0x139   :  { %1151 = vmatmul.mubr.bf16.gmra.mrb[84].mxu0 %v455_v42  ;;  %869 = vmatprep.mubr.bf16.mxu1 %v458_v43  ;;  %v483_v43 = vunpack.c.l.s8.bf16 %v363_v34 }
 0x13a   :  { %1158 = vmatprep.mubr.bf16.mxu0 %v460_v44  ;;  %v486_v44 = vunpack.c.h.s8.bf16 %v362_v11 }
 0x140   :  { %870 = vmatmul.mubr.bf16.gmra.mrb[88].mxu1 %v457_v47 }
 0x141   :  { %1159 = vmatmul.mubr.bf16.gmra.mrb[88].mxu0 %v459_v3  ;;  %877 = vmatprep.mubr.bf16.mxu1 %v462_v48  ;;  %v488_v3 = vunpack.c.h.s8.bf16 %v364_v13  ;;  %v365_v13 = vld [vmem:[%s2714_s4 + $0x1e0] sm:$0xff] }
 0x142   :  { %1166 = vmatprep.mubr.bf16.mxu0 %v464_v49 }
 0x148   :  { %878 = vmatmul.mubr.bf16.gmra.mrb[92].mxu1 %v461_v2 }
 0x149   :  { %1167 = vmatmul.mubr.bf16.gmra.mrb[92].mxu0 %v463_v51  ;;  %885 = vmatprep.mubr.bf16.mxu1 %v466_v52  ;;  %v366_v52 = vld [vmem:[%s2714_s4 + $0x1e8] sm:$0xff] }
 0x14a   :  { %1174 = vmatprep.mubr.bf16.mxu0 %v468_v53 }
 0x150   :  { %886 = vmatmul.mubr.bf16.gmra.mrb[96].mxu1 %v465_v56 }
 0x151   :  { %1175 = vmatmul.mubr.bf16.gmra.mrb[96].mxu0 %v467_v57  ;;  %893 = vmatprep.mubr.bf16.mxu1 %v470_v58  ;;  %v485_v58 = vunpack.c.h.s8.bf16 %v361_v33  ;;  %v603_v33 = vld [vmem:[#allocation3 + $0x38] sm:$0xff] }
 0x152   :  { %1182 = vmatprep.mubr.bf16.mxu0 %v472_v59 }
 0x158   :  { %894 = vmatmul.mubr.bf16.gmra.mrb[100].mxu1 %v469_v62  ;;  %v487_v62 = vunpack.c.h.s8.bf16 %v363_v34 }
 0x159   :  { %1183 = vmatmul.mubr.bf16.gmra.mrb[100].mxu0 %v471_v63  ;;  %901 = vmatprep.mubr.bf16.mxu1 %v474_v0  ;;  %v490_v63 = vunpack.c.l.s8.bf16 %v366_v52  ;;  %v600_v0 = vld [vmem:[#allocation3 + $0x20] sm:$0xff] }
 0x15a   :  { %1190 = vmatprep.mubr.bf16.mxu0 %v476_v4 }
 0x160   :  { %902 = vmatmul.mubr.bf16.gmra.mrb[104].mxu1 %v473_v7 }
 0x161   :  { %1191 = vmatmul.mubr.bf16.gmra.mrb[104].mxu0 %v475_v8  ;;  %909 = vmatprep.mubr.bf16.mxu1 %v478_v9 }
 0x162   :  { %1198 = vmatprep.mubr.bf16.mxu0 %v480_v10  ;;  %v601_v10 = vld [vmem:[#allocation3 + $0x28] sm:$0xff] }
 0x163   :  { %v695_v12 = vpop.f32.mrb[0].mxu1 }
 0x164   :  { %v984_v14 = vpop.f32.mrb[0].mxu0  ;;  %v697_v16 = vpop.f32.mrb[1].mxu1 }
 0x165   :  { %v985_v18 = vadd.f32 %v984_v14, %v695_v12  ;;  %v986_v19 = vpop.f32.mrb[1].mxu0  ;;  %v698_v20 = vpop.f32.mrb[2].mxu1  ;;  %v367_v14 = vld [vmem:[%s2714_s4 + $0x1f0] sm:$0xff]  ;;  %s2547_s4 = sld [smem:[#allocation9]] }
 0x166   :  { %v987_v24 = vpop.f32.mrb[2].mxu0  ;;  %v700_v25 = vpop.f32.mrb[3].mxu1 }
 0x167   :  { %v1240_v27 = vmul.f32 %v2495_v15, %v985_v18  ;;  %v988_v28 = vadd.f32 %v987_v24, %v698_v20  ;;  %v989_v29 = vpop.f32.mrb[3].mxu0  ;;  %v489_v20 = vunpack.c.l.s8.bf16 %v365_v13  ;;  %v491_v24 = vunpack.c.l.s8.bf16 %v367_v14 }
 0x168   :  { %910 = vmatmul.mubr.bf16.gmra.mrb[108].mxu1 %v477_v17  ;;  %v494_v25 = vunpack.c.h.s8.bf16 %v366_v52  ;;  %v496_v29 = vunpack.c.h.s8.bf16 %v368_v55 }
 0x169   :  { %v1304_v31 = vadd.f32 %v1240_v27, %v596_v23  ;;  %v1241_v32 = vmul.f32 %v2495_v15, %v988_v28  ;;  %1199 = vmatmul.mubr.bf16.gmra.mrb[108].mxu0 %v479_v21  ;;  %917 = vmatprep.mubr.bf16.mxu1 %v482_v22 }
 0x16a   :  { %1206 = vmatprep.mubr.bf16.mxu0 %v484_v26  ;;  %v602_v26 = vld [vmem:[#allocation3 + $0x30] sm:$0xff] }
 0x16b   :  { %1368 = vst [vmem:[#allocation3] sm:$0xff] %v1304_v31  ;;  %v1305_v35 = vadd.f32 %v1241_v32, %v597_v30  ;;  %v703_v36 = vpop.f32.mrb[4].mxu1  ;;  %p1811_p2 = scmp.ne.s32.totalorder %s2547_s4, 1 }
 0x16c   :  { %v992_v37 = vpop.f32.mrb[4].mxu0  ;;  %v705_v38 = vpop.f32.mrb[5].mxu1 }
 0x16d   :  { %1369 = vst [vmem:[#allocation3 + $0x8] sm:$0xff] %v1305_v35  ;;  %v993_v40 = vadd.f32 %v992_v37, %v703_v36  ;;  %v994_v41 = vpop.f32.mrb[5].mxu0  ;;  %v706_v42 = vpop.f32.mrb[6].mxu1 }
 0x16e   :  { %v995_v46 = vpop.f32.mrb[6].mxu0  ;;  %v708_v47 = vpop.f32.mrb[7].mxu1 }
 0x16f   :  { %v1242_v48 = vmul.f32 %v2495_v15, %v993_v40  ;;  %v996_v49 = vadd.f32 %v995_v46, %v706_v42  ;;  %v997_v50 = vpop.f32.mrb[7].mxu0  ;;  %v493_v40 = vunpack.c.h.s8.bf16 %v365_v13  ;;  %v608_v13 = vld [vmem:[#allocation3 + $0x60] sm:$0xff] }
 0x170   :  { %918 = vmatmul.mubr.bf16.gmra.mrb[112].mxu1 %v481_v39  ;;  %v605_v50 = vld [vmem:[#allocation3 + $0x48] sm:$0xff] }
 0x171   :  { %v1306_v2 = vadd.f32 %v1242_v48, %v598_v45  ;;  %v1243_v51 = vmul.f32 %v2495_v15, %v996_v49  ;;  %1207 = vmatmul.mubr.bf16.gmra.mrb[112].mxu0 %v483_v43  ;;  %925 = vmatprep.mubr.bf16.mxu1 %v486_v44  ;;  %v495_v44 = vunpack.c.h.s8.bf16 %v367_v14  ;;  %v604_v45 = vld [vmem:[#allocation3 + $0x40] sm:$0xff] }
 0x172   :  { %1214 = vmatprep.mubr.bf16.mxu0 %v488_v3 }
 0x173   :  { %1370 = vst [vmem:[#allocation3 + $0x10] sm:$0xff] %v1306_v2  ;;  %v1307_v53 = vadd.f32 %v1243_v51, %v599_v1  ;;  %v711_v54 = vpop.f32.mrb[8].mxu1 }
 0x174   :  { %v1000_v56 = vpop.f32.mrb[8].mxu0  ;;  %v713_v57 = vpop.f32.mrb[9].mxu1 }
 0x175   :  { %1371 = vst [vmem:[#allocation3 + $0x18] sm:$0xff] %v1307_v53  ;;  %v1001_v59 = vadd.f32 %v1000_v56, %v711_v54  ;;  %v1002_v60 = vpop.f32.mrb[9].mxu0  ;;  %v714_v61 = vpop.f32.mrb[10].mxu1 }
 0x176   :  { %v1003_v4 = vpop.f32.mrb[10].mxu0  ;;  %v716_v5 = vpop.f32.mrb[11].mxu1 }
 0x177   :  { %v1244_v7 = vmul.f32 %v2495_v15, %v1001_v59  ;;  %v1004_v8 = vadd.f32 %v1003_v4, %v714_v61  ;;  %v1005_v9 = vpop.f32.mrb[11].mxu0 }
 0x178   :  { %926 = vmatmul.mubr.bf16.gmra.mrb[116].mxu1 %v485_v58  ;;  %v606_v58 = vld [vmem:[#allocation3 + $0x50] sm:$0xff] }
 0x179   :  { %v1308_v11 = vadd.f32 %v1244_v7, %v600_v0  ;;  %v1245_v12 = vmul.f32 %v2495_v15, %v1004_v8  ;;  %1215 = vmatmul.mubr.bf16.gmra.mrb[116].mxu0 %v487_v62  ;;  %933 = vmatprep.mubr.bf16.mxu1 %v490_v63  ;;  %v607_v0 = vld [vmem:[#allocation3 + $0x58] sm:$0xff] }
 0x17a   :  { %1222 = vmatprep.mubr.bf16.mxu0 %v492_v6 }
 0x17b   :  { %1372 = vst [vmem:[#allocation3 + $0x20] sm:$0xff] %v1308_v11  ;;  %v1309_v16 = vadd.f32 %v1245_v12, %v601_v10  ;;  %v719_v17 = vpop.f32.mrb[12].mxu1 }
 0x17c   :  { %v1008_v18 = vpop.f32.mrb[12].mxu0  ;;  %v721_v19 = vpop.f32.mrb[13].mxu1 }
 0x17d   :  { %1373 = vst [vmem:[#allocation3 + $0x28] sm:$0xff] %v1309_v16  ;;  %v1009_v21 = vadd.f32 %v1008_v18, %v719_v17  ;;  %v1010_v22 = vpop.f32.mrb[13].mxu0  ;;  %v722_v23 = vpop.f32.mrb[14].mxu1 }
 0x17e   :  { %v1011_v27 = vpop.f32.mrb[14].mxu0  ;;  %v724_v28 = vpop.f32.mrb[15].mxu1 }
 0x17f   :  { %v1246_v30 = vmul.f32 %v2495_v15, %v1009_v21  ;;  %v1012_v31 = vadd.f32 %v1011_v27, %v722_v23  ;;  %v1013_v32 = vpop.f32.mrb[15].mxu0 }
 0x180   :  { %934 = vmatmul.mubr.bf16.gmra.mrb[120].mxu1 %v489_v20  ;;  %v609_v20 = vld [vmem:[#allocation3 + $0x68] sm:$0xff] }
 0x181   :  { %v1310_v34 = vadd.f32 %v1246_v30, %v602_v26  ;;  %v1247_v35 = vmul.f32 %v2495_v15, %v1012_v31  ;;  %1223 = vmatmul.mubr.bf16.gmra.mrb[120].mxu0 %v491_v24  ;;  %941 = vmatprep.mubr.bf16.mxu1 %v494_v25  ;;  %v610_v30 = vld [vmem:[#allocation3 + $0x70] sm:$0xff] }
 0x182   :  { %1230 = vmatprep.mubr.bf16.mxu0 %v496_v29 }
 0x183   :  { %1374 = vst [vmem:[#allocation3 + $0x30] sm:$0xff] %v1310_v34  ;;  %v1311_v36 = vadd.f32 %v1247_v35, %v603_v33  ;;  %v727_v37 = vpop.f32.mrb[16].mxu1 }
 0x184   :  { %v1016_v38 = vpop.f32.mrb[16].mxu0  ;;  %v729_v39 = vpop.f32.mrb[17].mxu1 }
 0x185   :  { %1375 = vst [vmem:[#allocation3 + $0x38] sm:$0xff] %v1311_v36  ;;  %v1017_v41 = vadd.f32 %v1016_v38, %v727_v37  ;;  %v1018_v42 = vpop.f32.mrb[17].mxu0  ;;  %v730_v43 = vpop.f32.mrb[18].mxu1  ;;  %v611_v36 = vld [vmem:[#allocation3 + $0x78] sm:$0xff] }
 0x186   :  { %v1019_v46 = vpop.f32.mrb[18].mxu0  ;;  %v732_v47 = vpop.f32.mrb[19].mxu1 }
 0x187   :  { %v1248_v3 = vmul.f32 %v2495_v15, %v1017_v41  ;;  %v1020_v48 = vadd.f32 %v1019_v46, %v730_v43  ;;  %v1021_v49 = vpop.f32.mrb[19].mxu0  ;;  %v612_v46 = vld [vmem:[#allocation3 + $0x80] sm:$0xff] }
 0x188   :  { %942 = vmatmul.mubr.bf16.gmra.mrb[124].mxu1 %v493_v40 }
 0x189   :  { %v1312_v1 = vadd.f32 %v1248_v3, %v604_v45  ;;  %v1249_v2 = vmul.f32 %v2495_v15, %v1020_v48  ;;  %1231 = vmatmul.mubr.bf16.gmra.mrb[124].mxu0 %v495_v44 }
 0x18b   :  { %1376 = vst [vmem:[#allocation3 + $0x40] sm:$0xff] %v1312_v1  ;;  %v1313_v51 = vadd.f32 %v1249_v2, %v605_v50  ;;  %v735_v52 = vpop.f32.mrb[20].mxu1  ;;  %v613_v1 = vld [vmem:[#allocation3 + $0x88] sm:$0xff] }
 0x18c   :  { %v1024_v53 = vpop.f32.mrb[20].mxu0  ;;  %v737_v54 = vpop.f32.mrb[21].mxu1 }
 0x18d   :  { %1377 = vst [vmem:[#allocation3 + $0x48] sm:$0xff] %v1313_v51  ;;  %v1025_v55 = vadd.f32 %v1024_v53, %v735_v52  ;;  %v1026_v56 = vpop.f32.mrb[21].mxu0  ;;  %v738_v57 = vpop.f32.mrb[22].mxu1 }
 0x18e   :  { %v1027_v59 = vpop.f32.mrb[22].mxu0  ;;  %v740_v60 = vpop.f32.mrb[23].mxu1 }
 0x18f   :  { %v1250_v61 = vmul.f32 %v2495_v15, %v1025_v55  ;;  %v1028_v62 = vadd.f32 %v1027_v59, %v738_v57  ;;  %v1029_v63 = vpop.f32.mrb[23].mxu0  ;;  %v614_v59 = vld [vmem:[#allocation3 + $0x90] sm:$0xff] }
 0x191   :  { %v1314_v4 = vadd.f32 %v1250_v61, %v606_v58  ;;  %v1251_v5 = vmul.f32 %v2495_v15, %v1028_v62 }
 0x193   :  { %1378 = vst [vmem:[#allocation3 + $0x50] sm:$0xff] %v1314_v4  ;;  %v1315_v6 = vadd.f32 %v1251_v5, %v607_v0  ;;  %v743_v7 = vpop.f32.mrb[24].mxu1  ;;  %v615_v4 = vld [vmem:[#allocation3 + $0x98] sm:$0xff] }
 0x194   :  { %v1032_v8 = vpop.f32.mrb[24].mxu0  ;;  %v745_v9 = vpop.f32.mrb[25].mxu1 }
 0x195   :  { %1379 = vst [vmem:[#allocation3 + $0x58] sm:$0xff] %v1315_v6  ;;  %v1033_v10 = vadd.f32 %v1032_v8, %v743_v7  ;;  %v1034_v11 = vpop.f32.mrb[25].mxu0  ;;  %v746_v12 = vpop.f32.mrb[26].mxu1 }
 0x196   :  { %v1035_v14 = vpop.f32.mrb[26].mxu0  ;;  %v748_v16 = vpop.f32.mrb[27].mxu1 }
 0x197   :  { %v1252_v17 = vmul.f32 %v2495_v15, %v1033_v10  ;;  %v1036_v18 = vadd.f32 %v1035_v14, %v746_v12  ;;  %v1037_v19 = vpop.f32.mrb[27].mxu0  ;;  %v616_v14 = vld [vmem:[#allocation3 + $0xa0] sm:$0xff] }
 0x199   :  { %v1316_v21 = vadd.f32 %v1252_v17, %v608_v13  ;;  %v1253_v22 = vmul.f32 %v2495_v15, %v1036_v18 }
 0x19b   :  { %1380 = vst [vmem:[#allocation3 + $0x60] sm:$0xff] %v1316_v21  ;;  %v1317_v23 = vadd.f32 %v1253_v22, %v609_v20  ;;  %v751_v24 = vpop.f32.mrb[28].mxu1  ;;  %v617_v21 = vld [vmem:[#allocation3 + $0xa8] sm:$0xff] }
 0x19c   :  { %v1040_v25 = vpop.f32.mrb[28].mxu0  ;;  %v753_v26 = vpop.f32.mrb[29].mxu1 }
 0x19d   :  { %1381 = vst [vmem:[#allocation3 + $0x68] sm:$0xff] %v1317_v23  ;;  %v1041_v27 = vadd.f32 %v1040_v25, %v751_v24  ;;  %v1042_v28 = vpop.f32.mrb[29].mxu0  ;;  %v754_v29 = vpop.f32.mrb[30].mxu1 }
 0x19e   :  { %v1043_v31 = vpop.f32.mrb[30].mxu0  ;;  %v756_v32 = vpop.f32.mrb[31].mxu1 }
 0x19f   :  { %v1254_v33 = vmul.f32 %v2495_v15, %v1041_v27  ;;  %v1044_v34 = vadd.f32 %v1043_v31, %v754_v29  ;;  %v1045_v35 = vpop.f32.mrb[31].mxu0  ;;  %v618_v31 = vld [vmem:[#allocation3 + $0xb0] sm:$0xff] }
 0x1a1   :  { %v1318_v37 = vadd.f32 %v1254_v33, %v610_v30  ;;  %v1255_v38 = vmul.f32 %v2495_v15, %v1044_v34 }
 0x1a3   :  { %1382 = vst [vmem:[#allocation3 + $0x70] sm:$0xff] %v1318_v37  ;;  %v1319_v39 = vadd.f32 %v1255_v38, %v611_v36  ;;  %v759_v40 = vpop.f32.mrb[32].mxu1  ;;  %v619_v37 = vld [vmem:[#allocation3 + $0xb8] sm:$0xff] }
 0x1a4   :  { %v1048_v41 = vpop.f32.mrb[32].mxu0  ;;  %v761_v42 = vpop.f32.mrb[33].mxu1 }
 0x1a5   :  { %1383 = vst [vmem:[#allocation3 + $0x78] sm:$0xff] %v1319_v39  ;;  %v1049_v43 = vadd.f32 %v1048_v41, %v759_v40  ;;  %v1050_v44 = vpop.f32.mrb[33].mxu0  ;;  %v762_v45 = vpop.f32.mrb[34].mxu1 }
 0x1a6   :  { %v1051_v47 = vpop.f32.mrb[34].mxu0  ;;  %v764_v3 = vpop.f32.mrb[35].mxu1 }
 0x1a7   :  { %v1256_v48 = vmul.f32 %v2495_v15, %v1049_v43  ;;  %v1052_v49 = vadd.f32 %v1051_v47, %v762_v45  ;;  %v1053_v50 = vpop.f32.mrb[35].mxu0  ;;  %v620_v47 = vld [vmem:[#allocation3 + $0xc0] sm:$0xff] }
 0x1a9   :  { %v1320_v2 = vadd.f32 %v1256_v48, %v612_v46  ;;  %v1257_v51 = vmul.f32 %v2495_v15, %v1052_v49 }
 0x1ab   :  { %1384 = vst [vmem:[#allocation3 + $0x80] sm:$0xff] %v1320_v2  ;;  %v1321_v52 = vadd.f32 %v1257_v51, %v613_v1  ;;  %v767_v53 = vpop.f32.mrb[36].mxu1  ;;  %v621_v2 = vld [vmem:[#allocation3 + $0xc8] sm:$0xff] }
 0x1ac   :  { %v1056_v54 = vpop.f32.mrb[36].mxu0  ;;  %v769_v55 = vpop.f32.mrb[37].mxu1 }
 0x1ad   :  { %1385 = vst [vmem:[#allocation3 + $0x88] sm:$0xff] %v1321_v52  ;;  %v1057_v56 = vadd.f32 %v1056_v54, %v767_v53  ;;  %v1058_v57 = vpop.f32.mrb[37].mxu0  ;;  %v770_v58 = vpop.f32.mrb[38].mxu1 }
 0x1ae   :  { %v1059_v60 = vpop.f32.mrb[38].mxu0  ;;  %v772_v61 = vpop.f32.mrb[39].mxu1 }
 0x1af   :  { %v1258_v62 = vmul.f32 %v2495_v15, %v1057_v56  ;;  %v1060_v63 = vadd.f32 %v1059_v60, %v770_v58  ;;  %v1061_v0 = vpop.f32.mrb[39].mxu0  ;;  %v622_v60 = vld [vmem:[#allocation3 + $0xd0] sm:$0xff] }
 0x1b1   :  { %v1322_v5 = vadd.f32 %v1258_v62, %v614_v59  ;;  %v1259_v6 = vmul.f32 %v2495_v15, %v1060_v63 }
 0x1b3   :  { %1386 = vst [vmem:[#allocation3 + $0x90] sm:$0xff] %v1322_v5  ;;  %v1323_v7 = vadd.f32 %v1259_v6, %v615_v4  ;;  %v775_v8 = vpop.f32.mrb[40].mxu1  ;;  %v623_v5 = vld [vmem:[#allocation3 + $0xd8] sm:$0xff] }
 0x1b4   :  { %v1064_v9 = vpop.f32.mrb[40].mxu0  ;;  %v777_v10 = vpop.f32.mrb[41].mxu1 }
 0x1b5   :  { %1387 = vst [vmem:[#allocation3 + $0x98] sm:$0xff] %v1323_v7  ;;  %v1065_v11 = vadd.f32 %v1064_v9, %v775_v8  ;;  %v1066_v12 = vpop.f32.mrb[41].mxu0  ;;  %v778_v13 = vpop.f32.mrb[42].mxu1 }
 0x1b6   :  { %v1067_v16 = vpop.f32.mrb[42].mxu0  ;;  %v780_v17 = vpop.f32.mrb[43].mxu1 }
 0x1b7   :  { %v1260_v18 = vmul.f32 %v2495_v15, %v1065_v11  ;;  %v1068_v19 = vadd.f32 %v1067_v16, %v778_v13  ;;  %v1069_v20 = vpop.f32.mrb[43].mxu0  ;;  %v624_v16 = vld [vmem:[#allocation3 + $0xe0] sm:$0xff] }
 0x1b9   :  { %v1324_v22 = vadd.f32 %v1260_v18, %v616_v14  ;;  %v1261_v23 = vmul.f32 %v2495_v15, %v1068_v19 }
 0x1bb   :  { %1388 = vst [vmem:[#allocation3 + $0xa0] sm:$0xff] %v1324_v22  ;;  %v1325_v24 = vadd.f32 %v1261_v23, %v617_v21  ;;  %v783_v25 = vpop.f32.mrb[44].mxu1  ;;  %v625_v22 = vld [vmem:[#allocation3 + $0xe8] sm:$0xff] }
 0x1bc   :  { %v1072_v26 = vpop.f32.mrb[44].mxu0  ;;  %v785_v27 = vpop.f32.mrb[45].mxu1 }
 0x1bd   :  { %1389 = vst [vmem:[#allocation3 + $0xa8] sm:$0xff] %v1325_v24  ;;  %v1073_v28 = vadd.f32 %v1072_v26, %v783_v25  ;;  %v1074_v29 = vpop.f32.mrb[45].mxu0  ;;  %v786_v30 = vpop.f32.mrb[46].mxu1 }
 0x1be   :  { %v1075_v32 = vpop.f32.mrb[46].mxu0  ;;  %v788_v33 = vpop.f32.mrb[47].mxu1 }
 0x1bf   :  { %v1262_v34 = vmul.f32 %v2495_v15, %v1073_v28  ;;  %v1076_v35 = vadd.f32 %v1075_v32, %v786_v30  ;;  %v1077_v36 = vpop.f32.mrb[47].mxu0  ;;  %v626_v32 = vld [vmem:[#allocation3 + $0xf0] sm:$0xff] }
 0x1c1   :  { %v1326_v38 = vadd.f32 %v1262_v34, %v618_v31  ;;  %v1263_v39 = vmul.f32 %v2495_v15, %v1076_v35 }
 0x1c3   :  { %1390 = vst [vmem:[#allocation3 + $0xb0] sm:$0xff] %v1326_v38  ;;  %v1327_v40 = vadd.f32 %v1263_v39, %v619_v37  ;;  %v791_v41 = vpop.f32.mrb[48].mxu1  ;;  %v627_v38 = vld [vmem:[#allocation3 + $0xf8] sm:$0xff] }
 0x1c4   :  { %v1080_v42 = vpop.f32.mrb[48].mxu0  ;;  %v793_v43 = vpop.f32.mrb[49].mxu1 }
 0x1c5   :  { %1391 = vst [vmem:[#allocation3 + $0xb8] sm:$0xff] %v1327_v40  ;;  %v1081_v44 = vadd.f32 %v1080_v42, %v791_v41  ;;  %v1082_v45 = vpop.f32.mrb[49].mxu0  ;;  %v794_v46 = vpop.f32.mrb[50].mxu1 }
 0x1c6   :  { %v1083_v3 = vpop.f32.mrb[50].mxu0  ;;  %v796_v48 = vpop.f32.mrb[51].mxu1 }
 0x1c7   :  { %v1264_v49 = vmul.f32 %v2495_v15, %v1081_v44  ;;  %v1084_v50 = vadd.f32 %v1083_v3, %v794_v46  ;;  %v1085_v1 = vpop.f32.mrb[51].mxu0  ;;  %v628_v3 = vld [vmem:[#allocation3 + $0x100] sm:$0xff] }
 0x1c9   :  { %v1328_v51 = vadd.f32 %v1264_v49, %v620_v47  ;;  %v1265_v52 = vmul.f32 %v2495_v15, %v1084_v50 }
 0x1cb   :  { %1392 = vst [vmem:[#allocation3 + $0xc0] sm:$0xff] %v1328_v51  ;;  %v1329_v53 = vadd.f32 %v1265_v52, %v621_v2  ;;  %v799_v54 = vpop.f32.mrb[52].mxu1  ;;  %v629_v51 = vld [vmem:[#allocation3 + $0x108] sm:$0xff] }
 0x1cc   :  { %v1088_v55 = vpop.f32.mrb[52].mxu0  ;;  %v801_v56 = vpop.f32.mrb[53].mxu1 }
 0x1cd   :  { %1393 = vst [vmem:[#allocation3 + $0xc8] sm:$0xff] %v1329_v53  ;;  %v1089_v57 = vadd.f32 %v1088_v55, %v799_v54  ;;  %v1090_v58 = vpop.f32.mrb[53].mxu0  ;;  %v802_v59 = vpop.f32.mrb[54].mxu1 }
 0x1ce   :  { %v1091_v61 = vpop.f32.mrb[54].mxu0  ;;  %v804_v62 = vpop.f32.mrb[55].mxu1 }
 0x1cf   :  { %v1266_v63 = vmul.f32 %v2495_v15, %v1089_v57  ;;  %v1092_v0 = vadd.f32 %v1091_v61, %v802_v59  ;;  %v1093_v4 = vpop.f32.mrb[55].mxu0  ;;  %v630_v61 = vld [vmem:[#allocation3 + $0x110] sm:$0xff] }
 0x1d1   :  { %v1330_v6 = vadd.f32 %v1266_v63, %v622_v60  ;;  %v1267_v7 = vmul.f32 %v2495_v15, %v1092_v0 }
 0x1d3   :  { %1394 = vst [vmem:[#allocation3 + $0xd0] sm:$0xff] %v1330_v6  ;;  %v1331_v8 = vadd.f32 %v1267_v7, %v623_v5  ;;  %v807_v9 = vpop.f32.mrb[56].mxu1  ;;  %v631_v6 = vld [vmem:[#allocation3 + $0x118] sm:$0xff] }
 0x1d4   :  { %v1096_v10 = vpop.f32.mrb[56].mxu0  ;;  %v809_v11 = vpop.f32.mrb[57].mxu1 }
 0x1d5   :  { %1395 = vst [vmem:[#allocation3 + $0xd8] sm:$0xff] %v1331_v8  ;;  %v1097_v12 = vadd.f32 %v1096_v10, %v807_v9  ;;  %v1098_v13 = vpop.f32.mrb[57].mxu0  ;;  %v810_v14 = vpop.f32.mrb[58].mxu1 }
 0x1d6   :  { %v1099_v17 = vpop.f32.mrb[58].mxu0  ;;  %v812_v18 = vpop.f32.mrb[59].mxu1 }
 0x1d7   :  { %v1268_v19 = vmul.f32 %v2495_v15, %v1097_v12  ;;  %v1100_v20 = vadd.f32 %v1099_v17, %v810_v14  ;;  %v1101_v21 = vpop.f32.mrb[59].mxu0  ;;  %v632_v17 = vld [vmem:[#allocation3 + $0x120] sm:$0xff] }
 0x1d9   :  { %v1332_v23 = vadd.f32 %v1268_v19, %v624_v16  ;;  %v1269_v24 = vmul.f32 %v2495_v15, %v1100_v20 }
 0x1db   :  { %1396 = vst [vmem:[#allocation3 + $0xe0] sm:$0xff] %v1332_v23  ;;  %v1333_v25 = vadd.f32 %v1269_v24, %v625_v22  ;;  %v815_v26 = vpop.f32.mrb[60].mxu1  ;;  %v633_v23 = vld [vmem:[#allocation3 + $0x128] sm:$0xff] }
 0x1dc   :  { %v1104_v27 = vpop.f32.mrb[60].mxu0  ;;  %v817_v28 = vpop.f32.mrb[61].mxu1 }
 0x1dd   :  { %1397 = vst [vmem:[#allocation3 + $0xe8] sm:$0xff] %v1333_v25  ;;  %v1105_v29 = vadd.f32 %v1104_v27, %v815_v26  ;;  %v1106_v30 = vpop.f32.mrb[61].mxu0  ;;  %v818_v31 = vpop.f32.mrb[62].mxu1 }
 0x1de   :  { %v1107_v33 = vpop.f32.mrb[62].mxu0  ;;  %v820_v34 = vpop.f32.mrb[63].mxu1 }
 0x1df   :  { %v1270_v35 = vmul.f32 %v2495_v15, %v1105_v29  ;;  %v1108_v36 = vadd.f32 %v1107_v33, %v818_v31  ;;  %v1109_v37 = vpop.f32.mrb[63].mxu0  ;;  %v634_v33 = vld [vmem:[#allocation3 + $0x130] sm:$0xff] }
 0x1e1   :  { %v1334_v39 = vadd.f32 %v1270_v35, %v626_v32  ;;  %v1271_v40 = vmul.f32 %v2495_v15, %v1108_v36 }
 0x1e3   :  { %1398 = vst [vmem:[#allocation3 + $0xf0] sm:$0xff] %v1334_v39  ;;  %v1335_v41 = vadd.f32 %v1271_v40, %v627_v38  ;;  %v823_v42 = vpop.f32.mrb[64].mxu1  ;;  %v635_v39 = vld [vmem:[#allocation3 + $0x138] sm:$0xff] }
 0x1e4   :  { %v1112_v43 = vpop.f32.mrb[64].mxu0  ;;  %v825_v44 = vpop.f32.mrb[65].mxu1 }
 0x1e5   :  { %1399 = vst [vmem:[#allocation3 + $0xf8] sm:$0xff] %v1335_v41  ;;  %v1113_v45 = vadd.f32 %v1112_v43, %v823_v42  ;;  %v1114_v46 = vpop.f32.mrb[65].mxu0  ;;  %v826_v47 = vpop.f32.mrb[66].mxu1 }
 0x1e6   :  { %v1115_v48 = vpop.f32.mrb[66].mxu0  ;;  %v828_v49 = vpop.f32.mrb[67].mxu1 }
 0x1e7   :  { %v1272_v50 = vmul.f32 %v2495_v15, %v1113_v45  ;;  %v1116_v1 = vadd.f32 %v1115_v48, %v826_v47  ;;  %v1117_v2 = vpop.f32.mrb[67].mxu0  ;;  %v636_v48 = vld [vmem:[#allocation3 + $0x140] sm:$0xff] }
 0x1e9   :  { %v1336_v52 = vadd.f32 %v1272_v50, %v628_v3  ;;  %v1273_v53 = vmul.f32 %v2495_v15, %v1116_v1 }
 0x1eb   :  { %1400 = vst [vmem:[#allocation3 + $0x100] sm:$0xff] %v1336_v52  ;;  %v1337_v54 = vadd.f32 %v1273_v53, %v629_v51  ;;  %v831_v55 = vpop.f32.mrb[68].mxu1  ;;  %v637_v52 = vld [vmem:[#allocation3 + $0x148] sm:$0xff] }
 0x1ec   :  { %v1120_v56 = vpop.f32.mrb[68].mxu0  ;;  %v833_v57 = vpop.f32.mrb[69].mxu1 }
 0x1ed   :  { %1401 = vst [vmem:[#allocation3 + $0x108] sm:$0xff] %v1337_v54  ;;  %v1121_v58 = vadd.f32 %v1120_v56, %v831_v55  ;;  %v1122_v59 = vpop.f32.mrb[69].mxu0  ;;  %v834_v60 = vpop.f32.mrb[70].mxu1 }
 0x1ee   :  { %v1123_v62 = vpop.f32.mrb[70].mxu0  ;;  %v836_v63 = vpop.f32.mrb[71].mxu1 }
 0x1ef   :  { %v1274_v0 = vmul.f32 %v2495_v15, %v1121_v58  ;;  %v1124_v4 = vadd.f32 %v1123_v62, %v834_v60  ;;  %v1125_v5 = vpop.f32.mrb[71].mxu0  ;;  %v638_v62 = vld [vmem:[#allocation3 + $0x150] sm:$0xff] }
 0x1f1   :  { %v1338_v7 = vadd.f32 %v1274_v0, %v630_v61  ;;  %v1275_v8 = vmul.f32 %v2495_v15, %v1124_v4 }
 0x1f3   :  { %1402 = vst [vmem:[#allocation3 + $0x110] sm:$0xff] %v1338_v7  ;;  %v1339_v9 = vadd.f32 %v1275_v8, %v631_v6  ;;  %v839_v10 = vpop.f32.mrb[72].mxu1  ;;  %v639_v7 = vld [vmem:[#allocation3 + $0x158] sm:$0xff] }
 0x1f4   :  { %v1128_v11 = vpop.f32.mrb[72].mxu0  ;;  %v841_v12 = vpop.f32.mrb[73].mxu1 }
 0x1f5   :  { %1403 = vst [vmem:[#allocation3 + $0x118] sm:$0xff] %v1339_v9  ;;  %v1129_v13 = vadd.f32 %v1128_v11, %v839_v10  ;;  %v1130_v14 = vpop.f32.mrb[73].mxu0  ;;  %v842_v16 = vpop.f32.mrb[74].mxu1 }
 0x1f6   :  { %v1131_v18 = vpop.f32.mrb[74].mxu0  ;;  %v844_v19 = vpop.f32.mrb[75].mxu1 }
 0x1f7   :  { %v1276_v20 = vmul.f32 %v2495_v15, %v1129_v13  ;;  %v1132_v21 = vadd.f32 %v1131_v18, %v842_v16  ;;  %v1133_v22 = vpop.f32.mrb[75].mxu0  ;;  %v640_v18 = vld [vmem:[#allocation3 + $0x160] sm:$0xff] }
 0x1f9   :  { %v1340_v24 = vadd.f32 %v1276_v20, %v632_v17  ;;  %v1277_v25 = vmul.f32 %v2495_v15, %v1132_v21 }
 0x1fb   :  { %1404 = vst [vmem:[#allocation3 + $0x120] sm:$0xff] %v1340_v24  ;;  %v1341_v26 = vadd.f32 %v1277_v25, %v633_v23  ;;  %v847_v27 = vpop.f32.mrb[76].mxu1  ;;  %v641_v24 = vld [vmem:[#allocation3 + $0x168] sm:$0xff] }
 0x1fc   :  { %v1136_v28 = vpop.f32.mrb[76].mxu0  ;;  %v849_v29 = vpop.f32.mrb[77].mxu1 }
 0x1fd   :  { %1405 = vst [vmem:[#allocation3 + $0x128] sm:$0xff] %v1341_v26  ;;  %v1137_v30 = vadd.f32 %v1136_v28, %v847_v27  ;;  %v1138_v31 = vpop.f32.mrb[77].mxu0  ;;  %v850_v32 = vpop.f32.mrb[78].mxu1 }
 0x1fe   :  { %v1139_v34 = vpop.f32.mrb[78].mxu0  ;;  %v852_v35 = vpop.f32.mrb[79].mxu1 }
 0x1ff   :  { %v1278_v36 = vmul.f32 %v2495_v15, %v1137_v30  ;;  %v1140_v37 = vadd.f32 %v1139_v34, %v850_v32  ;;  %v1141_v38 = vpop.f32.mrb[79].mxu0  ;;  %v642_v34 = vld [vmem:[#allocation3 + $0x170] sm:$0xff] }
 0x201   :  { %v1342_v40 = vadd.f32 %v1278_v36, %v634_v33  ;;  %v1279_v41 = vmul.f32 %v2495_v15, %v1140_v37 }
 0x203   :  { %1406 = vst [vmem:[#allocation3 + $0x130] sm:$0xff] %v1342_v40  ;;  %v1343_v42 = vadd.f32 %v1279_v41, %v635_v39  ;;  %v855_v43 = vpop.f32.mrb[80].mxu1  ;;  %v643_v40 = vld [vmem:[#allocation3 + $0x178] sm:$0xff] }
 0x204   :  { %v1144_v44 = vpop.f32.mrb[80].mxu0  ;;  %v857_v45 = vpop.f32.mrb[81].mxu1 }
 0x205   :  { %1407 = vst [vmem:[#allocation3 + $0x138] sm:$0xff] %v1343_v42  ;;  %v1145_v46 = vadd.f32 %v1144_v44, %v855_v43  ;;  %v1146_v47 = vpop.f32.mrb[81].mxu0  ;;  %v858_v3 = vpop.f32.mrb[82].mxu1 }
 0x206   :  { %v1147_v49 = vpop.f32.mrb[82].mxu0  ;;  %v860_v50 = vpop.f32.mrb[83].mxu1 }
 0x207   :  { %v1280_v1 = vmul.f32 %v2495_v15, %v1145_v46  ;;  %v1148_v2 = vadd.f32 %v1147_v49, %v858_v3  ;;  %v1149_v51 = vpop.f32.mrb[83].mxu0  ;;  %v644_v49 = vld [vmem:[#allocation3 + $0x180] sm:$0xff] }
 0x209   :  { %v1344_v53 = vadd.f32 %v1280_v1, %v636_v48  ;;  %v1281_v54 = vmul.f32 %v2495_v15, %v1148_v2 }
 0x20b   :  { %1408 = vst [vmem:[#allocation3 + $0x140] sm:$0xff] %v1344_v53  ;;  %v1345_v55 = vadd.f32 %v1281_v54, %v637_v52  ;;  %v863_v56 = vpop.f32.mrb[84].mxu1  ;;  %v645_v53 = vld [vmem:[#allocation3 + $0x188] sm:$0xff] }
 0x20c   :  { %v1152_v57 = vpop.f32.mrb[84].mxu0  ;;  %v865_v58 = vpop.f32.mrb[85].mxu1 }
 0x20d   :  { %1409 = vst [vmem:[#allocation3 + $0x148] sm:$0xff] %v1345_v55  ;;  %v1153_v59 = vadd.f32 %v1152_v57, %v863_v56  ;;  %v1154_v60 = vpop.f32.mrb[85].mxu0  ;;  %v866_v61 = vpop.f32.mrb[86].mxu1 }
 0x20e   :  { %v1155_v63 = vpop.f32.mrb[86].mxu0  ;;  %v868_v0 = vpop.f32.mrb[87].mxu1 }
 0x20f   :  { %v1282_v4 = vmul.f32 %v2495_v15, %v1153_v59  ;;  %v1156_v5 = vadd.f32 %v1155_v63, %v866_v61  ;;  %v1157_v6 = vpop.f32.mrb[87].mxu0  ;;  %v646_v63 = vld [vmem:[#allocation3 + $0x190] sm:$0xff] }
 0x211   :  { %v1346_v8 = vadd.f32 %v1282_v4, %v638_v62  ;;  %v1283_v9 = vmul.f32 %v2495_v15, %v1156_v5 }
 0x213   :  { %1410 = vst [vmem:[#allocation3 + $0x150] sm:$0xff] %v1346_v8  ;;  %v1347_v10 = vadd.f32 %v1283_v9, %v639_v7  ;;  %v871_v11 = vpop.f32.mrb[88].mxu1  ;;  %v647_v8 = vld [vmem:[#allocation3 + $0x198] sm:$0xff] }
 0x214   :  { %v1160_v12 = vpop.f32.mrb[88].mxu0  ;;  %v873_v13 = vpop.f32.mrb[89].mxu1 }
 0x215   :  { %1411 = vst [vmem:[#allocation3 + $0x158] sm:$0xff] %v1347_v10  ;;  %v1161_v14 = vadd.f32 %v1160_v12, %v871_v11  ;;  %v1162_v16 = vpop.f32.mrb[89].mxu0  ;;  %v874_v17 = vpop.f32.mrb[90].mxu1 }
 0x216   :  { %v1163_v19 = vpop.f32.mrb[90].mxu0  ;;  %v876_v20 = vpop.f32.mrb[91].mxu1 }
 0x217   :  { %v1284_v21 = vmul.f32 %v2495_v15, %v1161_v14  ;;  %v1164_v22 = vadd.f32 %v1163_v19, %v874_v17  ;;  %v1165_v23 = vpop.f32.mrb[91].mxu0  ;;  %v648_v19 = vld [vmem:[#allocation3 + $0x1a0] sm:$0xff] }
 0x219   :  { %v1348_v25 = vadd.f32 %v1284_v21, %v640_v18  ;;  %v1285_v26 = vmul.f32 %v2495_v15, %v1164_v22 }
 0x21b   :  { %1412 = vst [vmem:[#allocation3 + $0x160] sm:$0xff] %v1348_v25  ;;  %v1349_v27 = vadd.f32 %v1285_v26, %v641_v24  ;;  %v879_v28 = vpop.f32.mrb[92].mxu1  ;;  %v649_v25 = vld [vmem:[#allocation3 + $0x1a8] sm:$0xff] }
 0x21c   :  { %v1168_v29 = vpop.f32.mrb[92].mxu0  ;;  %v881_v30 = vpop.f32.mrb[93].mxu1 }
 0x21d   :  { %1413 = vst [vmem:[#allocation3 + $0x168] sm:$0xff] %v1349_v27  ;;  %v1169_v31 = vadd.f32 %v1168_v29, %v879_v28  ;;  %v1170_v32 = vpop.f32.mrb[93].mxu0  ;;  %v882_v33 = vpop.f32.mrb[94].mxu1 }
 0x21e   :  { %v1171_v35 = vpop.f32.mrb[94].mxu0  ;;  %v884_v36 = vpop.f32.mrb[95].mxu1 }
 0x21f   :  { %v1286_v37 = vmul.f32 %v2495_v15, %v1169_v31  ;;  %v1172_v38 = vadd.f32 %v1171_v35, %v882_v33  ;;  %v1173_v39 = vpop.f32.mrb[95].mxu0  ;;  %v650_v35 = vld [vmem:[#allocation3 + $0x1b0] sm:$0xff] }
 0x221   :  { %v1350_v41 = vadd.f32 %v1286_v37, %v642_v34  ;;  %v1287_v42 = vmul.f32 %v2495_v15, %v1172_v38 }
 0x223   :  { %1414 = vst [vmem:[#allocation3 + $0x170] sm:$0xff] %v1350_v41  ;;  %v1351_v43 = vadd.f32 %v1287_v42, %v643_v40  ;;  %v887_v44 = vpop.f32.mrb[96].mxu1  ;;  %v651_v41 = vld [vmem:[#allocation3 + $0x1b8] sm:$0xff] }
 0x224   :  { %v1176_v45 = vpop.f32.mrb[96].mxu0  ;;  %v889_v46 = vpop.f32.mrb[97].mxu1 }
 0x225   :  { %1415 = vst [vmem:[#allocation3 + $0x178] sm:$0xff] %v1351_v43  ;;  %v1177_v47 = vadd.f32 %v1176_v45, %v887_v44  ;;  %v1178_v3 = vpop.f32.mrb[97].mxu0  ;;  %v890_v48 = vpop.f32.mrb[98].mxu1 }
 0x226   :  { %v1179_v50 = vpop.f32.mrb[98].mxu0  ;;  %v892_v1 = vpop.f32.mrb[99].mxu1 }
 0x227   :  { %v1288_v2 = vmul.f32 %v2495_v15, %v1177_v47  ;;  %v1180_v51 = vadd.f32 %v1179_v50, %v890_v48  ;;  %v1181_v52 = vpop.f32.mrb[99].mxu0  ;;  %v652_v50 = vld [vmem:[#allocation3 + $0x1c0] sm:$0xff] }
 0x229   :  { %v1352_v54 = vadd.f32 %v1288_v2, %v644_v49  ;;  %v1289_v55 = vmul.f32 %v2495_v15, %v1180_v51 }
 0x22b   :  { %1416 = vst [vmem:[#allocation3 + $0x180] sm:$0xff] %v1352_v54  ;;  %v1353_v56 = vadd.f32 %v1289_v55, %v645_v53  ;;  %v895_v57 = vpop.f32.mrb[100].mxu1  ;;  %v653_v54 = vld [vmem:[#allocation3 + $0x1c8] sm:$0xff] }
 0x22c   :  { %v1184_v58 = vpop.f32.mrb[100].mxu0  ;;  %v897_v59 = vpop.f32.mrb[101].mxu1 }
 0x22d   :  { %1417 = vst [vmem:[#allocation3 + $0x188] sm:$0xff] %v1353_v56  ;;  %v1185_v60 = vadd.f32 %v1184_v58, %v895_v57  ;;  %v1186_v61 = vpop.f32.mrb[101].mxu0  ;;  %v898_v62 = vpop.f32.mrb[102].mxu1 }
 0x22e   :  { %v1187_v0 = vpop.f32.mrb[102].mxu0  ;;  %v900_v4 = vpop.f32.mrb[103].mxu1 }
 0x22f   :  { %v1290_v5 = vmul.f32 %v2495_v15, %v1185_v60  ;;  %v1188_v6 = vadd.f32 %v1187_v0, %v898_v62  ;;  %v1189_v7 = vpop.f32.mrb[103].mxu0  ;;  %v654_v0 = vld [vmem:[#allocation3 + $0x1d0] sm:$0xff] }
 0x231   :  { %v1354_v9 = vadd.f32 %v1290_v5, %v646_v63  ;;  %v1291_v10 = vmul.f32 %v2495_v15, %v1188_v6 }
 0x233   :  { %1418 = vst [vmem:[#allocation3 + $0x190] sm:$0xff] %v1354_v9  ;;  %v1355_v11 = vadd.f32 %v1291_v10, %v647_v8  ;;  %v903_v12 = vpop.f32.mrb[104].mxu1  ;;  %v655_v9 = vld [vmem:[#allocation3 + $0x1d8] sm:$0xff] }
 0x234   :  { %v1192_v13 = vpop.f32.mrb[104].mxu0  ;;  %v905_v14 = vpop.f32.mrb[105].mxu1 }
 0x235   :  { %1419 = vst [vmem:[#allocation3 + $0x198] sm:$0xff] %v1355_v11  ;;  %v1193_v16 = vadd.f32 %v1192_v13, %v903_v12  ;;  %v1194_v17 = vpop.f32.mrb[105].mxu0  ;;  %v906_v18 = vpop.f32.mrb[106].mxu1 }
 0x236   :  { %v1195_v20 = vpop.f32.mrb[106].mxu0  ;;  %v908_v21 = vpop.f32.mrb[107].mxu1 }
 0x237   :  { %v1292_v22 = vmul.f32 %v2495_v15, %v1193_v16  ;;  %v1196_v23 = vadd.f32 %v1195_v20, %v906_v18  ;;  %v1197_v24 = vpop.f32.mrb[107].mxu0  ;;  %v656_v20 = vld [vmem:[#allocation3 + $0x1e0] sm:$0xff] }
 0x239   :  { %v1356_v26 = vadd.f32 %v1292_v22, %v648_v19  ;;  %v1293_v27 = vmul.f32 %v2495_v15, %v1196_v23 }
 0x23b   :  { %1420 = vst [vmem:[#allocation3 + $0x1a0] sm:$0xff] %v1356_v26  ;;  %v1357_v28 = vadd.f32 %v1293_v27, %v649_v25  ;;  %v911_v29 = vpop.f32.mrb[108].mxu1  ;;  %v657_v26 = vld [vmem:[#allocation3 + $0x1e8] sm:$0xff] }
 0x23c   :  { %v1200_v30 = vpop.f32.mrb[108].mxu0  ;;  %v913_v31 = vpop.f32.mrb[109].mxu1 }
 0x23d   :  { %1421 = vst [vmem:[#allocation3 + $0x1a8] sm:$0xff] %v1357_v28  ;;  %v1201_v32 = vadd.f32 %v1200_v30, %v911_v29  ;;  %v1202_v33 = vpop.f32.mrb[109].mxu0  ;;  %v914_v34 = vpop.f32.mrb[110].mxu1 }
 0x23e   :  { %v1203_v36 = vpop.f32.mrb[110].mxu0  ;;  %v916_v37 = vpop.f32.mrb[111].mxu1 }
 0x23f   :  { %v1294_v38 = vmul.f32 %v2495_v15, %v1201_v32  ;;  %v1204_v39 = vadd.f32 %v1203_v36, %v914_v34  ;;  %v1205_v40 = vpop.f32.mrb[111].mxu0  ;;  %v658_v36 = vld [vmem:[#allocation3 + $0x1f0] sm:$0xff] }
 0x241   :  { %v1358_v42 = vadd.f32 %v1294_v38, %v650_v35  ;;  %v1295_v43 = vmul.f32 %v2495_v15, %v1204_v39 }
 0x243   :  { %1422 = vst [vmem:[#allocation3 + $0x1b0] sm:$0xff] %v1358_v42  ;;  %v1359_v44 = vadd.f32 %v1295_v43, %v651_v41  ;;  %v919_v45 = vpop.f32.mrb[112].mxu1  ;;  %v659_v42 = vld [vmem:[#allocation3 + $0x1f8] sm:$0xff] }
 0x244   :  { %v1208_v46 = vpop.f32.mrb[112].mxu0  ;;  %v921_v47 = vpop.f32.mrb[113].mxu1 }
 0x245   :  { %1423 = vst [vmem:[#allocation3 + $0x1b8] sm:$0xff] %v1359_v44  ;;  %v1209_v3 = vadd.f32 %v1208_v46, %v919_v45  ;;  %v1210_v48 = vpop.f32.mrb[113].mxu0  ;;  %v922_v49 = vpop.f32.mrb[114].mxu1  ;;  %v1437_v46 = vld [vmem:[#allocation3] sm:$0xff] (!%p1811_p2) }
 0x246   :  { %v1211_v1 = vpop.f32.mrb[114].mxu0  ;;  %v924_v2 = vpop.f32.mrb[115].mxu1  ;;  %v1501_v47 = vld [vmem:[%s2003_s26] sm:$0xff] (!%p1811_p2) }
 0x247   :  { %v1296_v51 = vmul.f32 %v2495_v15, %v1209_v3  ;;  %v1212_v52 = vadd.f32 %v1211_v1, %v922_v49  ;;  %v1213_v53 = vpop.f32.mrb[115].mxu0  ;;  %v1438_v3 = vld [vmem:[#allocation3 + $0x8] sm:$0xff] (!%p1811_p2)  ;;  %v1565_v48 = vadd.f32 (!%p1811_p2), %v1501_v47, %v1437_v46  ;;  %v1503_v1 = vld [vmem:[%s2003_s26 + $0x10] sm:$0xff] (!%p1811_p2) }
 0x248   :  { %v1502_v49 = vld [vmem:[%s2003_s26 + $0x8] sm:$0xff] (!%p1811_p2)  ;;  %v1441_v53 = vld [vmem:[#allocation3 + $0x20] sm:$0xff] (!%p1811_p2) }
 0x249   :  { %v1360_v55 = vadd.f32 %v1296_v51, %v652_v50  ;;  %v1297_v56 = vmul.f32 %v2495_v15, %v1212_v52  ;;  %v1439_v50 = vld [vmem:[#allocation3 + $0x10] sm:$0xff] (!%p1811_p2)  ;;  %v1440_v51 = vld [vmem:[#allocation3 + $0x18] sm:$0xff] (!%p1811_p2)  ;;  %v1454_v46 = vld [vmem:[#allocation3 + $0x88] sm:$0xff] (!%p1811_p2) }
 0x24a   :  { %v1567_v2 = vadd.f32 (!%p1811_p2), %v1503_v1, %v1439_v50  ;;  %v1504_v52 = vld [vmem:[%s2003_s26 + $0x18] sm:$0xff] (!%p1811_p2)  ;;  %v1519_v50 = vld [vmem:[%s2003_s26 + $0x90] sm:$0xff] (!%p1811_p2) }
 0x24b   :  { %1424 = vst [vmem:[#allocation3 + $0x1c0] sm:$0xff] %v1360_v55  ;;  %v1361_v57 = vadd.f32 %v1297_v56, %v653_v54  ;;  %v927_v58 = vpop.f32.mrb[116].mxu1  ;;  %v1629_v54 = vmul.f32 (!%p1811_p2), 0.33333334, %v1565_v48  ;;  %v1568_v55 = vadd.f32 (!%p1811_p2), %v1504_v52, %v1440_v51  ;;  %v1505_v56 = vld [vmem:[%s2003_s26 + $0x20] sm:$0xff] (!%p1811_p2)  ;;  %v1518_v48 = vld [vmem:[%s2003_s26 + $0x88] sm:$0xff] (!%p1811_p2) }
 0x24c   :  { %v1216_v59 = vpop.f32.mrb[116].mxu0  ;;  %v929_v60 = vpop.f32.mrb[117].mxu1  ;;  %v1456_v51 = vld [vmem:[#allocation3 + $0x98] sm:$0xff] (!%p1811_p2) }
 0x24d   :  { %1425 = vst [vmem:[#allocation3 + $0x1c8] sm:$0xff] %v1361_v57  ;;  %v1217_v61 = vadd.f32 %v1216_v59, %v927_v58  ;;  %v1218_v62 = vpop.f32.mrb[117].mxu0  ;;  %v930_v63 = vpop.f32.mrb[118].mxu1  ;;  %v1442_v57 = vld [vmem:[#allocation3 + $0x28] sm:$0xff] (!%p1811_p2)  ;;  %v1631_v60 = vmul.f32 (!%p1811_p2), 0.33333334, %v1567_v2  ;;  %1693 = vst [vmem:[%s2008_s28] sm:$0xff] (!%p1811_p2), %v1629_v54 }
 0x24e   :  { %v1219_v4 = vpop.f32.mrb[118].mxu0  ;;  %v932_v5 = vpop.f32.mrb[119].mxu1  ;;  %v1506_v58 = vld [vmem:[%s2003_s26 + $0x28] sm:$0xff] (!%p1811_p2)  ;;  %v1520_v52 = vld [vmem:[%s2003_s26 + $0x98] sm:$0xff] (!%p1811_p2) }
 0x24f   :  { %v1298_v6 = vmul.f32 %v2495_v15, %v1217_v61  ;;  %v1220_v7 = vadd.f32 %v1219_v4, %v930_v63  ;;  %v1221_v8 = vpop.f32.mrb[119].mxu0  ;;  %v1569_v61 = vadd.f32 (!%p1811_p2), %v1505_v56, %v1441_v53  ;;  %v1570_v62 = vadd.f32 (!%p1811_p2), %v1506_v58, %v1442_v57  ;;  %v1443_v63 = vld [vmem:[#allocation3 + $0x30] sm:$0xff] (!%p1811_p2)  ;;  %1695 = vst [vmem:[%s2008_s28 + $0x10] sm:$0xff] (!%p1811_p2), %v1631_v60  ;;  %v1457_v53 = vld [vmem:[#allocation3 + $0xa0] sm:$0xff] (!%p1811_p2)  ;;  %v1458_v57 = vld [vmem:[#allocation3 + $0xa8] sm:$0xff] (!%p1811_p2) }
 0x250   :  { %v1632_v4 = vmul.f32 (!%p1811_p2), 0.33333334, %v1568_v55  ;;  %v1445_v8 = vld [vmem:[#allocation3 + $0x40] sm:$0xff] (!%p1811_p2)  ;;  %v1584_v55 = vadd.f32 (!%p1811_p2), %v1520_v52, %v1456_v51  ;;  %v1522_v58 = vld [vmem:[%s2003_s26 + $0xa8] sm:$0xff] (!%p1811_p2)  ;;  %v1472_v51 = vld [vmem:[#allocation3 + $0x118] sm:$0xff] (!%p1811_p2) }
 0x251   :  { %v1362_v10 = vadd.f32 %v1298_v6, %v654_v0  ;;  %v1299_v11 = vmul.f32 %v2495_v15, %v1220_v7  ;;  %v1507_v0 = vld [vmem:[%s2003_s26 + $0x30] sm:$0xff] (!%p1811_p2)  ;;  %v1444_v6 = vld [vmem:[#allocation3 + $0x38] sm:$0xff] (!%p1811_p2)  ;;  %v1521_v56 = vld [vmem:[%s2003_s26 + $0xa0] sm:$0xff] (!%p1811_p2) }
 0x252   :  { %v1571_v5 = vadd.f32 (!%p1811_p2), %v1507_v0, %v1443_v63  ;;  %v1508_v7 = vld [vmem:[%s2003_s26 + $0x38] sm:$0xff] (!%p1811_p2)  ;;  %1696 = vst [vmem:[%s2008_s28 + $0x18] sm:$0xff] (!%p1811_p2), %v1632_v4  ;;  %v1459_v63 = vld [vmem:[#allocation3 + $0xb0] sm:$0xff] (!%p1811_p2)  ;;  %v1648_v4 = vmul.f32 (!%p1811_p2), 0.33333334, %v1584_v55 }
 0x253   :  { %1426 = vst [vmem:[#allocation3 + $0x1d0] sm:$0xff] %v1362_v10  ;;  %v1363_v12 = vadd.f32 %v1299_v11, %v655_v9  ;;  %v935_v13 = vpop.f32.mrb[120].mxu1  ;;  %v1633_v9 = vmul.f32 (!%p1811_p2), 0.33333334, %v1569_v61  ;;  %v1634_v10 = vmul.f32 (!%p1811_p2), 0.33333334, %v1570_v62  ;;  %v1572_v11 = vadd.f32 (!%p1811_p2), %v1508_v7, %v1444_v6 }
 0x254   :  { %v1224_v14 = vpop.f32.mrb[120].mxu0  ;;  %v937_v16 = vpop.f32.mrb[121].mxu1  ;;  %v1585_v61 = vadd.f32 (!%p1811_p2), %v1521_v56, %v1457_v53  ;;  %v1586_v62 = vadd.f32 (!%p1811_p2), %v1522_v58, %v1458_v57  ;;  %v1523_v0 = vld [vmem:[%s2003_s26 + $0xb0] sm:$0xff] (!%p1811_p2)  ;;  %v1460_v6 = vld [vmem:[#allocation3 + $0xb8] sm:$0xff] (!%p1811_p2)  ;;  %1712 = vst [vmem:[%s2008_s28 + $0x98] sm:$0xff] (!%p1811_p2), %v1648_v4  ;;  %v1473_v53 = vld [vmem:[#allocation3 + $0x120] sm:$0xff] (!%p1811_p2) }
 0x255   :  { %1427 = vst [vmem:[#allocation3 + $0x1d8] sm:$0xff] %v1363_v12  ;;  %v1225_v17 = vadd.f32 %v1224_v14, %v935_v13  ;;  %v1226_v18 = vpop.f32.mrb[121].mxu0  ;;  %v938_v19 = vpop.f32.mrb[122].mxu1  ;;  %v1509_v12 = vld [vmem:[%s2003_s26 + $0x40] sm:$0xff] (!%p1811_p2)  ;;  %v1446_v13 = vld [vmem:[#allocation3 + $0x48] sm:$0xff] (!%p1811_p2)  ;;  %1697 = vst [vmem:[%s2008_s28 + $0x20] sm:$0xff] (!%p1811_p2), %v1633_v9 }
 0x256   :  { %v1227_v21 = vpop.f32.mrb[122].mxu0  ;;  %v940_v22 = vpop.f32.mrb[123].mxu1  ;;  %v1635_v14 = vmul.f32 (!%p1811_p2), 0.33333334, %v1571_v5  ;;  %v1573_v16 = vadd.f32 (!%p1811_p2), %v1509_v12, %v1445_v8  ;;  %v1447_v18 = vld [vmem:[#allocation3 + $0x50] sm:$0xff] (!%p1811_p2)  ;;  %1698 = vst [vmem:[%s2008_s28 + $0x28] sm:$0xff] (!%p1811_p2), %v1634_v10  ;;  %v1587_v5 = vadd.f32 (!%p1811_p2), %v1523_v0, %v1459_v63 }
 0x257   :  { %v1300_v23 = vmul.f32 %v2495_v15, %v1225_v17  ;;  %v1228_v24 = vadd.f32 %v1227_v21, %v938_v19  ;;  %v1229_v25 = vpop.f32.mrb[123].mxu0  ;;  %v1510_v17 = vld [vmem:[%s2003_s26 + $0x48] sm:$0xff] (!%p1811_p2)  ;;  %v1511_v19 = vld [vmem:[%s2003_s26 + $0x50] sm:$0xff] (!%p1811_p2)  ;;  %v1524_v7 = vld [vmem:[%s2003_s26 + $0xb8] sm:$0xff] (!%p1811_p2)  ;;  %v1649_v9 = vmul.f32 (!%p1811_p2), 0.33333334, %v1585_v61 }
 0x258   :  { %v1574_v21 = vadd.f32 (!%p1811_p2), %v1510_v17, %v1446_v13  ;;  %v1575_v22 = vadd.f32 (!%p1811_p2), %v1511_v19, %v1447_v18  ;;  %v1449_v25 = vld [vmem:[#allocation3 + $0x60] sm:$0xff] (!%p1811_p2)  ;;  %1699 = vst [vmem:[%s2008_s28 + $0x30] sm:$0xff] (!%p1811_p2), %v1635_v14  ;;  %v1650_v10 = vmul.f32 (!%p1811_p2), 0.33333334, %v1586_v62  ;;  %v1462_v13 = vld [vmem:[#allocation3 + $0xc8] sm:$0xff] (!%p1811_p2)  ;;  %v1463_v18 = vld [vmem:[#allocation3 + $0xd0] sm:$0xff] (!%p1811_p2) }
 0x259   :  { %v1364_v27 = vadd.f32 %v1300_v23, %v656_v20  ;;  %v1301_v28 = vmul.f32 %v2495_v15, %v1228_v24  ;;  %v1636_v20 = vmul.f32 (!%p1811_p2), 0.33333334, %v1572_v11  ;;  %v1448_v23 = vld [vmem:[#allocation3 + $0x58] sm:$0xff] (!%p1811_p2)  ;;  %v1461_v8 = vld [vmem:[#allocation3 + $0xc0] sm:$0xff] (!%p1811_p2)  ;;  %v1588_v11 = vadd.f32 (!%p1811_p2), %v1524_v7, %v1460_v6  ;;  %v1526_v17 = vld [vmem:[%s2003_s26 + $0xc8] sm:$0xff] (!%p1811_p2)  ;;  %1713 = vst [vmem:[%s2008_s28 + $0xa0] sm:$0xff] (!%p1811_p2), %v1649_v9 }
 0x25a   :  { %v1512_v24 = vld [vmem:[%s2003_s26 + $0x58] sm:$0xff] (!%p1811_p2)  ;;  %v1525_v12 = vld [vmem:[%s2003_s26 + $0xc0] sm:$0xff] (!%p1811_p2)  ;;  %v1651_v14 = vmul.f32 (!%p1811_p2), 0.33333334, %v1587_v5  ;;  %v1527_v19 = vld [vmem:[%s2003_s26 + $0xd0] sm:$0xff] (!%p1811_p2)  ;;  %1714 = vst [vmem:[%s2008_s28 + $0xa8] sm:$0xff] (!%p1811_p2), %v1650_v10 }
 0x25b   :  { %1428 = vst [vmem:[#allocation3 + $0x1e0] sm:$0xff] %v1364_v27  ;;  %v1365_v29 = vadd.f32 %v1301_v28, %v657_v26  ;;  %v943_v30 = vpop.f32.mrb[124].mxu1  ;;  %v1637_v26 = vmul.f32 (!%p1811_p2), 0.33333334, %v1573_v16  ;;  %v1576_v27 = vadd.f32 (!%p1811_p2), %v1512_v24, %v1448_v23  ;;  %v1513_v28 = vld [vmem:[%s2003_s26 + $0x60] sm:$0xff] (!%p1811_p2)  ;;  %1700 = vst [vmem:[%s2008_s28 + $0x38] sm:$0xff] (!%p1811_p2), %v1636_v20  ;;  %v1589_v16 = vadd.f32 (!%p1811_p2), %v1525_v12, %v1461_v8 }
 0x25c   :  { %v1232_v31 = vpop.f32.mrb[124].mxu0  ;;  %v945_v32 = vpop.f32.mrb[125].mxu1  ;;  %v1652_v20 = vmul.f32 (!%p1811_p2), 0.33333334, %v1588_v11  ;;  %v1464_v23 = vld [vmem:[#allocation3 + $0xd8] sm:$0xff] (!%p1811_p2)  ;;  %1715 = vst [vmem:[%s2008_s28 + $0xb0] sm:$0xff] (!%p1811_p2), %v1651_v14 }
 0x25d   :  { %1429 = vst [vmem:[#allocation3 + $0x1e8] sm:$0xff] %v1365_v29  ;;  %v1233_v33 = vadd.f32 %v1232_v31, %v943_v30  ;;  %v1234_v34 = vpop.f32.mrb[125].mxu0  ;;  %v946_v35 = vpop.f32.mrb[126].mxu1  ;;  %v1450_v29 = vld [vmem:[#allocation3 + $0x68] sm:$0xff] (!%p1811_p2)  ;;  %v1638_v31 = vmul.f32 (!%p1811_p2), 0.33333334, %v1574_v21  ;;  %v1590_v21 = vadd.f32 (!%p1811_p2), %v1526_v17, %v1462_v13 }
 0x25e   :  { %v1235_v37 = vpop.f32.mrb[126].mxu0  ;;  %v948_v38 = vpop.f32.mrb[127].mxu1  ;;  %v1514_v30 = vld [vmem:[%s2003_s26 + $0x68] sm:$0xff] (!%p1811_p2)  ;;  %v1639_v32 = vmul.f32 (!%p1811_p2), 0.33333334, %v1575_v22  ;;  %1701 = vst [vmem:[%s2008_s28 + $0x40] sm:$0xff] (!%p1811_p2), %v1637_v26  ;;  %v1591_v22 = vadd.f32 (!%p1811_p2), %v1527_v19, %v1463_v18 }
 0x25f   :  { %v1302_v39 = vmul.f32 %v2495_v15, %v1233_v33  ;;  %v1236_v40 = vadd.f32 %v1235_v37, %v946_v35  ;;  %v1237_v41 = vpop.f32.mrb[127].mxu0  ;;  %1436 = sbr.rel (%p1811_p2) target bundleno = 650 (0x28a), region = 59  ;;  %v1577_v33 = vadd.f32 (!%p1811_p2), %v1513_v28, %v1449_v25  ;;  %v1578_v34 = vadd.f32 (!%p1811_p2), %v1514_v30, %v1450_v29  ;;  %v1451_v35 = vld [vmem:[#allocation3 + $0x70] sm:$0xff] (!%p1811_p2)  ;;  %1702 = vst [vmem:[%s2008_s28 + $0x48] sm:$0xff] (!%p1811_p2), %v1638_v31  ;;  %v1528_v24 = vld [vmem:[%s2003_s26 + $0xd8] sm:$0xff] (!%p1811_p2)  ;;  %v1465_v25 = vld [vmem:[#allocation3 + $0xe0] sm:$0xff] (!%p1811_p2) }
 0x260   :  { %v1640_v37 = vmul.f32 (!%p1811_p2), 0.33333334, %v1576_v27  ;;  %v1453_v41 = vld [vmem:[#allocation3 + $0x80] sm:$0xff] (!%p1811_p2)  ;;  %1703 = vst [vmem:[%s2008_s28 + $0x50] sm:$0xff] (!%p1811_p2), %v1639_v32  ;;  %v1653_v26 = vmul.f32 (!%p1811_p2), 0.33333334, %v1589_v16  ;;  %v1592_v27 = vadd.f32 (!%p1811_p2), %v1528_v24, %v1464_v23 }
 0x261   :  { %v1366_v43 = vadd.f32 %v1302_v39, %v658_v36  ;;  %v1303_v44 = vmul.f32 %v2495_v15, %v1236_v40  ;;  %v1566_v15 = vadd.f32 (!%p1811_p2), %v1502_v49, %v1438_v3  ;;  %v1515_v36 = vld [vmem:[%s2003_s26 + $0x70] sm:$0xff] (!%p1811_p2)  ;;  %v1452_v39 = vld [vmem:[#allocation3 + $0x78] sm:$0xff] (!%p1811_p2)  ;;  %v1529_v28 = vld [vmem:[%s2003_s26 + $0xe0] sm:$0xff] (!%p1811_p2)  ;;  %1716 = vst [vmem:[%s2008_s28 + $0xb8] sm:$0xff] (!%p1811_p2), %v1652_v20  ;;  %v1654_v31 = vmul.f32 (!%p1811_p2), 0.33333334, %v1590_v21 }
 0x262   :  { %v1579_v38 = vadd.f32 (!%p1811_p2), %v1515_v36, %v1451_v35  ;;  %v1516_v40 = vld [vmem:[%s2003_s26 + $0x78] sm:$0xff] (!%p1811_p2)  ;;  %1704 = vst [vmem:[%s2008_s28 + $0x58] sm:$0xff] (!%p1811_p2), %v1640_v37  ;;  %v1455_v49 = vld [vmem:[#allocation3 + $0x90] sm:$0xff] (!%p1811_p2)  ;;  %v1466_v29 = vld [vmem:[#allocation3 + $0xe8] sm:$0xff] (!%p1811_p2)  ;;  %v1655_v32 = vmul.f32 (!%p1811_p2), 0.33333334, %v1591_v22 }
 0x263   :  { %1430 = vst [vmem:[#allocation3 + $0x1f0] sm:$0xff] %v1366_v43  ;;  %v1367_v45 = vadd.f32 %v1303_v44, %v659_v42  ;;  %v1630_v59 = vmul.f32 (!%p1811_p2), 0.33333334, %v1566_v15  ;;  %v1641_v42 = vmul.f32 (!%p1811_p2), 0.33333334, %v1577_v33  ;;  %v1580_v44 = vadd.f32 (!%p1811_p2), %v1516_v40, %v1452_v39  ;;  %v1530_v30 = vld [vmem:[%s2003_s26 + $0xe8] sm:$0xff] (!%p1811_p2) }
 0x264   :  { %v1642_v43 = vmul.f32 (!%p1811_p2), 0.33333334, %v1578_v34  ;;  %v1643_v47 = vmul.f32 (!%p1811_p2), 0.33333334, %v1579_v38  ;;  %v1582_v15 = vadd.f32 (!%p1811_p2), %v1518_v48, %v1454_v46  ;;  %v1583_v2 = vadd.f32 (!%p1811_p2), %v1519_v50, %v1455_v49  ;;  %v1467_v35 = vld [vmem:[#allocation3 + $0xf0] sm:$0xff] (!%p1811_p2)  ;;  %1717 = vst [vmem:[%s2008_s28 + $0xc0] sm:$0xff] (!%p1811_p2), %v1653_v26 }
 0x265   :  { %1431 = vst [vmem:[#allocation3 + $0x1f8] sm:$0xff] %v1367_v45  ;;  %1694 = vst [vmem:[%s2008_s28 + $0x8] sm:$0xff] (!%p1811_p2), %v1630_v59  ;;  %v1517_v45 = vld [vmem:[%s2003_s26 + $0x80] sm:$0xff] (!%p1811_p2)  ;;  %v1644_v1 = vmul.f32 (!%p1811_p2), 0.33333334, %v1580_v44  ;;  %v1593_v33 = vadd.f32 (!%p1811_p2), %v1529_v28, %v1465_v25  ;;  %v1594_v34 = vadd.f32 (!%p1811_p2), %v1530_v30, %v1466_v29  ;;  %v1531_v36 = vld [vmem:[%s2003_s26 + $0xf0] sm:$0xff] (!%p1811_p2) }
 0x266   :  { %v1581_v3 = vadd.f32 %v1517_v45, %v1453_v41  ;;  %1705 = vst [vmem:[%s2008_s28 + $0x60] sm:$0xff] %v1641_v42  ;;  %1706 = vst [vmem:[%s2008_s28 + $0x68] sm:$0xff] %v1642_v43  ;;  %v1646_v59 = vmul.f32 0.33333334, %v1582_v15  ;;  %v1647_v60 = vmul.f32 0.33333334, %v1583_v2  ;;  %v1595_v38 = vadd.f32 %v1531_v36, %v1467_v35 }
 0x267   :  { %1707 = vst [vmem:[%s2008_s28 + $0x70] sm:$0xff] %v1643_v47  ;;  %1708 = vst [vmem:[%s2008_s28 + $0x78] sm:$0xff] %v1644_v1  ;;  %v1656_v37 = vmul.f32 0.33333334, %v1592_v27  ;;  %v1468_v39 = vld [vmem:[#allocation3 + $0xf8] sm:$0xff]  ;;  %v1469_v41 = vld [vmem:[#allocation3 + $0x100] sm:$0xff] }
 0x268   :  { %v1645_v54 = vmul.f32 0.33333334, %v1581_v3  ;;  %1710 = vst [vmem:[%s2008_s28 + $0x88] sm:$0xff] %v1646_v59  ;;  %1711 = vst [vmem:[%s2008_s28 + $0x90] sm:$0xff] %v1647_v60  ;;  %v1532_v40 = vld [vmem:[%s2003_s26 + $0xf8] sm:$0xff]  ;;  %v1533_v45 = vld [vmem:[%s2003_s26 + $0x100] sm:$0xff] }
 0x269   :  { %1718 = vst [vmem:[%s2008_s28 + $0xc8] sm:$0xff] %v1654_v31  ;;  %1719 = vst [vmem:[%s2008_s28 + $0xd0] sm:$0xff] %v1655_v32  ;;  %v1657_v42 = vmul.f32 0.33333334, %v1593_v33  ;;  %v1658_v43 = vmul.f32 0.33333334, %v1594_v34  ;;  %v1596_v44 = vadd.f32 %v1532_v40, %v1468_v39  ;;  %v1597_v3 = vadd.f32 %v1533_v45, %v1469_v41 }
 0x26a   :  { %1709 = vst [vmem:[%s2008_s28 + $0x80] sm:$0xff] %v1645_v54  ;;  %v1470_v46 = vld [vmem:[#allocation3 + $0x108] sm:$0xff]  ;;  %1720 = vst [vmem:[%s2008_s28 + $0xd8] sm:$0xff] %v1656_v37  ;;  %v1659_v47 = vmul.f32 0.33333334, %v1595_v38  ;;  %v1471_v49 = vld [vmem:[#allocation3 + $0x110] sm:$0xff] }
 0x26b   :  { %v1534_v48 = vld [vmem:[%s2003_s26 + $0x108] sm:$0xff]  ;;  %v1535_v50 = vld [vmem:[%s2003_s26 + $0x110] sm:$0xff]  ;;  %1721 = vst [vmem:[%s2008_s28 + $0xe0] sm:$0xff] %v1657_v42  ;;  %1722 = vst [vmem:[%s2008_s28 + $0xe8] sm:$0xff] %v1658_v43  ;;  %v1660_v1 = vmul.f32 0.33333334, %v1596_v44 }
 0x26c   :  { %v1598_v15 = vadd.f32 %v1534_v48, %v1470_v46  ;;  %v1599_v2 = vadd.f32 %v1535_v50, %v1471_v49  ;;  %v1536_v52 = vld [vmem:[%s2003_s26 + $0x118] sm:$0xff]  ;;  %1723 = vst [vmem:[%s2008_s28 + $0xf0] sm:$0xff] %v1659_v47  ;;  %v1661_v54 = vmul.f32 0.33333334, %v1597_v3  ;;  %v1537_v56 = vld [vmem:[%s2003_s26 + $0x120] sm:$0xff]  ;;  %v1474_v57 = vld [vmem:[#allocation3 + $0x128] sm:$0xff] }
 0x26d   :  { %v1600_v55 = vadd.f32 %v1536_v52, %v1472_v51  ;;  %v1538_v58 = vld [vmem:[%s2003_s26 + $0x128] sm:$0xff]  ;;  %1724 = vst [vmem:[%s2008_s28 + $0xf8] sm:$0xff] %v1660_v1  ;;  %v1601_v61 = vadd.f32 %v1537_v56, %v1473_v53  ;;  %v1475_v63 = vld [vmem:[#allocation3 + $0x130] sm:$0xff]  ;;  %v1476_v6 = vld [vmem:[#allocation3 + $0x138] sm:$0xff] }
 0x26e   :  { %v1662_v59 = vmul.f32 0.33333334, %v1598_v15  ;;  %v1663_v60 = vmul.f32 0.33333334, %v1599_v2  ;;  %v1602_v62 = vadd.f32 %v1538_v58, %v1474_v57  ;;  %v1539_v0 = vld [vmem:[%s2003_s26 + $0x130] sm:$0xff]  ;;  %1725 = vst [vmem:[%s2008_s28 + $0x100] sm:$0xff] %v1661_v54 }
 0x26f   :  { %v1664_v4 = vmul.f32 0.33333334, %v1600_v55  ;;  %v1603_v5 = vadd.f32 %v1539_v0, %v1475_v63  ;;  %v1540_v7 = vld [vmem:[%s2003_s26 + $0x138] sm:$0xff]  ;;  %v1477_v8 = vld [vmem:[#allocation3 + $0x140] sm:$0xff]  ;;  %v1665_v9 = vmul.f32 0.33333334, %v1601_v61 }
 0x270   :  { %1726 = vst [vmem:[%s2008_s28 + $0x108] sm:$0xff] %v1662_v59  ;;  %1727 = vst [vmem:[%s2008_s28 + $0x110] sm:$0xff] %v1663_v60  ;;  %v1666_v10 = vmul.f32 0.33333334, %v1602_v62  ;;  %v1604_v11 = vadd.f32 %v1540_v7, %v1476_v6  ;;  %v1541_v12 = vld [vmem:[%s2003_s26 + $0x140] sm:$0xff]  ;;  %v1478_v13 = vld [vmem:[#allocation3 + $0x148] sm:$0xff] }
 0x271   :  { %1728 = vst [vmem:[%s2008_s28 + $0x118] sm:$0xff] %v1664_v4  ;;  %v1667_v14 = vmul.f32 0.33333334, %v1603_v5  ;;  %v1605_v16 = vadd.f32 %v1541_v12, %v1477_v8  ;;  %v1542_v17 = vld [vmem:[%s2003_s26 + $0x148] sm:$0xff]  ;;  %v1479_v18 = vld [vmem:[#allocation3 + $0x150] sm:$0xff]  ;;  %1729 = vst [vmem:[%s2008_s28 + $0x120] sm:$0xff] %v1665_v9 }
 0x272   :  { %v1543_v19 = vld [vmem:[%s2003_s26 + $0x150] sm:$0xff]  ;;  %1730 = vst [vmem:[%s2008_s28 + $0x128] sm:$0xff] %v1666_v10  ;;  %v1668_v20 = vmul.f32 0.33333334, %v1604_v11  ;;  %v1606_v21 = vadd.f32 %v1542_v17, %v1478_v13  ;;  %v1480_v23 = vld [vmem:[#allocation3 + $0x158] sm:$0xff]  ;;  %v1481_v25 = vld [vmem:[#allocation3 + $0x160] sm:$0xff] }
 0x273   :  { %v1607_v22 = vadd.f32 %v1543_v19, %v1479_v18  ;;  %v1544_v24 = vld [vmem:[%s2003_s26 + $0x158] sm:$0xff]  ;;  %1731 = vst [vmem:[%s2008_s28 + $0x130] sm:$0xff] %v1667_v14  ;;  %v1669_v26 = vmul.f32 0.33333334, %v1605_v16  ;;  %v1545_v28 = vld [vmem:[%s2003_s26 + $0x160] sm:$0xff]  ;;  %v1482_v29 = vld [vmem:[#allocation3 + $0x168] sm:$0xff] }
 0x274   :  { %v1608_v27 = vadd.f32 %v1544_v24, %v1480_v23  ;;  %v1546_v30 = vld [vmem:[%s2003_s26 + $0x168] sm:$0xff]  ;;  %1732 = vst [vmem:[%s2008_s28 + $0x138] sm:$0xff] %v1668_v20  ;;  %v1670_v31 = vmul.f32 0.33333334, %v1606_v21  ;;  %v1609_v33 = vadd.f32 %v1545_v28, %v1481_v25  ;;  %v1483_v35 = vld [vmem:[#allocation3 + $0x170] sm:$0xff]  ;;  %v1484_v39 = vld [vmem:[#allocation3 + $0x178] sm:$0xff] }
 0x275   :  { %v1671_v32 = vmul.f32 0.33333334, %v1607_v22  ;;  %v1610_v34 = vadd.f32 %v1546_v30, %v1482_v29  ;;  %v1547_v36 = vld [vmem:[%s2003_s26 + $0x170] sm:$0xff]  ;;  %1733 = vst [vmem:[%s2008_s28 + $0x140] sm:$0xff] %v1669_v26  ;;  %v1548_v40 = vld [vmem:[%s2003_s26 + $0x178] sm:$0xff]  ;;  %v1485_v41 = vld [vmem:[#allocation3 + $0x180] sm:$0xff] }
 0x276   :  { %v1672_v37 = vmul.f32 0.33333334, %v1608_v27  ;;  %v1611_v38 = vadd.f32 %v1547_v36, %v1483_v35  ;;  %1734 = vst [vmem:[%s2008_s28 + $0x148] sm:$0xff] %v1670_v31  ;;  %v1673_v42 = vmul.f32 0.33333334, %v1609_v33  ;;  %v1612_v44 = vadd.f32 %v1548_v40, %v1484_v39  ;;  %v1549_v45 = vld [vmem:[%s2003_s26 + $0x180] sm:$0xff] }
 0x277   :  { %1735 = vst [vmem:[%s2008_s28 + $0x150] sm:$0xff] %v1671_v32  ;;  %v1674_v43 = vmul.f32 0.33333334, %v1610_v34  ;;  %v1486_v46 = vld [vmem:[#allocation3 + $0x188] sm:$0xff]  ;;  %v1613_v3 = vadd.f32 %v1549_v45, %v1485_v41  ;;  %v1487_v49 = vld [vmem:[#allocation3 + $0x190] sm:$0xff]  ;;  %v1488_v51 = vld [vmem:[#allocation3 + $0x198] sm:$0xff] }
 0x278   :  { %1736 = vst [vmem:[%s2008_s28 + $0x158] sm:$0xff] %v1672_v37  ;;  %v1675_v47 = vmul.f32 0.33333334, %v1611_v38  ;;  %v1550_v48 = vld [vmem:[%s2003_s26 + $0x188] sm:$0xff]  ;;  %v1551_v50 = vld [vmem:[%s2003_s26 + $0x190] sm:$0xff]  ;;  %1737 = vst [vmem:[%s2008_s28 + $0x160] sm:$0xff] %v1673_v42 }
 0x279   :  { %1738 = vst [vmem:[%s2008_s28 + $0x168] sm:$0xff] %v1674_v43  ;;  %v1676_v1 = vmul.f32 0.33333334, %v1612_v44  ;;  %v1614_v15 = vadd.f32 %v1550_v48, %v1486_v46  ;;  %v1615_v2 = vadd.f32 %v1551_v50, %v1487_v49  ;;  %v1552_v52 = vld [vmem:[%s2003_s26 + $0x198] sm:$0xff]  ;;  %v1489_v53 = vld [vmem:[#allocation3 + $0x1a0] sm:$0xff]  ;;  %v1490_v57 = vld [vmem:[#allocation3 + $0x1a8] sm:$0xff] }
 0x27a   :  { %1739 = vst [vmem:[%s2008_s28 + $0x170] sm:$0xff] %v1675_v47  ;;  %v1677_v54 = vmul.f32 0.33333334, %v1613_v3  ;;  %v1616_v55 = vadd.f32 %v1552_v52, %v1488_v51  ;;  %v1553_v56 = vld [vmem:[%s2003_s26 + $0x1a0] sm:$0xff]  ;;  %v1554_v58 = vld [vmem:[%s2003_s26 + $0x1a8] sm:$0xff]  ;;  %v1491_v63 = vld [vmem:[#allocation3 + $0x1b0] sm:$0xff] }
 0x27b   :  { %1740 = vst [vmem:[%s2008_s28 + $0x178] sm:$0xff] %v1676_v1  ;;  %v1678_v59 = vmul.f32 0.33333334, %v1614_v15  ;;  %v1679_v60 = vmul.f32 0.33333334, %v1615_v2  ;;  %v1617_v61 = vadd.f32 %v1553_v56, %v1489_v53  ;;  %v1618_v62 = vadd.f32 %v1554_v58, %v1490_v57  ;;  %v1555_v0 = vld [vmem:[%s2003_s26 + $0x1b0] sm:$0xff] }
 0x27c   :  { %1741 = vst [vmem:[%s2008_s28 + $0x180] sm:$0xff] %v1677_v54  ;;  %v1680_v4 = vmul.f32 0.33333334, %v1616_v55  ;;  %v1619_v5 = vadd.f32 %v1555_v0, %v1491_v63  ;;  %v1492_v6 = vld [vmem:[#allocation3 + $0x1b8] sm:$0xff]  ;;  %v1493_v8 = vld [vmem:[#allocation3 + $0x1c0] sm:$0xff]  ;;  %v1494_v13 = vld [vmem:[#allocation3 + $0x1c8] sm:$0xff] }
 0x27d   :  { %v1556_v7 = vld [vmem:[%s2003_s26 + $0x1b8] sm:$0xff]  ;;  %1742 = vst [vmem:[%s2008_s28 + $0x188] sm:$0xff] %v1678_v59  ;;  %1743 = vst [vmem:[%s2008_s28 + $0x190] sm:$0xff] %v1679_v60  ;;  %v1681_v9 = vmul.f32 0.33333334, %v1617_v61  ;;  %v1557_v12 = vld [vmem:[%s2003_s26 + $0x1c0] sm:$0xff] }
 0x27e   :  { %v1682_v10 = vmul.f32 0.33333334, %v1618_v62  ;;  %v1620_v11 = vadd.f32 %v1556_v7, %v1492_v6  ;;  %1744 = vst [vmem:[%s2008_s28 + $0x198] sm:$0xff] %v1680_v4  ;;  %v1683_v14 = vmul.f32 0.33333334, %v1619_v5  ;;  %v1621_v16 = vadd.f32 %v1557_v12, %v1493_v8  ;;  %v1558_v17 = vld [vmem:[%s2003_s26 + $0x1c8] sm:$0xff] }
 0x27f   :  { %v1495_v18 = vld [vmem:[#allocation3 + $0x1d0] sm:$0xff]  ;;  %1745 = vst [vmem:[%s2008_s28 + $0x1a0] sm:$0xff] %v1681_v9  ;;  %v1622_v21 = vadd.f32 %v1558_v17, %v1494_v13  ;;  %v1496_v23 = vld [vmem:[#allocation3 + $0x1d8] sm:$0xff]  ;;  %v1497_v25 = vld [vmem:[#allocation3 + $0x1e0] sm:$0xff] }
 0x280   :  { %v1559_v19 = vld [vmem:[%s2003_s26 + $0x1d0] sm:$0xff]  ;;  %1746 = vst [vmem:[%s2008_s28 + $0x1a8] sm:$0xff] %v1682_v10  ;;  %v1684_v20 = vmul.f32 0.33333334, %v1620_v11  ;;  %v1560_v24 = vld [vmem:[%s2003_s26 + $0x1d8] sm:$0xff]  ;;  %1747 = vst [vmem:[%s2008_s28 + $0x1b0] sm:$0xff] %v1683_v14 }
 0x281   :  { %v1623_v22 = vadd.f32 %v1559_v19, %v1495_v18  ;;  %v1685_v26 = vmul.f32 0.33333334, %v1621_v16  ;;  %v1624_v27 = vadd.f32 %v1560_v24, %v1496_v23  ;;  %v1561_v28 = vld [vmem:[%s2003_s26 + $0x1e0] sm:$0xff]  ;;  %v1498_v29 = vld [vmem:[#allocation3 + $0x1e8] sm:$0xff]  ;;  %v1686_v31 = vmul.f32 0.33333334, %v1622_v21 }
 0x282   :  { %v1562_v30 = vld [vmem:[%s2003_s26 + $0x1e8] sm:$0xff]  ;;  %1748 = vst [vmem:[%s2008_s28 + $0x1b8] sm:$0xff] %v1684_v20  ;;  %v1625_v33 = vadd.f32 %v1561_v28, %v1497_v25  ;;  %v1499_v35 = vld [vmem:[#allocation3 + $0x1f0] sm:$0xff]  ;;  %v1500_v39 = vld [vmem:[#allocation3 + $0x1f8] sm:$0xff] }
 0x283   :  { %v1687_v32 = vmul.f32 0.33333334, %v1623_v22  ;;  %v1626_v34 = vadd.f32 %v1562_v30, %v1498_v29  ;;  %v1563_v36 = vld [vmem:[%s2003_s26 + $0x1f0] sm:$0xff]  ;;  %1749 = vst [vmem:[%s2008_s28 + $0x1c0] sm:$0xff] %v1685_v26  ;;  %v1688_v37 = vmul.f32 0.33333334, %v1624_v27 }
 0x284   :  { %v1627_v38 = vadd.f32 %v1563_v36, %v1499_v35  ;;  %v1564_v40 = vld [vmem:[%s2003_s26 + $0x1f8] sm:$0xff]  ;;  %1750 = vst [vmem:[%s2008_s28 + $0x1c8] sm:$0xff] %v1686_v31  ;;  %v1689_v41 = vmul.f32 0.33333334, %v1625_v33 }
 0x285   :  { %1751 = vst [vmem:[%s2008_s28 + $0x1d0] sm:$0xff] %v1687_v32  ;;  %v1690_v42 = vmul.f32 0.33333334, %v1626_v34  ;;  %v1628_v43 = vadd.f32 %v1564_v40, %v1500_v39  ;;  %1752 = vst [vmem:[%s2008_s28 + $0x1d8] sm:$0xff] %v1688_v37 }
 0x286   :  { %v1691_v44 = vmul.f32 0.33333334, %v1627_v38  ;;  %1753 = vst [vmem:[%s2008_s28 + $0x1e0] sm:$0xff] %v1689_v41 }
 0x287   :  { %1754 = vst [vmem:[%s2008_s28 + $0x1e8] sm:$0xff] %v1690_v42  ;;  %v1692_v45 = vmul.f32 0.33333334, %v1628_v43 }
 0x288   :  { %1755 = vst [vmem:[%s2008_s28 + $0x1f0] sm:$0xff] %v1691_v44 }
 0x289   :  { %1756 = vst [vmem:[%s2008_s28 + $0x1f8] sm:$0xff] %v1692_v45 }
 0x28a PF:  { %1775 = vsyncmov [#allocation4] }
 0x28d   :  { %s1776_s13 = vpop.sfrf %1775 }
 0x28e   :  { %p1812_p3 = scmp.ne.s32.totalorder %s1776_s13, 0 }
 0x290   :  { %1780 = shalt.err (%p1812_p3)  }

</bundles_post_ra>
